<compile_context>
chip_gen: v7x
topology: tpu7x:2x2x1
jax: 0.10.0
libtpu: 0.0.40
codegen_flags: <defaults>
</compile_context>

<pallas_src>
import functools

import jax
import jax.numpy as jnp
from jax.experimental import pallas as pl
from jax.experimental.pallas import tpu as pltpu


NUM_LAYERS = 3


# ----------------------------------------------------------------------------- kernel
def _lstm_head_kernel(x_ref,                      # (T*B, D)  f32, time-major rows
                      wih0_ref, b0_ref,           # (D, 4H) bf16, (1, 4H) f32
                      whh0_ref,                   # (H, 4H) bf16   layer-0 recurrent
                      wcat1_ref, b1_ref,          # (2H, 4H) bf16, (1, 4H) f32  layer 1 fused [Wih;Whh]
                      wcat2_ref, b2_ref,          # (2H, 4H) bf16, (1, 4H) f32  layer 2 fused
                      wh1_ref, bh1_ref,           # (H, 32) bf16, (1, 32) f32   head linear1
                      wh2_ref, bh2_ref,           # (1, 32) f32,  (1, 1) f32    head linear2
                      out_ref,                    # (B, 1) f32
                      *, seq_len, batch):
    T, B = seq_len, batch
    H4 = whh0_ref.shape[1]
    H = H4 // 4
    mxu_dt = whh0_ref.dtype

    # Layer-0 input projection: depends only on x, so it sits OFF the serial
    # h(t) -> h(t+1) chain.  One (T*B, D) x (D, 4H) matmul, time-major rows.
    gx0 = jnp.dot(x_ref[...].astype(mxu_dt), wih0_ref[...],
                  preferred_element_type=jnp.float32) + b0_ref[...]        # (T*B, 4H)

    # Hoisted bias broadcasts (JAX does not CSE broadcast_in_dim).
    b1b = jnp.broadcast_to(b1_ref[...], (B, H4))
    b2b = jnp.broadcast_to(b2_ref[...], (B, H4))

    def lstm_cell(gates, c_prev):
        # torch gate order i, f, g, o; 64-lane slices (cheap lane selects).
        i_g = jax.nn.sigmoid(gates[:, 0 * H:1 * H])
        f_g = jax.nn.sigmoid(gates[:, 1 * H:2 * H])
        g_g = jnp.tanh(gates[:, 2 * H:3 * H])
        o_g = jax.nn.sigmoid(gates[:, 3 * H:4 * H])
        c_new = f_g * c_prev + i_g * g_g
        h_new = o_g * jnp.tanh(c_new)
        return h_new, c_new

    zero = jnp.zeros((B, H), jnp.float32)         # torch default h0 = c0 = 0
    h0 = h1 = h2 = zero
    c0 = c1 = c2 = zero

    # Wavefront: wave w runs layer0@t=w, layer1@t=w-1, layer2@t=w-2.
    # All gate pre-activations of a wave read only end-of-previous-wave state, so
    # the three matmuls are mutually independent; cell updates follow afterwards.
    # T is a compile-time constant -> full static unroll (LLO gets full visibility).
    for w in range(T + 2):
        do0 = w < T
        do1 = 1 <= w <= T
        do2 = 2 <= w <= T + 1

        if do0:
            g0 = gx0[w * B:(w + 1) * B, :] + jnp.dot(
                h0.astype(mxu_dt), whh0_ref[...],
                preferred_element_type=jnp.float32)
        if do1:
            cat1 = jnp.concatenate([h0, h1], axis=1).astype(mxu_dt)        # (B, 2H)
            g1 = jnp.dot(cat1, wcat1_ref[...],
                         preferred_element_type=jnp.float32) + b1b
        if do2:
            cat2 = jnp.concatenate([h1, h2], axis=1).astype(mxu_dt)        # (B, 2H)
            g2 = jnp.dot(cat2, wcat2_ref[...],
                         preferred_element_type=jnp.float32) + b2b

        if do0:
            h0, c0 = lstm_cell(g0, c0)
        if do1:
            h1, c1 = lstm_cell(g1, c1)
        if do2:
            h2, c2 = lstm_cell(g2, c2)

    # head: Linear(64,32) -> ReLU -> Dropout(eval: identity) -> Linear(32,1) -> sigmoid
    z1 = jnp.dot(h2.astype(mxu_dt), wh1_ref[...],
                 preferred_element_type=jnp.float32) + bh1_ref[...]
    z1 = jnp.maximum(z1, 0.0)
    # TODO(synk): training-mode dropout (head + inter-layer LSTM dropout) not applied; eval() semantics.
    z2 = jnp.sum(z1 * wh2_ref[...], axis=1, keepdims=True) + bh2_ref[...]
    out_ref[...] = jax.nn.sigmoid(z2)


# ----------------------------------------------------------------------------- wrapper
@jax.jit
def complex_diabetes_lstm_forward(x_btd, packed):
    """x_btd: (B, T, D) float32, batch-first like the PyTorch module."""
    B, T, D = x_btd.shape

    # Time-major row layout for the in-kernel layer-0 input projection.
    # (Tiny: T*B*D*4 bytes; the big gx0 matmul + HBM round trip is now in-kernel.)
    x_tb = jnp.transpose(x_btd, (1, 0, 2)).reshape(T * B, D)

    vmem = pl.BlockSpec(memory_space=pltpu.MemorySpace.VMEM)
    kernel = functools.partial(_lstm_head_kernel, seq_len=T, batch=B)

    # Gridless call: total resident data is << 1 MiB, so no tiling / pipelining.
    # (If B >> 2, add a parallel batch grid so v7x's 2nd TensorCore helps.)
    return pl.pallas_call(
        kernel,
        out_shape=jax.ShapeDtypeStruct((B, 1), jnp.float32),
        in_specs=[vmem] * 12,
        out_specs=vmem,
    )(x_tb,
      packed["wih0"], packed["b0"], packed["whh0"],
      packed["wcat1"], packed["b1"],
      packed["wcat2"], packed["b2"],
      packed["wh1"], packed["bh1"], packed["wh2"], packed["bh2"])


# ----------------------------------------------------------------------------- params
def init_params(key, input_size, hidden=64, mid=32, out=1):
    """Deterministic synthetic parameters, raw torch.nn.LSTM / Linear layout."""
    ks = jax.random.split(key, 4 * NUM_LAYERS + 4)
    k = iter(ks)
    scale = 1.0 / jnp.sqrt(jnp.float32(hidden))
    lstm = []
    for layer in range(NUM_LAYERS):
        in_l = input_size if layer == 0 else hidden
        w_ih = jax.random.uniform(next(k), (4 * hidden, in_l), jnp.float32, -scale, scale)
        w_hh = jax.random.uniform(next(k), (4 * hidden, hidden), jnp.float32, -scale, scale)
        b_ih = jax.random.uniform(next(k), (4 * hidden,), jnp.float32, -scale, scale)
        b_hh = jax.random.uniform(next(k), (4 * hidden,), jnp.float32, -scale, scale)
        lstm.append((w_ih, w_hh, b_ih, b_hh))
    w1 = jax.random.uniform(next(k), (mid, hidden), jnp.float32, -scale, scale)
    b1 = jax.random.uniform(next(k), (mid,), jnp.float32, -scale, scale)
    w2 = jax.random.uniform(next(k), (out, mid), jnp.float32, -scale, scale)
    b2 = jax.random.uniform(next(k), (out,), jnp.float32, -scale, scale)
    return {"lstm": lstm, "w1": w1, "b1": b1, "w2": w2, "b2": b2}


def pack_params(raw, hidden=64, mxu_dtype=jnp.bfloat16):
    """Fuse per-layer weights ([Wih; Whh] for layers 1/2) and pre-cast MXU operands.

    No gate lane padding: gates are 4*H lanes, h/c are H lanes.
    If closer fidelity to the f32 torch module is required, pass mxu_dtype=jnp.float32.
    """
    w_ih0, w_hh0, b_ih0, b_hh0 = raw["lstm"][0]
    packed = {
        "wih0": w_ih0.T.astype(mxu_dtype),                          # (D, 4H)
        "whh0": w_hh0.T.astype(mxu_dtype),                          # (H, 4H)
        "b0": (b_ih0 + b_hh0)[None, :].astype(jnp.float32),         # (1, 4H)
    }
    for idx, layer in enumerate((1, 2), start=1):
        w_ih, w_hh, b_ih, b_hh = raw["lstm"][layer]
        packed[f"wcat{idx}"] = jnp.concatenate(
            [w_ih.T, w_hh.T], axis=0).astype(mxu_dtype)             # (2H, 4H)
        packed[f"b{idx}"] = (b_ih + b_hh)[None, :].astype(jnp.float32)
    packed["wh1"] = raw["w1"].T.astype(mxu_dtype)                   # (H, 32)
    packed["bh1"] = raw["b1"][None, :].astype(jnp.float32)          # (1, 32)
    packed["wh2"] = raw["w2"].astype(jnp.float32)                   # (1, 32)
    packed["bh2"] = raw["b2"][None, :].astype(jnp.float32)          # (1, 1)
    return packed


# ----------------------------------------------------------------------------- reference
def reference_forward(x_btd, raw, hidden=64, mxu_dtype=jnp.float32):
    """Pure-JAX reference mirroring torch eval() semantics.

    mxu_dtype=float32  -> faithful f32 reference of the PyTorch module.
    mxu_dtype=bfloat16 -> matched matmul precision (bf16 operands, f32 accumulate),
                          mirroring the kernel.
    """
    B, T, _ = x_btd.shape
    H = hidden

    def mm(a, b):
        return jnp.dot(a.astype(mxu_dtype), b.astype(mxu_dtype),
                       preferred_element_type=jnp.float32)

    h = [jnp.zeros((B, H), jnp.float32) for _ in range(NUM_LAYERS)]
    c = [jnp.zeros((B, H), jnp.float32) for _ in range(NUM_LAYERS)]
    for t in range(T):
        layer_in = x_btd[:, t, :]
        for layer in range(NUM_LAYERS):
            w_ih, w_hh, b_ih, b_hh = raw["lstm"][layer]
            gates = mm(layer_in, w_ih.T) + mm(h[layer], w_hh.T) + (b_ih + b_hh)
            i_g = jax.nn.sigmoid(gates[:, 0 * H:1 * H])
            f_g = jax.nn.sigmoid(gates[:, 1 * H:2 * H])
            g_g = jnp.tanh(gates[:, 2 * H:3 * H])
            o_g = jax.nn.sigmoid(gates[:, 3 * H:4 * H])
            c[layer] = f_g * c[layer] + i_g * g_g
            h[layer] = o_g * jnp.tanh(c[layer])
            layer_in = h[layer]
    z1 = jnp.maximum(mm(h[-1], raw["w1"].T) + raw["b1"], 0.0)
    z2 = z1 @ raw["w2"].T + raw["b2"]
    return jax.nn.sigmoid(z2)


# ----------------------------------------------------------------------------- main
if __name__ == "__main__":
    B, T, D, H = 2, 8, 8, 64                     # batch, seq, input_size, hidden
    key = jax.random.PRNGKey(0)
    kx, kp = jax.random.split(key)
    x = jax.random.normal(kx, (B, T, D), jnp.float32)
    raw = init_params(kp, input_size=D, hidden=H)
    packed = pack_params(raw, hidden=H, mxu_dtype=jnp.bfloat16)   # bf16 MXU operands

    out = jax.block_until_ready(complex_diabetes_lstm_forward(x, packed))
    assert out.shape == (B, 1)

    # Tight check vs matched-precision reference (same bf16 MXU operand precision).
    ref_matched = reference_forward(x, raw, hidden=H, mxu_dtype=jnp.bfloat16)
    assert jnp.allclose(out, ref_matched, atol=2e-3, rtol=2e-3), (out, ref_matched)

    # Loose check vs the faithful f32 PyTorch-equivalent reference.
    ref_f32 = reference_forward(x, raw, hidden=H, mxu_dtype=jnp.float32)
    assert jnp.allclose(out, ref_f32, atol=3e-2, rtol=3e-2), (out, ref_f32)

    print("KERNEL_OK")
</pallas_src>

<mosaic_0001>
module attributes {stable_mosaic.version = 11 : i64} {
  func.func @_lstm_head_kernel(%arg0: memref<16x8xf32, #tpu.memory_space<vmem>>, %arg1: memref<8x256xbf16, #tpu.memory_space<vmem>>, %arg2: memref<1x256xf32, #tpu.memory_space<vmem>>, %arg3: memref<64x256xbf16, #tpu.memory_space<vmem>>, %arg4: memref<128x256xbf16, #tpu.memory_space<vmem>>, %arg5: memref<1x256xf32, #tpu.memory_space<vmem>>, %arg6: memref<128x256xbf16, #tpu.memory_space<vmem>>, %arg7: memref<1x256xf32, #tpu.memory_space<vmem>>, %arg8: memref<64x32xbf16, #tpu.memory_space<vmem>>, %arg9: memref<1x32xf32, #tpu.memory_space<vmem>>, %arg10: memref<1x32xf32, #tpu.memory_space<vmem>>, %arg11: memref<1x1xf32, #tpu.memory_space<vmem>>, %arg12: memref<2x1xf32, #tpu.memory_space<vmem>>) attributes {dimension_semantics = [], scalar_prefetch = 0 : i64, scratch_operands = 0 : i64, tpu.core_type = #tpu.core_type<tc>} {
    %c0 = arith.constant 0 : index
    %c0_0 = arith.constant 0 : index
    %0 = vector.load %arg0[%c0, %c0_0] : memref<16x8xf32, #tpu.memory_space<vmem>>, vector<16x8xf32>
    %1 = arith.truncf %0 : vector<16x8xf32> to vector<16x8xbf16>
    %c0_1 = arith.constant 0 : index
    %c0_2 = arith.constant 0 : index
    %2 = vector.load %arg1[%c0_1, %c0_2] : memref<8x256xbf16, #tpu.memory_space<vmem>>, vector<8x256xbf16>
    %cst = arith.constant dense<0.000000e+00> : vector<16x256xf32>
    %3 = tpu.matmul %1, %2, %cst {dimension_numbers = #tpu.dot_dimension_numbers<[1], [0], [0], [1], [0, 0, 1, 1], [], []>} : vector<16x8xbf16>, vector<8x256xbf16>, vector<16x256xf32> -> vector<16x256xf32>
    %c0_3 = arith.constant 0 : index
    %c0_4 = arith.constant 0 : index
    %4 = vector.load %arg2[%c0_3, %c0_4] : memref<1x256xf32, #tpu.memory_space<vmem>>, vector<1x256xf32>
    %5 = vector.broadcast %4 : vector<1x256xf32> to vector<16x256xf32>
    %6 = arith.addf %3, %5 : vector<16x256xf32>
    %c0_5 = arith.constant 0 : index
    %c0_6 = arith.constant 0 : index
    %7 = vector.load %arg5[%c0_5, %c0_6] : memref<1x256xf32, #tpu.memory_space<vmem>>, vector<1x256xf32>
    %8 = vector.shape_cast %7 : vector<1x256xf32> to vector<1x256xf32>
    %9 = vector.broadcast %8 : vector<1x256xf32> to vector<2x256xf32>
    %c0_7 = arith.constant 0 : index
    %c0_8 = arith.constant 0 : index
    %10 = vector.load %arg7[%c0_7, %c0_8] : memref<1x256xf32, #tpu.memory_space<vmem>>, vector<1x256xf32>
    %11 = vector.shape_cast %10 : vector<1x256xf32> to vector<1x256xf32>
    %12 = vector.broadcast %11 : vector<1x256xf32> to vector<2x256xf32>
    %cst_9 = arith.constant 0.000000e+00 : f32
    %13 = vector.broadcast %cst_9 : f32 to vector<2x64xf32>
    %14 = vector.extract_strided_slice %6 {offsets = [0, 0], sizes = [2, 256], strides = [1, 1]} : vector<16x256xf32> to vector<2x256xf32>
    %15 = arith.truncf %13 : vector<2x64xf32> to vector<2x64xbf16>
    %c0_10 = arith.constant 0 : index
    %c0_11 = arith.constant 0 : index
    %16 = vector.load %arg3[%c0_10, %c0_11] : memref<64x256xbf16, #tpu.memory_space<vmem>>, vector<64x256xbf16>
    %cst_12 = arith.constant dense<0.000000e+00> : vector<2x256xf32>
    %17 = tpu.matmul %15, %16, %cst_12 {dimension_numbers = #tpu.dot_dimension_numbers<[1], [0], [0], [1], [0, 0, 1, 1], [], []>} : vector<2x64xbf16>, vector<64x256xbf16>, vector<2x256xf32> -> vector<2x256xf32>
    %18 = arith.addf %14, %17 : vector<2x256xf32>
    %19 = vector.extract_strided_slice %18 {offsets = [0, 0], sizes = [2, 64], strides = [1, 1]} : vector<2x256xf32> to vector<2x64xf32>
    %20 = arith.negf %19 : vector<2x64xf32>
    %21 = math.exp %20 : vector<2x64xf32>
    %cst_13 = arith.constant 1.000000e+00 : f32
    %22 = vector.broadcast %cst_13 : f32 to vector<2x64xf32>
    %23 = arith.addf %22, %21 : vector<2x64xf32>
    %24 = arith.divf %22, %23 : vector<2x64xf32>
    %25 = vector.extract_strided_slice %18 {offsets = [0, 64], sizes = [2, 64], strides = [1, 1]} : vector<2x256xf32> to vector<2x64xf32>
    %26 = arith.negf %25 : vector<2x64xf32>
    %27 = math.exp %26 : vector<2x64xf32>
    %cst_14 = arith.constant 1.000000e+00 : f32
    %28 = vector.broadcast %cst_14 : f32 to vector<2x64xf32>
    %29 = arith.addf %28, %27 : vector<2x64xf32>
    %30 = arith.divf %28, %29 : vector<2x64xf32>
    %31 = vector.extract_strided_slice %18 {offsets = [0, 128], sizes = [2, 64], strides = [1, 1]} : vector<2x256xf32> to vector<2x64xf32>
    %32 = math.tanh %31 : vector<2x64xf32>
    %33 = vector.extract_strided_slice %18 {offsets = [0, 192], sizes = [2, 64], strides = [1, 1]} : vector<2x256xf32> to vector<2x64xf32>
    %34 = arith.negf %33 : vector<2x64xf32>
    %35 = math.exp %34 : vector<2x64xf32>
    %cst_15 = arith.constant 1.000000e+00 : f32
    %36 = vector.broadcast %cst_15 : f32 to vector<2x64xf32>
    %37 = arith.addf %36, %35 : vector<2x64xf32>
    %38 = arith.divf %36, %37 : vector<2x64xf32>
    %39 = arith.mulf %30, %13 : vector<2x64xf32>
    %40 = arith.mulf %24, %32 : vector<2x64xf32>
    %41 = arith.addf %39, %40 : vector<2x64xf32>
    %42 = math.tanh %41 : vector<2x64xf32>
    %43 = arith.mulf %38, %42 : vector<2x64xf32>
    %44 = vector.extract_strided_slice %6 {offsets = [2, 0], sizes = [2, 256], strides = [1, 1]} : vector<16x256xf32> to vector<2x256xf32>
    %45 = arith.truncf %43 : vector<2x64xf32> to vector<2x64xbf16>
    %c0_16 = arith.constant 0 : index
    %c0_17 = arith.constant 0 : index
    %46 = vector.load %arg3[%c0_16, %c0_17] : memref<64x256xbf16, #tpu.memory_space<vmem>>, vector<64x256xbf16>
    %cst_18 = arith.constant dense<0.000000e+00> : vector<2x256xf32>
    %47 = tpu.matmul %45, %46, %cst_18 {dimension_numbers = #tpu.dot_dimension_numbers<[1], [0], [0], [1], [0, 0, 1, 1], [], []>} : vector<2x64xbf16>, vector<64x256xbf16>, vector<2x256xf32> -> vector<2x256xf32>
    %48 = arith.addf %44, %47 : vector<2x256xf32>
    %49 = tpu.concatenate %43, %13 in 1 : vector<2x64xf32>, vector<2x64xf32> -> vector<2x128xf32>
    %50 = arith.truncf %49 : vector<2x128xf32> to vector<2x128xbf16>
    %c0_19 = arith.constant 0 : index
    %c0_20 = arith.constant 0 : index
    %51 = vector.load %arg4[%c0_19, %c0_20] : memref<128x256xbf16, #tpu.memory_space<vmem>>, vector<128x256xbf16>
    %cst_21 = arith.constant dense<0.000000e+00> : vector<2x256xf32>
    %52 = tpu.matmul %50, %51, %cst_21 {dimension_numbers = #tpu.dot_dimension_numbers<[1], [0], [0], [1], [0, 0, 1, 1], [], []>} : vector<2x128xbf16>, vector<128x256xbf16>, vector<2x256xf32> -> vector<2x256xf32>
    %53 = arith.addf %52, %9 : vector<2x256xf32>
    %54 = vector.extract_strided_slice %48 {offsets = [0, 0], sizes = [2, 64], strides = [1, 1]} : vector<2x256xf32> to vector<2x64xf32>
    %55 = arith.negf %54 : vector<2x64xf32>
    %56 = math.exp %55 : vector<2x64xf32>
    %cst_22 = arith.constant 1.000000e+00 : f32
    %57 = vector.broadcast %cst_22 : f32 to vector<2x64xf32>
    %58 = arith.addf %57, %56 : vector<2x64xf32>
    %59 = arith.divf %57, %58 : vector<2x64xf32>
    %60 = vector.extract_strided_slice %48 {offsets = [0, 64], sizes = [2, 64], strides = [1, 1]} : vector<2x256xf32> to vector<2x64xf32>
    %61 = arith.negf %60 : vector<2x64xf32>
    %62 = math.exp %61 : vector<2x64xf32>
    %cst_23 = arith.constant 1.000000e+00 : f32
    %63 = vector.broadcast %cst_23 : f32 to vector<2x64xf32>
    %64 = arith.addf %63, %62 : vector<2x64xf32>
    %65 = arith.divf %63, %64 : vector<2x64xf32>
    %66 = vector.extract_strided_slice %48 {offsets = [0, 128], sizes = [2, 64], strides = [1, 1]} : vector<2x256xf32> to vector<2x64xf32>
    %67 = math.tanh %66 : vector<2x64xf32>
    %68 = vector.extract_strided_slice %48 {offsets = [0, 192], sizes = [2, 64], strides = [1, 1]} : vector<2x256xf32> to vector<2x64xf32>
    %69 = arith.negf %68 : vector<2x64xf32>
    %70 = math.exp %69 : vector<2x64xf32>
    %cst_24 = arith.constant 1.000000e+00 : f32
    %71 = vector.broadcast %cst_24 : f32 to vector<2x64xf32>
    %72 = arith.addf %71, %70 : vector<2x64xf32>
    %73 = arith.divf %71, %72 : vector<2x64xf32>
    %74 = arith.mulf %65, %41 : vector<2x64xf32>
    %75 = arith.mulf %59, %67 : vector<2x64xf32>
    %76 = arith.addf %74, %75 : vector<2x64xf32>
    %77 = math.tanh %76 : vector<2x64xf32>
    %78 = arith.mulf %73, %77 : vector<2x64xf32>
    %79 = vector.extract_strided_slice %53 {offsets = [0, 0], sizes = [2, 64], strides = [1, 1]} : vector<2x256xf32> to vector<2x64xf32>
    %80 = arith.negf %79 : vector<2x64xf32>
    %81 = math.exp %80 : vector<2x64xf32>
    %cst_25 = arith.constant 1.000000e+00 : f32
    %82 = vector.broadcast %cst_25 : f32 to vector<2x64xf32>
    %83 = arith.addf %82, %81 : vector<2x64xf32>
    %84 = arith.divf %82, %83 : vector<2x64xf32>
    %85 = vector.extract_strided_slice %53 {offsets = [0, 64], sizes = [2, 64], strides = [1, 1]} : vector<2x256xf32> to vector<2x64xf32>
    %86 = arith.negf %85 : vector<2x64xf32>
    %87 = math.exp %86 : vector<2x64xf32>
    %cst_26 = arith.constant 1.000000e+00 : f32
    %88 = vector.broadcast %cst_26 : f32 to vector<2x64xf32>
    %89 = arith.addf %88, %87 : vector<2x64xf32>
    %90 = arith.divf %88, %89 : vector<2x64xf32>
    %91 = vector.extract_strided_slice %53 {offsets = [0, 128], sizes = [2, 64], strides = [1, 1]} : vector<2x256xf32> to vector<2x64xf32>
    %92 = math.tanh %91 : vector<2x64xf32>
    %93 = vector.extract_strided_slice %53 {offsets = [0, 192], sizes = [2, 64], strides = [1, 1]} : vector<2x256xf32> to vector<2x64xf32>
    %94 = arith.negf %93 : vector<2x64xf32>
    %95 = math.exp %94 : vector<2x64xf32>
    %cst_27 = arith.constant 1.000000e+00 : f32
    %96 = vector.broadcast %cst_27 : f32 to vector<2x64xf32>
    %97 = arith.addf %96, %95 : vector<2x64xf32>
    %98 = arith.divf %96, %97 : vector<2x64xf32>
    %99 = arith.mulf %90, %13 : vector<2x64xf32>
    %100 = arith.mulf %84, %92 : vector<2x64xf32>
    %101 = arith.addf %99, %100 : vector<2x64xf32>
    %102 = math.tanh %101 : vector<2x64xf32>
    %103 = arith.mulf %98, %102 : vector<2x64xf32>
    %104 = vector.extract_strided_slice %6 {offsets = [4, 0], sizes = [2, 256], strides = [1, 1]} : vector<16x256xf32> to vector<2x256xf32>
    %105 = arith.truncf %78 : vector<2x64xf32> to vector<2x64xbf16>
    %c0_28 = arith.constant 0 : index
    %c0_29 = arith.constant 0 : index
    %106 = vector.load %arg3[%c0_28, %c0_29] : memref<64x256xbf16, #tpu.memory_space<vmem>>, vector<64x256xbf16>
    %cst_30 = arith.constant dense<0.000000e+00> : vector<2x256xf32>
    %107 = tpu.matmul %105, %106, %cst_30 {dimension_numbers = #tpu.dot_dimension_numbers<[1], [0], [0], [1], [0, 0, 1, 1], [], []>} : vector<2x64xbf16>, vector<64x256xbf16>, vector<2x256xf32> -> vector<2x256xf32>
    %108 = arith.addf %104, %107 : vector<2x256xf32>
    %109 = tpu.concatenate %78, %103 in 1 : vector<2x64xf32>, vector<2x64xf32> -> vector<2x128xf32>
    %110 = arith.truncf %109 : vector<2x128xf32> to vector<2x128xbf16>
    %c0_31 = arith.constant 0 : index
    %c0_32 = arith.constant 0 : index
    %111 = vector.load %arg4[%c0_31, %c0_32] : memref<128x256xbf16, #tpu.memory_space<vmem>>, vector<128x256xbf16>
    %cst_33 = arith.constant dense<0.000000e+00> : vector<2x256xf32>
    %112 = tpu.matmul %110, %111, %cst_33 {dimension_numbers = #tpu.dot_dimension_numbers<[1], [0], [0], [1], [0, 0, 1, 1], [], []>} : vector<2x128xbf16>, vector<128x256xbf16>, vector<2x256xf32> -> vector<2x256xf32>
    %113 = arith.addf %112, %9 : vector<2x256xf32>
    %114 = tpu.concatenate %103, %13 in 1 : vector<2x64xf32>, vector<2x64xf32> -> vector<2x128xf32>
    %115 = arith.truncf %114 : vector<2x128xf32> to vector<2x128xbf16>
    %c0_34 = arith.constant 0 : index
    %c0_35 = arith.constant 0 : index
    %116 = vector.load %arg6[%c0_34, %c0_35] : memref<128x256xbf16, #tpu.memory_space<vmem>>, vector<128x256xbf16>
    %cst_36 = arith.constant dense<0.000000e+00> : vector<2x256xf32>
    %117 = tpu.matmul %115, %116, %cst_36 {dimension_numbers = #tpu.dot_dimension_numbers<[1], [0], [0], [1], [0, 0, 1, 1], [], []>} : vector<2x128xbf16>, vector<128x256xbf16>, vector<2x256xf32> -> vector<2x256xf32>
    %118 = arith.addf %117, %12 : vector<2x256xf32>
    %119 = vector.extract_strided_slice %108 {offsets = [0, 0], sizes = [2, 64], strides = [1, 1]} : vector<2x256xf32> to vector<2x64xf32>
    %120 = arith.negf %119 : vector<2x64xf32>
    %121 = math.exp %120 : vector<2x64xf32>
    %cst_37 = arith.constant 1.000000e+00 : f32
    %122 = vector.broadcast %cst_37 : f32 to vector<2x64xf32>
    %123 = arith.addf %122, %121 : vector<2x64xf32>
    %124 = arith.divf %122, %123 : vector<2x64xf32>
    %125 = vector.extract_strided_slice %108 {offsets = [0, 64], sizes = [2, 64], strides = [1, 1]} : vector<2x256xf32> to vector<2x64xf32>
    %126 = arith.negf %125 : vector<2x64xf32>
    %127 = math.exp %126 : vector<2x64xf32>
    %cst_38 = arith.constant 1.000000e+00 : f32
    %128 = vector.broadcast %cst_38 : f32 to vector<2x64xf32>
    %129 = arith.addf %128, %127 : vector<2x64xf32>
    %130 = arith.divf %128, %129 : vector<2x64xf32>
    %131 = vector.extract_strided_slice %108 {offsets = [0, 128], sizes = [2, 64], strides = [1, 1]} : vector<2x256xf32> to vector<2x64xf32>
    %132 = math.tanh %131 : vector<2x64xf32>
    %133 = vector.extract_strided_slice %108 {offsets = [0, 192], sizes = [2, 64], strides = [1, 1]} : vector<2x256xf32> to vector<2x64xf32>
    %134 = arith.negf %133 : vector<2x64xf32>
    %135 = math.exp %134 : vector<2x64xf32>
    %cst_39 = arith.constant 1.000000e+00 : f32
    %136 = vector.broadcast %cst_39 : f32 to vector<2x64xf32>
    %137 = arith.addf %136, %135 : vector<2x64xf32>
    %138 = arith.divf %136, %137 : vector<2x64xf32>
    %139 = arith.mulf %130, %76 : vector<2x64xf32>
    %140 = arith.mulf %124, %132 : vector<2x64xf32>
    %141 = arith.addf %139, %140 : vector<2x64xf32>
    %142 = math.tanh %141 : vector<2x64xf32>
    %143 = arith.mulf %138, %142 : vector<2x64xf32>
    %144 = vector.extract_strided_slice %113 {offsets = [0, 0], sizes = [2, 64], strides = [1, 1]} : vector<2x256xf32> to vector<2x64xf32>
    %145 = arith.negf %144 : vector<2x64xf32>
    %146 = math.exp %145 : vector<2x64xf32>
    %cst_40 = arith.constant 1.000000e+00 : f32
    %147 = vector.broadcast %cst_40 : f32 to vector<2x64xf32>
    %148 = arith.addf %147, %146 : vector<2x64xf32>
    %149 = arith.divf %147, %148 : vector<2x64xf32>
    %150 = vector.extract_strided_slice %113 {offsets = [0, 64], sizes = [2, 64], strides = [1, 1]} : vector<2x256xf32> to vector<2x64xf32>
    %151 = arith.negf %150 : vector<2x64xf32>
    %152 = math.exp %151 : vector<2x64xf32>
    %cst_41 = arith.constant 1.000000e+00 : f32
    %153 = vector.broadcast %cst_41 : f32 to vector<2x64xf32>
    %154 = arith.addf %153, %152 : vector<2x64xf32>
    %155 = arith.divf %153, %154 : vector<2x64xf32>
    %156 = vector.extract_strided_slice %113 {offsets = [0, 128], sizes = [2, 64], strides = [1, 1]} : vector<2x256xf32> to vector<2x64xf32>
    %157 = math.tanh %156 : vector<2x64xf32>
    %158 = vector.extract_strided_slice %113 {offsets = [0, 192], sizes = [2, 64], strides = [1, 1]} : vector<2x256xf32> to vector<2x64xf32>
    %159 = arith.negf %158 : vector<2x64xf32>
    %160 = math.exp %159 : vector<2x64xf32>
    %cst_42 = arith.constant 1.000000e+00 : f32
    %161 = vector.broadcast %cst_42 : f32 to vector<2x64xf32>
    %162 = arith.addf %161, %160 : vector<2x64xf32>
    %163 = arith.divf %161, %162 : vector<2x64xf32>
    %164 = arith.mulf %155, %101 : vector<2x64xf32>
    %165 = arith.mulf %149, %157 : vector<2x64xf32>
    %166 = arith.addf %164, %165 : vector<2x64xf32>
    %167 = math.tanh %166 : vector<2x64xf32>
    %168 = arith.mulf %163, %167 : vector<2x64xf32>
    %169 = vector.extract_strided_slice %118 {offsets = [0, 0], sizes = [2, 64], strides = [1, 1]} : vector<2x256xf32> to vector<2x64xf32>
    %170 = arith.negf %169 : vector<2x64xf32>
    %171 = math.exp %170 : vector<2x64xf32>
    %cst_43 = arith.constant 1.000000e+00 : f32
    %172 = vector.broadcast %cst_43 : f32 to vector<2x64xf32>
    %173 = arith.addf %172, %171 : vector<2x64xf32>
    %174 = arith.divf %172, %173 : vector<2x64xf32>
    %175 = vector.extract_strided_slice %118 {offsets = [0, 64], sizes = [2, 64], strides = [1, 1]} : vector<2x256xf32> to vector<2x64xf32>
    %176 = arith.negf %175 : vector<2x64xf32>
    %177 = math.exp %176 : vector<2x64xf32>
    %cst_44 = arith.constant 1.000000e+00 : f32
    %178 = vector.broadcast %cst_44 : f32 to vector<2x64xf32>
    %179 = arith.addf %178, %177 : vector<2x64xf32>
    %180 = arith.divf %178, %179 : vector<2x64xf32>
    %181 = vector.extract_strided_slice %118 {offsets = [0, 128], sizes = [2, 64], strides = [1, 1]} : vector<2x256xf32> to vector<2x64xf32>
    %182 = math.tanh %181 : vector<2x64xf32>
    %183 = vector.extract_strided_slice %118 {offsets = [0, 192], sizes = [2, 64], strides = [1, 1]} : vector<2x256xf32> to vector<2x64xf32>
    %184 = arith.negf %183 : vector<2x64xf32>
    %185 = math.exp %184 : vector<2x64xf32>
    %cst_45 = arith.constant 1.000000e+00 : f32
    %186 = vector.broadcast %cst_45 : f32 to vector<2x64xf32>
    %187 = arith.addf %186, %185 : vector<2x64xf32>
    %188 = arith.divf %186, %187 : vector<2x64xf32>
    %189 = arith.mulf %180, %13 : vector<2x64xf32>
    %190 = arith.mulf %174, %182 : vector<2x64xf32>
    %191 = arith.addf %189, %190 : vector<2x64xf32>
    %192 = math.tanh %191 : vector<2x64xf32>
    %193 = arith.mulf %188, %192 : vector<2x64xf32>
    %194 = vector.extract_strided_slice %6 {offsets = [6, 0], sizes = [2, 256], strides = [1, 1]} : vector<16x256xf32> to vector<2x256xf32>
    %195 = arith.truncf %143 : vector<2x64xf32> to vector<2x64xbf16>
    %c0_46 = arith.constant 0 : index
    %c0_47 = arith.constant 0 : index
    %196 = vector.load %arg3[%c0_46, %c0_47] : memref<64x256xbf16, #tpu.memory_space<vmem>>, vector<64x256xbf16>
    %cst_48 = arith.constant dense<0.000000e+00> : vector<2x256xf32>
    %197 = tpu.matmul %195, %196, %cst_48 {dimension_numbers = #tpu.dot_dimension_numbers<[1], [0], [0], [1], [0, 0, 1, 1], [], []>} : vector<2x64xbf16>, vector<64x256xbf16>, vector<2x256xf32> -> vector<2x256xf32>
    %198 = arith.addf %194, %197 : vector<2x256xf32>
    %199 = tpu.concatenate %143, %168 in 1 : vector<2x64xf32>, vector<2x64xf32> -> vector<2x128xf32>
    %200 = arith.truncf %199 : vector<2x128xf32> to vector<2x128xbf16>
    %c0_49 = arith.constant 0 : index
    %c0_50 = arith.constant 0 : index
    %201 = vector.load %arg4[%c0_49, %c0_50] : memref<128x256xbf16, #tpu.memory_space<vmem>>, vector<128x256xbf16>
    %cst_51 = arith.constant dense<0.000000e+00> : vector<2x256xf32>
    %202 = tpu.matmul %200, %201, %cst_51 {dimension_numbers = #tpu.dot_dimension_numbers<[1], [0], [0], [1], [0, 0, 1, 1], [], []>} : vector<2x128xbf16>, vector<128x256xbf16>, vector<2x256xf32> -> vector<2x256xf32>
    %203 = arith.addf %202, %9 : vector<2x256xf32>
    %204 = tpu.concatenate %168, %193 in 1 : vector<2x64xf32>, vector<2x64xf32> -> vector<2x128xf32>
    %205 = arith.truncf %204 : vector<2x128xf32> to vector<2x128xbf16>
    %c0_52 = arith.constant 0 : index
    %c0_53 = arith.constant 0 : index
    %206 = vector.load %arg6[%c0_52, %c0_53] : memref<128x256xbf16, #tpu.memory_space<vmem>>, vector<128x256xbf16>
    %cst_54 = arith.constant dense<0.000000e+00> : vector<2x256xf32>
    %207 = tpu.matmul %205, %206, %cst_54 {dimension_numbers = #tpu.dot_dimension_numbers<[1], [0], [0], [1], [0, 0, 1, 1], [], []>} : vector<2x128xbf16>, vector<128x256xbf16>, vector<2x256xf32> -> vector<2x256xf32>
    %208 = arith.addf %207, %12 : vector<2x256xf32>
    %209 = vector.extract_strided_slice %198 {offsets = [0, 0], sizes = [2, 64], strides = [1, 1]} : vector<2x256xf32> to vector<2x64xf32>
    %210 = arith.negf %209 : vector<2x64xf32>
    %211 = math.exp %210 : vector<2x64xf32>
    %cst_55 = arith.constant 1.000000e+00 : f32
    %212 = vector.broadcast %cst_55 : f32 to vector<2x64xf32>
    %213 = arith.addf %212, %211 : vector<2x64xf32>
    %214 = arith.divf %212, %213 : vector<2x64xf32>
    %215 = vector.extract_strided_slice %198 {offsets = [0, 64], sizes = [2, 64], strides = [1, 1]} : vector<2x256xf32> to vector<2x64xf32>
    %216 = arith.negf %215 : vector<2x64xf32>
    %217 = math.exp %216 : vector<2x64xf32>
    %cst_56 = arith.constant 1.000000e+00 : f32
    %218 = vector.broadcast %cst_56 : f32 to vector<2x64xf32>
    %219 = arith.addf %218, %217 : vector<2x64xf32>
    %220 = arith.divf %218, %219 : vector<2x64xf32>
    %221 = vector.extract_strided_slice %198 {offsets = [0, 128], sizes = [2, 64], strides = [1, 1]} : vector<2x256xf32> to vector<2x64xf32>
    %222 = math.tanh %221 : vector<2x64xf32>
    %223 = vector.extract_strided_slice %198 {offsets = [0, 192], sizes = [2, 64], strides = [1, 1]} : vector<2x256xf32> to vector<2x64xf32>
    %224 = arith.negf %223 : vector<2x64xf32>
    %225 = math.exp %224 : vector<2x64xf32>
    %cst_57 = arith.constant 1.000000e+00 : f32
    %226 = vector.broadcast %cst_57 : f32 to vector<2x64xf32>
    %227 = arith.addf %226, %225 : vector<2x64xf32>
    %228 = arith.divf %226, %227 : vector<2x64xf32>
    %229 = arith.mulf %220, %141 : vector<2x64xf32>
    %230 = arith.mulf %214, %222 : vector<2x64xf32>
    %231 = arith.addf %229, %230 : vector<2x64xf32>
    %232 = math.tanh %231 : vector<2x64xf32>
    %233 = arith.mulf %228, %232 : vector<2x64xf32>
    %234 = vector.extract_strided_slice %203 {offsets = [0, 0], sizes = [2, 64], strides = [1, 1]} : vector<2x256xf32> to vector<2x64xf32>
    %235 = arith.negf %234 : vector<2x64xf32>
    %236 = math.exp %235 : vector<2x64xf32>
    %cst_58 = arith.constant 1.000000e+00 : f32
    %237 = vector.broadcast %cst_58 : f32 to vector<2x64xf32>
    %238 = arith.addf %237, %236 : vector<2x64xf32>
    %239 = arith.divf %237, %238 : vector<2x64xf32>
    %240 = vector.extract_strided_slice %203 {offsets = [0, 64], sizes = [2, 64], strides = [1, 1]} : vector<2x256xf32> to vector<2x64xf32>
    %241 = arith.negf %240 : vector<2x64xf32>
    %242 = math.exp %241 : vector<2x64xf32>
    %cst_59 = arith.constant 1.000000e+00 : f32
    %243 = vector.broadcast %cst_59 : f32 to vector<2x64xf32>
    %244 = arith.addf %243, %242 : vector<2x64xf32>
    %245 = arith.divf %243, %244 : vector<2x64xf32>
    %246 = vector.extract_strided_slice %203 {offsets = [0, 128], sizes = [2, 64], strides = [1, 1]} : vector<2x256xf32> to vector<2x64xf32>
    %247 = math.tanh %246 : vector<2x64xf32>
    %248 = vector.extract_strided_slice %203 {offsets = [0, 192], sizes = [2, 64], strides = [1, 1]} : vector<2x256xf32> to vector<2x64xf32>
    %249 = arith.negf %248 : vector<2x64xf32>
    %250 = math.exp %249 : vector<2x64xf32>
    %cst_60 = arith.constant 1.000000e+00 : f32
    %251 = vector.broadcast %cst_60 : f32 to vector<2x64xf32>
    %252 = arith.addf %251, %250 : vector<2x64xf32>
    %253 = arith.divf %251, %252 : vector<2x64xf32>
    %254 = arith.mulf %245, %166 : vector<2x64xf32>
    %255 = arith.mulf %239, %247 : vector<2x64xf32>
    %256 = arith.addf %254, %255 : vector<2x64xf32>
    %257 = math.tanh %256 : vector<2x64xf32>
    %258 = arith.mulf %253, %257 : vector<2x64xf32>
    %259 = vector.extract_strided_slice %208 {offsets = [0, 0], sizes = [2, 64], strides = [1, 1]} : vector<2x256xf32> to vector<2x64xf32>
    %260 = arith.negf %259 : vector<2x64xf32>
    %261 = math.exp %260 : vector<2x64xf32>
    %cst_61 = arith.constant 1.000000e+00 : f32
    %262 = vector.broadcast %cst_61 : f32 to vector<2x64xf32>
    %263 = arith.addf %262, %261 : vector<2x64xf32>
    %264 = arith.divf %262, %263 : vector<2x64xf32>
    %265 = vector.extract_strided_slice %208 {offsets = [0, 64], sizes = [2, 64], strides = [1, 1]} : vector<2x256xf32> to vector<2x64xf32>
    %266 = arith.negf %265 : vector<2x64xf32>
    %267 = math.exp %266 : vector<2x64xf32>
    %cst_62 = arith.constant 1.000000e+00 : f32
    %268 = vector.broadcast %cst_62 : f32 to vector<2x64xf32>
    %269 = arith.addf %268, %267 : vector<2x64xf32>
    %270 = arith.divf %268, %269 : vector<2x64xf32>
    %271 = vector.extract_strided_slice %208 {offsets = [0, 128], sizes = [2, 64], strides = [1, 1]} : vector<2x256xf32> to vector<2x64xf32>
    %272 = math.tanh %271 : vector<2x64xf32>
    %273 = vector.extract_strided_slice %208 {offsets = [0, 192], sizes = [2, 64], strides = [1, 1]} : vector<2x256xf32> to vector<2x64xf32>
    %274 = arith.negf %273 : vector<2x64xf32>
    %275 = math.exp %274 : vector<2x64xf32>
    %cst_63 = arith.constant 1.000000e+00 : f32
    %276 = vector.broadcast %cst_63 : f32 to vector<2x64xf32>
    %277 = arith.addf %276, %275 : vector<2x64xf32>
    %278 = arith.divf %276, %277 : vector<2x64xf32>
    %279 = arith.mulf %270, %191 : vector<2x64xf32>
    %280 = arith.mulf %264, %272 : vector<2x64xf32>
    %281 = arith.addf %279, %280 : vector<2x64xf32>
    %282 = math.tanh %281 : vector<2x64xf32>
    %283 = arith.mulf %278, %282 : vector<2x64xf32>
    %284 = vector.extract_strided_slice %6 {offsets = [8, 0], sizes = [2, 256], strides = [1, 1]} : vector<16x256xf32> to vector<2x256xf32>
    %285 = arith.truncf %233 : vector<2x64xf32> to vector<2x64xbf16>
    %c0_64 = arith.constant 0 : index
    %c0_65 = arith.constant 0 : index
    %286 = vector.load %arg3[%c0_64, %c0_65] : memref<64x256xbf16, #tpu.memory_space<vmem>>, vector<64x256xbf16>
    %cst_66 = arith.constant dense<0.000000e+00> : vector<2x256xf32>
    %287 = tpu.matmul %285, %286, %cst_66 {dimension_numbers = #tpu.dot_dimension_numbers<[1], [0], [0], [1], [0, 0, 1, 1], [], []>} : vector<2x64xbf16>, vector<64x256xbf16>, vector<2x256xf32> -> vector<2x256xf32>
    %288 = arith.addf %284, %287 : vector<2x256xf32>
    %289 = tpu.concatenate %233, %258 in 1 : vector<2x64xf32>, vector<2x64xf32> -> vector<2x128xf32>
    %290 = arith.truncf %289 : vector<2x128xf32> to vector<2x128xbf16>
    %c0_67 = arith.constant 0 : index
    %c0_68 = arith.constant 0 : index
    %291 = vector.load %arg4[%c0_67, %c0_68] : memref<128x256xbf16, #tpu.memory_space<vmem>>, vector<128x256xbf16>
    %cst_69 = arith.constant dense<0.000000e+00> : vector<2x256xf32>
    %292 = tpu.matmul %290, %291, %cst_69 {dimension_numbers = #tpu.dot_dimension_numbers<[1], [0], [0], [1], [0, 0, 1, 1], [], []>} : vector<2x128xbf16>, vector<128x256xbf16>, vector<2x256xf32> -> vector<2x256xf32>
    %293 = arith.addf %292, %9 : vector<2x256xf32>
    %294 = tpu.concatenate %258, %283 in 1 : vector<2x64xf32>, vector<2x64xf32> -> vector<2x128xf32>
    %295 = arith.truncf %294 : vector<2x128xf32> to vector<2x128xbf16>
    %c0_70 = arith.constant 0 : index
    %c0_71 = arith.constant 0 : index
    %296 = vector.load %arg6[%c0_70, %c0_71] : memref<128x256xbf16, #tpu.memory_space<vmem>>, vector<128x256xbf16>
    %cst_72 = arith.constant dense<0.000000e+00> : vector<2x256xf32>
    %297 = tpu.matmul %295, %296, %cst_72 {dimension_numbers = #tpu.dot_dimension_numbers<[1], [0], [0], [1], [0, 0, 1, 1], [], []>} : vector<2x128xbf16>, vector<128x256xbf16>, vector<2x256xf32> -> vector<2x256xf32>
    %298 = arith.addf %297, %12 : vector<2x256xf32>
    %299 = vector.extract_strided_slice %288 {offsets = [0, 0], sizes = [2, 64], strides = [1, 1]} : vector<2x256xf32> to vector<2x64xf32>
    %300 = arith.negf %299 : vector<2x64xf32>
    %301 = math.exp %300 : vector<2x64xf32>
    %cst_73 = arith.constant 1.000000e+00 : f32
    %302 = vector.broadcast %cst_73 : f32 to vector<2x64xf32>
    %303 = arith.addf %302, %301 : vector<2x64xf32>
    %304 = arith.divf %302, %303 : vector<2x64xf32>
    %305 = vector.extract_strided_slice %288 {offsets = [0, 64], sizes = [2, 64], strides = [1, 1]} : vector<2x256xf32> to vector<2x64xf32>
    %306 = arith.negf %305 : vector<2x64xf32>
    %307 = math.exp %306 : vector<2x64xf32>
    %cst_74 = arith.constant 1.000000e+00 : f32
    %308 = vector.broadcast %cst_74 : f32 to vector<2x64xf32>
    %309 = arith.addf %308, %307 : vector<2x64xf32>
    %310 = arith.divf %308, %309 : vector<2x64xf32>
    %311 = vector.extract_strided_slice %288 {offsets = [0, 128], sizes = [2, 64], strides = [1, 1]} : vector<2x256xf32> to vector<2x64xf32>
    %312 = math.tanh %311 : vector<2x64xf32>
    %313 = vector.extract_strided_slice %288 {offsets = [0, 192], sizes = [2, 64], strides = [1, 1]} : vector<2x256xf32> to vector<2x64xf32>
    %314 = arith.negf %313 : vector<2x64xf32>
    %315 = math.exp %314 : vector<2x64xf32>
    %cst_75 = arith.constant 1.000000e+00 : f32
    %316 = vector.broadcast %cst_75 : f32 to vector<2x64xf32>
    %317 = arith.addf %316, %315 : vector<2x64xf32>
    %318 = arith.divf %316, %317 : vector<2x64xf32>
    %319 = arith.mulf %310, %231 : vector<2x64xf32>
    %320 = arith.mulf %304, %312 : vector<2x64xf32>
    %321 = arith.addf %319, %320 : vector<2x64xf32>
    %322 = math.tanh %321 : vector<2x64xf32>
    %323 = arith.mulf %318, %322 : vector<2x64xf32>
    %324 = vector.extract_strided_slice %293 {offsets = [0, 0], sizes = [2, 64], strides = [1, 1]} : vector<2x256xf32> to vector<2x64xf32>
    %325 = arith.negf %324 : vector<2x64xf32>
    %326 = math.exp %325 : vector<2x64xf32>
    %cst_76 = arith.constant 1.000000e+00 : f32
    %327 = vector.broadcast %cst_76 : f32 to vector<2x64xf32>
    %328 = arith.addf %327, %326 : vector<2x64xf32>
    %329 = arith.divf %327, %328 : vector<2x64xf32>
    %330 = vector.extract_strided_slice %293 {offsets = [0, 64], sizes = [2, 64], strides = [1, 1]} : vector<2x256xf32> to vector<2x64xf32>
    %331 = arith.negf %330 : vector<2x64xf32>
    %332 = math.exp %331 : vector<2x64xf32>
    %cst_77 = arith.constant 1.000000e+00 : f32
    %333 = vector.broadcast %cst_77 : f32 to vector<2x64xf32>
    %334 = arith.addf %333, %332 : vector<2x64xf32>
    %335 = arith.divf %333, %334 : vector<2x64xf32>
    %336 = vector.extract_strided_slice %293 {offsets = [0, 128], sizes = [2, 64], strides = [1, 1]} : vector<2x256xf32> to vector<2x64xf32>
    %337 = math.tanh %336 : vector<2x64xf32>
    %338 = vector.extract_strided_slice %293 {offsets = [0, 192], sizes = [2, 64], strides = [1, 1]} : vector<2x256xf32> to vector<2x64xf32>
    %339 = arith.negf %338 : vector<2x64xf32>
    %340 = math.exp %339 : vector<2x64xf32>
    %cst_78 = arith.constant 1.000000e+00 : f32
    %341 = vector.broadcast %cst_78 : f32 to vector<2x64xf32>
    %342 = arith.addf %341, %340 : vector<2x64xf32>
    %343 = arith.divf %341, %342 : vector<2x64xf32>
    %344 = arith.mulf %335, %256 : vector<2x64xf32>
    %345 = arith.mulf %329, %337 : vector<2x64xf32>
    %346 = arith.addf %344, %345 : vector<2x64xf32>
    %347 = math.tanh %346 : vector<2x64xf32>
    %348 = arith.mulf %343, %347 : vector<2x64xf32>
    %349 = vector.extract_strided_slice %298 {offsets = [0, 0], sizes = [2, 64], strides = [1, 1]} : vector<2x256xf32> to vector<2x64xf32>
    %350 = arith.negf %349 : vector<2x64xf32>
    %351 = math.exp %350 : vector<2x64xf32>
    %cst_79 = arith.constant 1.000000e+00 : f32
    %352 = vector.broadcast %cst_79 : f32 to vector<2x64xf32>
    %353 = arith.addf %352, %351 : vector<2x64xf32>
    %354 = arith.divf %352, %353 : vector<2x64xf32>
    %355 = vector.extract_strided_slice %298 {offsets = [0, 64], sizes = [2, 64], strides = [1, 1]} : vector<2x256xf32> to vector<2x64xf32>
    %356 = arith.negf %355 : vector<2x64xf32>
    %357 = math.exp %356 : vector<2x64xf32>
    %cst_80 = arith.constant 1.000000e+00 : f32
    %358 = vector.broadcast %cst_80 : f32 to vector<2x64xf32>
    %359 = arith.addf %358, %357 : vector<2x64xf32>
    %360 = arith.divf %358, %359 : vector<2x64xf32>
    %361 = vector.extract_strided_slice %298 {offsets = [0, 128], sizes = [2, 64], strides = [1, 1]} : vector<2x256xf32> to vector<2x64xf32>
    %362 = math.tanh %361 : vector<2x64xf32>
    %363 = vector.extract_strided_slice %298 {offsets = [0, 192], sizes = [2, 64], strides = [1, 1]} : vector<2x256xf32> to vector<2x64xf32>
    %364 = arith.negf %363 : vector<2x64xf32>
    %365 = math.exp %364 : vector<2x64xf32>
    %cst_81 = arith.constant 1.000000e+00 : f32
    %366 = vector.broadcast %cst_81 : f32 to vector<2x64xf32>
    %367 = arith.addf %366, %365 : vector<2x64xf32>
    %368 = arith.divf %366, %367 : vector<2x64xf32>
    %369 = arith.mulf %360, %281 : vector<2x64xf32>
    %370 = arith.mulf %354, %362 : vector<2x64xf32>
    %371 = arith.addf %369, %370 : vector<2x64xf32>
    %372 = math.tanh %371 : vector<2x64xf32>
    %373 = arith.mulf %368, %372 : vector<2x64xf32>
    %374 = vector.extract_strided_slice %6 {offsets = [10, 0], sizes = [2, 256], strides = [1, 1]} : vector<16x256xf32> to vector<2x256xf32>
    %375 = arith.truncf %323 : vector<2x64xf32> to vector<2x64xbf16>
    %c0_82 = arith.constant 0 : index
    %c0_83 = arith.constant 0 : index
    %376 = vector.load %arg3[%c0_82, %c0_83] : memref<64x256xbf16, #tpu.memory_space<vmem>>, vector<64x256xbf16>
    %cst_84 = arith.constant dense<0.000000e+00> : vector<2x256xf32>
    %377 = tpu.matmul %375, %376, %cst_84 {dimension_numbers = #tpu.dot_dimension_numbers<[1], [0], [0], [1], [0, 0, 1, 1], [], []>} : vector<2x64xbf16>, vector<64x256xbf16>, vector<2x256xf32> -> vector<2x256xf32>
    %378 = arith.addf %374, %377 : vector<2x256xf32>
    %379 = tpu.concatenate %323, %348 in 1 : vector<2x64xf32>, vector<2x64xf32> -> vector<2x128xf32>
    %380 = arith.truncf %379 : vector<2x128xf32> to vector<2x128xbf16>
    %c0_85 = arith.constant 0 : index
    %c0_86 = arith.constant 0 : index
    %381 = vector.load %arg4[%c0_85, %c0_86] : memref<128x256xbf16, #tpu.memory_space<vmem>>, vector<128x256xbf16>
    %cst_87 = arith.constant dense<0.000000e+00> : vector<2x256xf32>
    %382 = tpu.matmul %380, %381, %cst_87 {dimension_numbers = #tpu.dot_dimension_numbers<[1], [0], [0], [1], [0, 0, 1, 1], [], []>} : vector<2x128xbf16>, vector<128x256xbf16>, vector<2x256xf32> -> vector<2x256xf32>
    %383 = arith.addf %382, %9 : vector<2x256xf32>
    %384 = tpu.concatenate %348, %373 in 1 : vector<2x64xf32>, vector<2x64xf32> -> vector<2x128xf32>
    %385 = arith.truncf %384 : vector<2x128xf32> to vector<2x128xbf16>
    %c0_88 = arith.constant 0 : index
    %c0_89 = arith.constant 0 : index
    %386 = vector.load %arg6[%c0_88, %c0_89] : memref<128x256xbf16, #tpu.memory_space<vmem>>, vector<128x256xbf16>
    %cst_90 = arith.constant dense<0.000000e+00> : vector<2x256xf32>
    %387 = tpu.matmul %385, %386, %cst_90 {dimension_numbers = #tpu.dot_dimension_numbers<[1], [0], [0], [1], [0, 0, 1, 1], [], []>} : vector<2x128xbf16>, vector<128x256xbf16>, vector<2x256xf32> -> vector<2x256xf32>
    %388 = arith.addf %387, %12 : vector<2x256xf32>
    %389 = vector.extract_strided_slice %378 {offsets = [0, 0], sizes = [2, 64], strides = [1, 1]} : vector<2x256xf32> to vector<2x64xf32>
    %390 = arith.negf %389 : vector<2x64xf32>
    %391 = math.exp %390 : vector<2x64xf32>
    %cst_91 = arith.constant 1.000000e+00 : f32
    %392 = vector.broadcast %cst_91 : f32 to vector<2x64xf32>
    %393 = arith.addf %392, %391 : vector<2x64xf32>
    %394 = arith.divf %392, %393 : vector<2x64xf32>
    %395 = vector.extract_strided_slice %378 {offsets = [0, 64], sizes = [2, 64], strides = [1, 1]} : vector<2x256xf32> to vector<2x64xf32>
    %396 = arith.negf %395 : vector<2x64xf32>
    %397 = math.exp %396 : vector<2x64xf32>
    %cst_92 = arith.constant 1.000000e+00 : f32
    %398 = vector.broadcast %cst_92 : f32 to vector<2x64xf32>
    %399 = arith.addf %398, %397 : vector<2x64xf32>
    %400 = arith.divf %398, %399 : vector<2x64xf32>
    %401 = vector.extract_strided_slice %378 {offsets = [0, 128], sizes = [2, 64], strides = [1, 1]} : vector<2x256xf32> to vector<2x64xf32>
    %402 = math.tanh %401 : vector<2x64xf32>
    %403 = vector.extract_strided_slice %378 {offsets = [0, 192], sizes = [2, 64], strides = [1, 1]} : vector<2x256xf32> to vector<2x64xf32>
    %404 = arith.negf %403 : vector<2x64xf32>
    %405 = math.exp %404 : vector<2x64xf32>
    %cst_93 = arith.constant 1.000000e+00 : f32
    %406 = vector.broadcast %cst_93 : f32 to vector<2x64xf32>
    %407 = arith.addf %406, %405 : vector<2x64xf32>
    %408 = arith.divf %406, %407 : vector<2x64xf32>
    %409 = arith.mulf %400, %321 : vector<2x64xf32>
    %410 = arith.mulf %394, %402 : vector<2x64xf32>
    %411 = arith.addf %409, %410 : vector<2x64xf32>
    %412 = math.tanh %411 : vector<2x64xf32>
    %413 = arith.mulf %408, %412 : vector<2x64xf32>
    %414 = vector.extract_strided_slice %383 {offsets = [0, 0], sizes = [2, 64], strides = [1, 1]} : vector<2x256xf32> to vector<2x64xf32>
    %415 = arith.negf %414 : vector<2x64xf32>
    %416 = math.exp %415 : vector<2x64xf32>
    %cst_94 = arith.constant 1.000000e+00 : f32
    %417 = vector.broadcast %cst_94 : f32 to vector<2x64xf32>
    %418 = arith.addf %417, %416 : vector<2x64xf32>
    %419 = arith.divf %417, %418 : vector<2x64xf32>
    %420 = vector.extract_strided_slice %383 {offsets = [0, 64], sizes = [2, 64], strides = [1, 1]} : vector<2x256xf32> to vector<2x64xf32>
    %421 = arith.negf %420 : vector<2x64xf32>
    %422 = math.exp %421 : vector<2x64xf32>
    %cst_95 = arith.constant 1.000000e+00 : f32
    %423 = vector.broadcast %cst_95 : f32 to vector<2x64xf32>
    %424 = arith.addf %423, %422 : vector<2x64xf32>
    %425 = arith.divf %423, %424 : vector<2x64xf32>
    %426 = vector.extract_strided_slice %383 {offsets = [0, 128], sizes = [2, 64], strides = [1, 1]} : vector<2x256xf32> to vector<2x64xf32>
    %427 = math.tanh %426 : vector<2x64xf32>
    %428 = vector.extract_strided_slice %383 {offsets = [0, 192], sizes = [2, 64], strides = [1, 1]} : vector<2x256xf32> to vector<2x64xf32>
    %429 = arith.negf %428 : vector<2x64xf32>
    %430 = math.exp %429 : vector<2x64xf32>
    %cst_96 = arith.constant 1.000000e+00 : f32
    %431 = vector.broadcast %cst_96 : f32 to vector<2x64xf32>
    %432 = arith.addf %431, %430 : vector<2x64xf32>
    %433 = arith.divf %431, %432 : vector<2x64xf32>
    %434 = arith.mulf %425, %346 : vector<2x64xf32>
    %435 = arith.mulf %419, %427 : vector<2x64xf32>
    %436 = arith.addf %434, %435 : vector<2x64xf32>
    %437 = math.tanh %436 : vector<2x64xf32>
    %438 = arith.mulf %433, %437 : vector<2x64xf32>
    %439 = vector.extract_strided_slice %388 {offsets = [0, 0], sizes = [2, 64], strides = [1, 1]} : vector<2x256xf32> to vector<2x64xf32>
    %440 = arith.negf %439 : vector<2x64xf32>
    %441 = math.exp %440 : vector<2x64xf32>
    %cst_97 = arith.constant 1.000000e+00 : f32
    %442 = vector.broadcast %cst_97 : f32 to vector<2x64xf32>
    %443 = arith.addf %442, %441 : vector<2x64xf32>
    %444 = arith.divf %442, %443 : vector<2x64xf32>
    %445 = vector.extract_strided_slice %388 {offsets = [0, 64], sizes = [2, 64], strides = [1, 1]} : vector<2x256xf32> to vector<2x64xf32>
    %446 = arith.negf %445 : vector<2x64xf32>
    %447 = math.exp %446 : vector<2x64xf32>
    %cst_98 = arith.constant 1.000000e+00 : f32
    %448 = vector.broadcast %cst_98 : f32 to vector<2x64xf32>
    %449 = arith.addf %448, %447 : vector<2x64xf32>
    %450 = arith.divf %448, %449 : vector<2x64xf32>
    %451 = vector.extract_strided_slice %388 {offsets = [0, 128], sizes = [2, 64], strides = [1, 1]} : vector<2x256xf32> to vector<2x64xf32>
    %452 = math.tanh %451 : vector<2x64xf32>
    %453 = vector.extract_strided_slice %388 {offsets = [0, 192], sizes = [2, 64], strides = [1, 1]} : vector<2x256xf32> to vector<2x64xf32>
    %454 = arith.negf %453 : vector<2x64xf32>
    %455 = math.exp %454 : vector<2x64xf32>
    %cst_99 = arith.constant 1.000000e+00 : f32
    %456 = vector.broadcast %cst_99 : f32 to vector<2x64xf32>
    %457 = arith.addf %456, %455 : vector<2x64xf32>
    %458 = arith.divf %456, %457 : vector<2x64xf32>
    %459 = arith.mulf %450, %371 : vector<2x64xf32>
    %460 = arith.mulf %444, %452 : vector<2x64xf32>
    %461 = arith.addf %459, %460 : vector<2x64xf32>
    %462 = math.tanh %461 : vector<2x64xf32>
    %463 = arith.mulf %458, %462 : vector<2x64xf32>
    %464 = vector.extract_strided_slice %6 {offsets = [12, 0], sizes = [2, 256], strides = [1, 1]} : vector<16x256xf32> to vector<2x256xf32>
    %465 = arith.truncf %413 : vector<2x64xf32> to vector<2x64xbf16>
    %c0_100 = arith.constant 0 : index
    %c0_101 = arith.constant 0 : index
    %466 = vector.load %arg3[%c0_100, %c0_101] : memref<64x256xbf16, #tpu.memory_space<vmem>>, vector<64x256xbf16>
    %cst_102 = arith.constant dense<0.000000e+00> : vector<2x256xf32>
    %467 = tpu.matmul %465, %466, %cst_102 {dimension_numbers = #tpu.dot_dimension_numbers<[1], [0], [0], [1], [0, 0, 1, 1], [], []>} : vector<2x64xbf16>, vector<64x256xbf16>, vector<2x256xf32> -> vector<2x256xf32>
    %468 = arith.addf %464, %467 : vector<2x256xf32>
    %469 = tpu.concatenate %413, %438 in 1 : vector<2x64xf32>, vector<2x64xf32> -> vector<2x128xf32>
    %470 = arith.truncf %469 : vector<2x128xf32> to vector<2x128xbf16>
    %c0_103 = arith.constant 0 : index
    %c0_104 = arith.constant 0 : index
    %471 = vector.load %arg4[%c0_103, %c0_104] : memref<128x256xbf16, #tpu.memory_space<vmem>>, vector<128x256xbf16>
    %cst_105 = arith.constant dense<0.000000e+00> : vector<2x256xf32>
    %472 = tpu.matmul %470, %471, %cst_105 {dimension_numbers = #tpu.dot_dimension_numbers<[1], [0], [0], [1], [0, 0, 1, 1], [], []>} : vector<2x128xbf16>, vector<128x256xbf16>, vector<2x256xf32> -> vector<2x256xf32>
    %473 = arith.addf %472, %9 : vector<2x256xf32>
    %474 = tpu.concatenate %438, %463 in 1 : vector<2x64xf32>, vector<2x64xf32> -> vector<2x128xf32>
    %475 = arith.truncf %474 : vector<2x128xf32> to vector<2x128xbf16>
    %c0_106 = arith.constant 0 : index
    %c0_107 = arith.constant 0 : index
    %476 = vector.load %arg6[%c0_106, %c0_107] : memref<128x256xbf16, #tpu.memory_space<vmem>>, vector<128x256xbf16>
    %cst_108 = arith.constant dense<0.000000e+00> : vector<2x256xf32>
    %477 = tpu.matmul %475, %476, %cst_108 {dimension_numbers = #tpu.dot_dimension_numbers<[1], [0], [0], [1], [0, 0, 1, 1], [], []>} : vector<2x128xbf16>, vector<128x256xbf16>, vector<2x256xf32> -> vector<2x256xf32>
    %478 = arith.addf %477, %12 : vector<2x256xf32>
    %479 = vector.extract_strided_slice %468 {offsets = [0, 0], sizes = [2, 64], strides = [1, 1]} : vector<2x256xf32> to vector<2x64xf32>
    %480 = arith.negf %479 : vector<2x64xf32>
    %481 = math.exp %480 : vector<2x64xf32>
    %cst_109 = arith.constant 1.000000e+00 : f32
    %482 = vector.broadcast %cst_109 : f32 to vector<2x64xf32>
    %483 = arith.addf %482, %481 : vector<2x64xf32>
    %484 = arith.divf %482, %483 : vector<2x64xf32>
    %485 = vector.extract_strided_slice %468 {offsets = [0, 64], sizes = [2, 64], strides = [1, 1]} : vector<2x256xf32> to vector<2x64xf32>
    %486 = arith.negf %485 : vector<2x64xf32>
    %487 = math.exp %486 : vector<2x64xf32>
    %cst_110 = arith.constant 1.000000e+00 : f32
    %488 = vector.broadcast %cst_110 : f32 to vector<2x64xf32>
    %489 = arith.addf %488, %487 : vector<2x64xf32>
    %490 = arith.divf %488, %489 : vector<2x64xf32>
    %491 = vector.extract_strided_slice %468 {offsets = [0, 128], sizes = [2, 64], strides = [1, 1]} : vector<2x256xf32> to vector<2x64xf32>
    %492 = math.tanh %491 : vector<2x64xf32>
    %493 = vector.extract_strided_slice %468 {offsets = [0, 192], sizes = [2, 64], strides = [1, 1]} : vector<2x256xf32> to vector<2x64xf32>
    %494 = arith.negf %493 : vector<2x64xf32>
    %495 = math.exp %494 : vector<2x64xf32>
    %cst_111 = arith.constant 1.000000e+00 : f32
    %496 = vector.broadcast %cst_111 : f32 to vector<2x64xf32>
    %497 = arith.addf %496, %495 : vector<2x64xf32>
    %498 = arith.divf %496, %497 : vector<2x64xf32>
    %499 = arith.mulf %490, %411 : vector<2x64xf32>
    %500 = arith.mulf %484, %492 : vector<2x64xf32>
    %501 = arith.addf %499, %500 : vector<2x64xf32>
    %502 = math.tanh %501 : vector<2x64xf32>
    %503 = arith.mulf %498, %502 : vector<2x64xf32>
    %504 = vector.extract_strided_slice %473 {offsets = [0, 0], sizes = [2, 64], strides = [1, 1]} : vector<2x256xf32> to vector<2x64xf32>
    %505 = arith.negf %504 : vector<2x64xf32>
    %506 = math.exp %505 : vector<2x64xf32>
    %cst_112 = arith.constant 1.000000e+00 : f32
    %507 = vector.broadcast %cst_112 : f32 to vector<2x64xf32>
    %508 = arith.addf %507, %506 : vector<2x64xf32>
    %509 = arith.divf %507, %508 : vector<2x64xf32>
    %510 = vector.extract_strided_slice %473 {offsets = [0, 64], sizes = [2, 64], strides = [1, 1]} : vector<2x256xf32> to vector<2x64xf32>
    %511 = arith.negf %510 : vector<2x64xf32>
    %512 = math.exp %511 : vector<2x64xf32>
    %cst_113 = arith.constant 1.000000e+00 : f32
    %513 = vector.broadcast %cst_113 : f32 to vector<2x64xf32>
    %514 = arith.addf %513, %512 : vector<2x64xf32>
    %515 = arith.divf %513, %514 : vector<2x64xf32>
    %516 = vector.extract_strided_slice %473 {offsets = [0, 128], sizes = [2, 64], strides = [1, 1]} : vector<2x256xf32> to vector<2x64xf32>
    %517 = math.tanh %516 : vector<2x64xf32>
    %518 = vector.extract_strided_slice %473 {offsets = [0, 192], sizes = [2, 64], strides = [1, 1]} : vector<2x256xf32> to vector<2x64xf32>
    %519 = arith.negf %518 : vector<2x64xf32>
    %520 = math.exp %519 : vector<2x64xf32>
    %cst_114 = arith.constant 1.000000e+00 : f32
    %521 = vector.broadcast %cst_114 : f32 to vector<2x64xf32>
    %522 = arith.addf %521, %520 : vector<2x64xf32>
    %523 = arith.divf %521, %522 : vector<2x64xf32>
    %524 = arith.mulf %515, %436 : vector<2x64xf32>
    %525 = arith.mulf %509, %517 : vector<2x64xf32>
    %526 = arith.addf %524, %525 : vector<2x64xf32>
    %527 = math.tanh %526 : vector<2x64xf32>
    %528 = arith.mulf %523, %527 : vector<2x64xf32>
    %529 = vector.extract_strided_slice %478 {offsets = [0, 0], sizes = [2, 64], strides = [1, 1]} : vector<2x256xf32> to vector<2x64xf32>
    %530 = arith.negf %529 : vector<2x64xf32>
    %531 = math.exp %530 : vector<2x64xf32>
    %cst_115 = arith.constant 1.000000e+00 : f32
    %532 = vector.broadcast %cst_115 : f32 to vector<2x64xf32>
    %533 = arith.addf %532, %531 : vector<2x64xf32>
    %534 = arith.divf %532, %533 : vector<2x64xf32>
    %535 = vector.extract_strided_slice %478 {offsets = [0, 64], sizes = [2, 64], strides = [1, 1]} : vector<2x256xf32> to vector<2x64xf32>
    %536 = arith.negf %535 : vector<2x64xf32>
    %537 = math.exp %536 : vector<2x64xf32>
    %cst_116 = arith.constant 1.000000e+00 : f32
    %538 = vector.broadcast %cst_116 : f32 to vector<2x64xf32>
    %539 = arith.addf %538, %537 : vector<2x64xf32>
    %540 = arith.divf %538, %539 : vector<2x64xf32>
    %541 = vector.extract_strided_slice %478 {offsets = [0, 128], sizes = [2, 64], strides = [1, 1]} : vector<2x256xf32> to vector<2x64xf32>
    %542 = math.tanh %541 : vector<2x64xf32>
    %543 = vector.extract_strided_slice %478 {offsets = [0, 192], sizes = [2, 64], strides = [1, 1]} : vector<2x256xf32> to vector<2x64xf32>
    %544 = arith.negf %543 : vector<2x64xf32>
    %545 = math.exp %544 : vector<2x64xf32>
    %cst_117 = arith.constant 1.000000e+00 : f32
    %546 = vector.broadcast %cst_117 : f32 to vector<2x64xf32>
    %547 = arith.addf %546, %545 : vector<2x64xf32>
    %548 = arith.divf %546, %547 : vector<2x64xf32>
    %549 = arith.mulf %540, %461 : vector<2x64xf32>
    %550 = arith.mulf %534, %542 : vector<2x64xf32>
    %551 = arith.addf %549, %550 : vector<2x64xf32>
    %552 = math.tanh %551 : vector<2x64xf32>
    %553 = arith.mulf %548, %552 : vector<2x64xf32>
    %554 = vector.extract_strided_slice %6 {offsets = [14, 0], sizes = [2, 256], strides = [1, 1]} : vector<16x256xf32> to vector<2x256xf32>
    %555 = arith.truncf %503 : vector<2x64xf32> to vector<2x64xbf16>
    %c0_118 = arith.constant 0 : index
    %c0_119 = arith.constant 0 : index
    %556 = vector.load %arg3[%c0_118, %c0_119] : memref<64x256xbf16, #tpu.memory_space<vmem>>, vector<64x256xbf16>
    %cst_120 = arith.constant dense<0.000000e+00> : vector<2x256xf32>
    %557 = tpu.matmul %555, %556, %cst_120 {dimension_numbers = #tpu.dot_dimension_numbers<[1], [0], [0], [1], [0, 0, 1, 1], [], []>} : vector<2x64xbf16>, vector<64x256xbf16>, vector<2x256xf32> -> vector<2x256xf32>
    %558 = arith.addf %554, %557 : vector<2x256xf32>
    %559 = tpu.concatenate %503, %528 in 1 : vector<2x64xf32>, vector<2x64xf32> -> vector<2x128xf32>
    %560 = arith.truncf %559 : vector<2x128xf32> to vector<2x128xbf16>
    %c0_121 = arith.constant 0 : index
    %c0_122 = arith.constant 0 : index
    %561 = vector.load %arg4[%c0_121, %c0_122] : memref<128x256xbf16, #tpu.memory_space<vmem>>, vector<128x256xbf16>
    %cst_123 = arith.constant dense<0.000000e+00> : vector<2x256xf32>
    %562 = tpu.matmul %560, %561, %cst_123 {dimension_numbers = #tpu.dot_dimension_numbers<[1], [0], [0], [1], [0, 0, 1, 1], [], []>} : vector<2x128xbf16>, vector<128x256xbf16>, vector<2x256xf32> -> vector<2x256xf32>
    %563 = arith.addf %562, %9 : vector<2x256xf32>
    %564 = tpu.concatenate %528, %553 in 1 : vector<2x64xf32>, vector<2x64xf32> -> vector<2x128xf32>
    %565 = arith.truncf %564 : vector<2x128xf32> to vector<2x128xbf16>
    %c0_124 = arith.constant 0 : index
    %c0_125 = arith.constant 0 : index
    %566 = vector.load %arg6[%c0_124, %c0_125] : memref<128x256xbf16, #tpu.memory_space<vmem>>, vector<128x256xbf16>
    %cst_126 = arith.constant dense<0.000000e+00> : vector<2x256xf32>
    %567 = tpu.matmul %565, %566, %cst_126 {dimension_numbers = #tpu.dot_dimension_numbers<[1], [0], [0], [1], [0, 0, 1, 1], [], []>} : vector<2x128xbf16>, vector<128x256xbf16>, vector<2x256xf32> -> vector<2x256xf32>
    %568 = arith.addf %567, %12 : vector<2x256xf32>
    %569 = vector.extract_strided_slice %558 {offsets = [0, 0], sizes = [2, 64], strides = [1, 1]} : vector<2x256xf32> to vector<2x64xf32>
    %570 = arith.negf %569 : vector<2x64xf32>
    %571 = math.exp %570 : vector<2x64xf32>
    %cst_127 = arith.constant 1.000000e+00 : f32
    %572 = vector.broadcast %cst_127 : f32 to vector<2x64xf32>
    %573 = arith.addf %572, %571 : vector<2x64xf32>
    %574 = arith.divf %572, %573 : vector<2x64xf32>
    %575 = vector.extract_strided_slice %558 {offsets = [0, 64], sizes = [2, 64], strides = [1, 1]} : vector<2x256xf32> to vector<2x64xf32>
    %576 = arith.negf %575 : vector<2x64xf32>
    %577 = math.exp %576 : vector<2x64xf32>
    %cst_128 = arith.constant 1.000000e+00 : f32
    %578 = vector.broadcast %cst_128 : f32 to vector<2x64xf32>
    %579 = arith.addf %578, %577 : vector<2x64xf32>
    %580 = arith.divf %578, %579 : vector<2x64xf32>
    %581 = vector.extract_strided_slice %558 {offsets = [0, 128], sizes = [2, 64], strides = [1, 1]} : vector<2x256xf32> to vector<2x64xf32>
    %582 = math.tanh %581 : vector<2x64xf32>
    %583 = vector.extract_strided_slice %558 {offsets = [0, 192], sizes = [2, 64], strides = [1, 1]} : vector<2x256xf32> to vector<2x64xf32>
    %584 = arith.negf %583 : vector<2x64xf32>
    %585 = math.exp %584 : vector<2x64xf32>
    %cst_129 = arith.constant 1.000000e+00 : f32
    %586 = vector.broadcast %cst_129 : f32 to vector<2x64xf32>
    %587 = arith.addf %586, %585 : vector<2x64xf32>
    %588 = arith.divf %586, %587 : vector<2x64xf32>
    %589 = arith.mulf %580, %501 : vector<2x64xf32>
    %590 = arith.mulf %574, %582 : vector<2x64xf32>
    %591 = arith.addf %589, %590 : vector<2x64xf32>
    %592 = math.tanh %591 : vector<2x64xf32>
    %593 = arith.mulf %588, %592 : vector<2x64xf32>
    %594 = vector.extract_strided_slice %563 {offsets = [0, 0], sizes = [2, 64], strides = [1, 1]} : vector<2x256xf32> to vector<2x64xf32>
    %595 = arith.negf %594 : vector<2x64xf32>
    %596 = math.exp %595 : vector<2x64xf32>
    %cst_130 = arith.constant 1.000000e+00 : f32
    %597 = vector.broadcast %cst_130 : f32 to vector<2x64xf32>
    %598 = arith.addf %597, %596 : vector<2x64xf32>
    %599 = arith.divf %597, %598 : vector<2x64xf32>
    %600 = vector.extract_strided_slice %563 {offsets = [0, 64], sizes = [2, 64], strides = [1, 1]} : vector<2x256xf32> to vector<2x64xf32>
    %601 = arith.negf %600 : vector<2x64xf32>
    %602 = math.exp %601 : vector<2x64xf32>
    %cst_131 = arith.constant 1.000000e+00 : f32
    %603 = vector.broadcast %cst_131 : f32 to vector<2x64xf32>
    %604 = arith.addf %603, %602 : vector<2x64xf32>
    %605 = arith.divf %603, %604 : vector<2x64xf32>
    %606 = vector.extract_strided_slice %563 {offsets = [0, 128], sizes = [2, 64], strides = [1, 1]} : vector<2x256xf32> to vector<2x64xf32>
    %607 = math.tanh %606 : vector<2x64xf32>
    %608 = vector.extract_strided_slice %563 {offsets = [0, 192], sizes = [2, 64], strides = [1, 1]} : vector<2x256xf32> to vector<2x64xf32>
    %609 = arith.negf %608 : vector<2x64xf32>
    %610 = math.exp %609 : vector<2x64xf32>
    %cst_132 = arith.constant 1.000000e+00 : f32
    %611 = vector.broadcast %cst_132 : f32 to vector<2x64xf32>
    %612 = arith.addf %611, %610 : vector<2x64xf32>
    %613 = arith.divf %611, %612 : vector<2x64xf32>
    %614 = arith.mulf %605, %526 : vector<2x64xf32>
    %615 = arith.mulf %599, %607 : vector<2x64xf32>
    %616 = arith.addf %614, %615 : vector<2x64xf32>
    %617 = math.tanh %616 : vector<2x64xf32>
    %618 = arith.mulf %613, %617 : vector<2x64xf32>
    %619 = vector.extract_strided_slice %568 {offsets = [0, 0], sizes = [2, 64], strides = [1, 1]} : vector<2x256xf32> to vector<2x64xf32>
    %620 = arith.negf %619 : vector<2x64xf32>
    %621 = math.exp %620 : vector<2x64xf32>
    %cst_133 = arith.constant 1.000000e+00 : f32
    %622 = vector.broadcast %cst_133 : f32 to vector<2x64xf32>
    %623 = arith.addf %622, %621 : vector<2x64xf32>
    %624 = arith.divf %622, %623 : vector<2x64xf32>
    %625 = vector.extract_strided_slice %568 {offsets = [0, 64], sizes = [2, 64], strides = [1, 1]} : vector<2x256xf32> to vector<2x64xf32>
    %626 = arith.negf %625 : vector<2x64xf32>
    %627 = math.exp %626 : vector<2x64xf32>
    %cst_134 = arith.constant 1.000000e+00 : f32
    %628 = vector.broadcast %cst_134 : f32 to vector<2x64xf32>
    %629 = arith.addf %628, %627 : vector<2x64xf32>
    %630 = arith.divf %628, %629 : vector<2x64xf32>
    %631 = vector.extract_strided_slice %568 {offsets = [0, 128], sizes = [2, 64], strides = [1, 1]} : vector<2x256xf32> to vector<2x64xf32>
    %632 = math.tanh %631 : vector<2x64xf32>
    %633 = vector.extract_strided_slice %568 {offsets = [0, 192], sizes = [2, 64], strides = [1, 1]} : vector<2x256xf32> to vector<2x64xf32>
    %634 = arith.negf %633 : vector<2x64xf32>
    %635 = math.exp %634 : vector<2x64xf32>
    %cst_135 = arith.constant 1.000000e+00 : f32
    %636 = vector.broadcast %cst_135 : f32 to vector<2x64xf32>
    %637 = arith.addf %636, %635 : vector<2x64xf32>
    %638 = arith.divf %636, %637 : vector<2x64xf32>
    %639 = arith.mulf %630, %551 : vector<2x64xf32>
    %640 = arith.mulf %624, %632 : vector<2x64xf32>
    %641 = arith.addf %639, %640 : vector<2x64xf32>
    %642 = math.tanh %641 : vector<2x64xf32>
    %643 = arith.mulf %638, %642 : vector<2x64xf32>
    %644 = tpu.concatenate %593, %618 in 1 : vector<2x64xf32>, vector<2x64xf32> -> vector<2x128xf32>
    %645 = arith.truncf %644 : vector<2x128xf32> to vector<2x128xbf16>
    %c0_136 = arith.constant 0 : index
    %c0_137 = arith.constant 0 : index
    %646 = vector.load %arg4[%c0_136, %c0_137] : memref<128x256xbf16, #tpu.memory_space<vmem>>, vector<128x256xbf16>
    %cst_138 = arith.constant dense<0.000000e+00> : vector<2x256xf32>
    %647 = tpu.matmul %645, %646, %cst_138 {dimension_numbers = #tpu.dot_dimension_numbers<[1], [0], [0], [1], [0, 0, 1, 1], [], []>} : vector<2x128xbf16>, vector<128x256xbf16>, vector<2x256xf32> -> vector<2x256xf32>
    %648 = arith.addf %647, %9 : vector<2x256xf32>
    %649 = tpu.concatenate %618, %643 in 1 : vector<2x64xf32>, vector<2x64xf32> -> vector<2x128xf32>
    %650 = arith.truncf %649 : vector<2x128xf32> to vector<2x128xbf16>
    %c0_139 = arith.constant 0 : index
    %c0_140 = arith.constant 0 : index
    %651 = vector.load %arg6[%c0_139, %c0_140] : memref<128x256xbf16, #tpu.memory_space<vmem>>, vector<128x256xbf16>
    %cst_141 = arith.constant dense<0.000000e+00> : vector<2x256xf32>
    %652 = tpu.matmul %650, %651, %cst_141 {dimension_numbers = #tpu.dot_dimension_numbers<[1], [0], [0], [1], [0, 0, 1, 1], [], []>} : vector<2x128xbf16>, vector<128x256xbf16>, vector<2x256xf32> -> vector<2x256xf32>
    %653 = arith.addf %652, %12 : vector<2x256xf32>
    %654 = vector.extract_strided_slice %648 {offsets = [0, 0], sizes = [2, 64], strides = [1, 1]} : vector<2x256xf32> to vector<2x64xf32>
    %655 = arith.negf %654 : vector<2x64xf32>
    %656 = math.exp %655 : vector<2x64xf32>
    %cst_142 = arith.constant 1.000000e+00 : f32
    %657 = vector.broadcast %cst_142 : f32 to vector<2x64xf32>
    %658 = arith.addf %657, %656 : vector<2x64xf32>
    %659 = arith.divf %657, %658 : vector<2x64xf32>
    %660 = vector.extract_strided_slice %648 {offsets = [0, 64], sizes = [2, 64], strides = [1, 1]} : vector<2x256xf32> to vector<2x64xf32>
    %661 = arith.negf %660 : vector<2x64xf32>
    %662 = math.exp %661 : vector<2x64xf32>
    %cst_143 = arith.constant 1.000000e+00 : f32
    %663 = vector.broadcast %cst_143 : f32 to vector<2x64xf32>
    %664 = arith.addf %663, %662 : vector<2x64xf32>
    %665 = arith.divf %663, %664 : vector<2x64xf32>
    %666 = vector.extract_strided_slice %648 {offsets = [0, 128], sizes = [2, 64], strides = [1, 1]} : vector<2x256xf32> to vector<2x64xf32>
    %667 = math.tanh %666 : vector<2x64xf32>
    %668 = vector.extract_strided_slice %648 {offsets = [0, 192], sizes = [2, 64], strides = [1, 1]} : vector<2x256xf32> to vector<2x64xf32>
    %669 = arith.negf %668 : vector<2x64xf32>
    %670 = math.exp %669 : vector<2x64xf32>
    %cst_144 = arith.constant 1.000000e+00 : f32
    %671 = vector.broadcast %cst_144 : f32 to vector<2x64xf32>
    %672 = arith.addf %671, %670 : vector<2x64xf32>
    %673 = arith.divf %671, %672 : vector<2x64xf32>
    %674 = arith.mulf %665, %616 : vector<2x64xf32>
    %675 = arith.mulf %659, %667 : vector<2x64xf32>
    %676 = arith.addf %674, %675 : vector<2x64xf32>
    %677 = math.tanh %676 : vector<2x64xf32>
    %678 = arith.mulf %673, %677 : vector<2x64xf32>
    %679 = vector.extract_strided_slice %653 {offsets = [0, 0], sizes = [2, 64], strides = [1, 1]} : vector<2x256xf32> to vector<2x64xf32>
    %680 = arith.negf %679 : vector<2x64xf32>
    %681 = math.exp %680 : vector<2x64xf32>
    %cst_145 = arith.constant 1.000000e+00 : f32
    %682 = vector.broadcast %cst_145 : f32 to vector<2x64xf32>
    %683 = arith.addf %682, %681 : vector<2x64xf32>
    %684 = arith.divf %682, %683 : vector<2x64xf32>
    %685 = vector.extract_strided_slice %653 {offsets = [0, 64], sizes = [2, 64], strides = [1, 1]} : vector<2x256xf32> to vector<2x64xf32>
    %686 = arith.negf %685 : vector<2x64xf32>
    %687 = math.exp %686 : vector<2x64xf32>
    %cst_146 = arith.constant 1.000000e+00 : f32
    %688 = vector.broadcast %cst_146 : f32 to vector<2x64xf32>
    %689 = arith.addf %688, %687 : vector<2x64xf32>
    %690 = arith.divf %688, %689 : vector<2x64xf32>
    %691 = vector.extract_strided_slice %653 {offsets = [0, 128], sizes = [2, 64], strides = [1, 1]} : vector<2x256xf32> to vector<2x64xf32>
    %692 = math.tanh %691 : vector<2x64xf32>
    %693 = vector.extract_strided_slice %653 {offsets = [0, 192], sizes = [2, 64], strides = [1, 1]} : vector<2x256xf32> to vector<2x64xf32>
    %694 = arith.negf %693 : vector<2x64xf32>
    %695 = math.exp %694 : vector<2x64xf32>
    %cst_147 = arith.constant 1.000000e+00 : f32
    %696 = vector.broadcast %cst_147 : f32 to vector<2x64xf32>
    %697 = arith.addf %696, %695 : vector<2x64xf32>
    %698 = arith.divf %696, %697 : vector<2x64xf32>
    %699 = arith.mulf %690, %641 : vector<2x64xf32>
    %700 = arith.mulf %684, %692 : vector<2x64xf32>
    %701 = arith.addf %699, %700 : vector<2x64xf32>
    %702 = math.tanh %701 : vector<2x64xf32>
    %703 = arith.mulf %698, %702 : vector<2x64xf32>
    %704 = tpu.concatenate %678, %703 in 1 : vector<2x64xf32>, vector<2x64xf32> -> vector<2x128xf32>
    %705 = arith.truncf %704 : vector<2x128xf32> to vector<2x128xbf16>
    %c0_148 = arith.constant 0 : index
    %c0_149 = arith.constant 0 : index
    %706 = vector.load %arg6[%c0_148, %c0_149] : memref<128x256xbf16, #tpu.memory_space<vmem>>, vector<128x256xbf16>
    %cst_150 = arith.constant dense<0.000000e+00> : vector<2x256xf32>
    %707 = tpu.matmul %705, %706, %cst_150 {dimension_numbers = #tpu.dot_dimension_numbers<[1], [0], [0], [1], [0, 0, 1, 1], [], []>} : vector<2x128xbf16>, vector<128x256xbf16>, vector<2x256xf32> -> vector<2x256xf32>
    %708 = arith.addf %707, %12 : vector<2x256xf32>
    %709 = vector.extract_strided_slice %708 {offsets = [0, 0], sizes = [2, 64], strides = [1, 1]} : vector<2x256xf32> to vector<2x64xf32>
    %710 = arith.negf %709 : vector<2x64xf32>
    %711 = math.exp %710 : vector<2x64xf32>
    %cst_151 = arith.constant 1.000000e+00 : f32
    %712 = vector.broadcast %cst_151 : f32 to vector<2x64xf32>
    %713 = arith.addf %712, %711 : vector<2x64xf32>
    %714 = arith.divf %712, %713 : vector<2x64xf32>
    %715 = vector.extract_strided_slice %708 {offsets = [0, 64], sizes = [2, 64], strides = [1, 1]} : vector<2x256xf32> to vector<2x64xf32>
    %716 = arith.negf %715 : vector<2x64xf32>
    %717 = math.exp %716 : vector<2x64xf32>
    %cst_152 = arith.constant 1.000000e+00 : f32
    %718 = vector.broadcast %cst_152 : f32 to vector<2x64xf32>
    %719 = arith.addf %718, %717 : vector<2x64xf32>
    %720 = arith.divf %718, %719 : vector<2x64xf32>
    %721 = vector.extract_strided_slice %708 {offsets = [0, 128], sizes = [2, 64], strides = [1, 1]} : vector<2x256xf32> to vector<2x64xf32>
    %722 = math.tanh %721 : vector<2x64xf32>
    %723 = vector.extract_strided_slice %708 {offsets = [0, 192], sizes = [2, 64], strides = [1, 1]} : vector<2x256xf32> to vector<2x64xf32>
    %724 = arith.negf %723 : vector<2x64xf32>
    %725 = math.exp %724 : vector<2x64xf32>
    %cst_153 = arith.constant 1.000000e+00 : f32
    %726 = vector.broadcast %cst_153 : f32 to vector<2x64xf32>
    %727 = arith.addf %726, %725 : vector<2x64xf32>
    %728 = arith.divf %726, %727 : vector<2x64xf32>
    %729 = arith.mulf %720, %701 : vector<2x64xf32>
    %730 = arith.mulf %714, %722 : vector<2x64xf32>
    %731 = arith.addf %729, %730 : vector<2x64xf32>
    %732 = math.tanh %731 : vector<2x64xf32>
    %733 = arith.mulf %728, %732 : vector<2x64xf32>
    %734 = arith.truncf %733 : vector<2x64xf32> to vector<2x64xbf16>
    %c0_154 = arith.constant 0 : index
    %c0_155 = arith.constant 0 : index
    %735 = vector.load %arg8[%c0_154, %c0_155] : memref<64x32xbf16, #tpu.memory_space<vmem>>, vector<64x32xbf16>
    %cst_156 = arith.constant dense<0.000000e+00> : vector<2x32xf32>
    %736 = tpu.matmul %734, %735, %cst_156 {dimension_numbers = #tpu.dot_dimension_numbers<[1], [0], [0], [1], [0, 0, 1, 1], [], []>} : vector<2x64xbf16>, vector<64x32xbf16>, vector<2x32xf32> -> vector<2x32xf32>
    %c0_157 = arith.constant 0 : index
    %c0_158 = arith.constant 0 : index
    %737 = vector.load %arg9[%c0_157, %c0_158] : memref<1x32xf32, #tpu.memory_space<vmem>>, vector<1x32xf32>
    %738 = vector.broadcast %737 : vector<1x32xf32> to vector<2x32xf32>
    %739 = arith.addf %736, %738 : vector<2x32xf32>
    %cst_159 = arith.constant 0.000000e+00 : f32
    %740 = vector.broadcast %cst_159 : f32 to vector<2x32xf32>
    %741 = arith.maximumf %739, %740 : vector<2x32xf32>
    %c0_160 = arith.constant 0 : index
    %c0_161 = arith.constant 0 : index
    %742 = vector.load %arg10[%c0_160, %c0_161] : memref<1x32xf32, #tpu.memory_space<vmem>>, vector<1x32xf32>
    %743 = vector.broadcast %742 : vector<1x32xf32> to vector<2x32xf32>
    %744 = arith.mulf %741, %743 : vector<2x32xf32>
    %cst_162 = arith.constant dense<0.000000e+00> : vector<2xf32>
    %745 = vector.multi_reduction <add>, %744, %cst_162 [1] : vector<2x32xf32> to vector<2xf32>
    %746 = vector.shape_cast %745 : vector<2xf32> to vector<2x1xf32>
    %c0_163 = arith.constant 0 : index
    %c0_164 = arith.constant 0 : index
    %747 = vector.load %arg11[%c0_163, %c0_164] : memref<1x1xf32, #tpu.memory_space<vmem>>, vector<1x1xf32>
    %748 = vector.broadcast %747 : vector<1x1xf32> to vector<2x1xf32>
    %749 = arith.addf %746, %748 : vector<2x1xf32>
    %750 = arith.negf %749 : vector<2x1xf32>
    %751 = math.exp %750 : vector<2x1xf32>
    %cst_165 = arith.constant 1.000000e+00 : f32
    %752 = vector.broadcast %cst_165 : f32 to vector<2x1xf32>
    %753 = arith.addf %752, %751 : vector<2x1xf32>
    %754 = arith.divf %752, %753 : vector<2x1xf32>
    %c0_166 = arith.constant 0 : index
    %c0_167 = arith.constant 0 : index
    %755 = vector.load %arg12[%c0_166, %c0_167] : memref<2x1xf32, #tpu.memory_space<vmem>>, vector<2x1xf32>
    tpu.vector_store %arg12[%c0_166, %c0_167], %754 {strides = array<i32>} : memref<2x1xf32, #tpu.memory_space<vmem>>, vector<2x1xf32>,
    return
  }
}

</mosaic_0001>

<bundles_post_ra>
// kernel: complex_diabetes_lstm_forward.1
= control target key start
LH: loop header
LB: loop body
LE: loop exit
PB: predicated region body
PF: predicated region fallthrough
CT: control target
= control target key end

     0   :  { %s3830_s0 = inlined_call_operand.vmem [shape: f32[16,8], index: 0, kind: input, shape index: {}]   ;;  %s3831_s1 = inlined_call_operand.vmem [shape: bf16[8,256], index: 1, kind: input, shape index: {}]   ;;  %s3832_s2 = inlined_call_operand.vmem [shape: f32[1,256], index: 2, kind: input, shape index: {}]   ;;  %s3833_s3 = inlined_call_operand.vmem [shape: bf16[64,256], index: 3, kind: input, shape index: {}]   ;;  %s3834_s4 = inlined_call_operand.hbm [shape: bf16[128,256], index: 4, kind: input, shape index: {}]   ;;  %s3835_s5 = inlined_call_operand.vmem [shape: f32[1,256], index: 5, kind: input, shape index: {}]   ;;  %s3836_s6 = inlined_call_operand.hbm [shape: bf16[128,256], index: 6, kind: input, shape index: {}]   ;;  %s3837_s7 = inlined_call_operand.vmem [shape: f32[1,256], index: 7, kind: input, shape index: {}]   ;;  %s3838_s8 = inlined_call_operand.vmem [shape: bf16[64,32], index: 8, kind: input, shape index: {}]   ;;  %s3839_s9 = inlined_call_operand.vmem [shape: f32[1,32], index: 9, kind: input, shape index: {}]   ;;  %s3840_s10 = inlined_call_operand.vmem [shape: f32[1,32], index: 10, kind: input, shape index: {}]   ;;  %s3841_s11 = inlined_call_operand.<no memory space> [shape: f32[1,1], index: 11, kind: input, shape index: {}]   ;;  %s3842_s12 = inlined_call_operand.vmem [shape: f32[2,1], index: 12, kind: output, shape index: {}]  }
   0x1   :  { %v17_v0 = vstv %s3841_s11 }
   0x2   :  { %18 = vst [vmem:[#allocation2] sm:$0x1] %v17_v0 }
   0x3   :  { %19 = vsyncpa [#allocation4], 0 }
   0x4   :  { %20 = vsyncpa [#allocation6], 0  ;;  %s2886_s23 = smov [#allocation3]   ;;  %s2838_s27 = scalar_lea.hbm %s3834_s4, 2048 }
   0x5   :  { %s34_s24 = sshll.u32 %s2886_s23, 4  ;;  %p2839_p0 = scmp.ne.s32.totalorder %s3834_s4, %s2838_s27  ;;  %s35_s24 = int_to_ptr.vmem [resolvable:$true] %s34_s24 }
   0x6   :  { %p2842_p1 = scmp.lt.u32.totalorder %s2838_s27, %s3834_s4 }
   0x8   :  { %p2844_p2 = pnand %p2842_p1, %p2839_p0 }
   0xa   :  { %2847 = shalt.err (!%p2844_p2)
}
   0xb   :  { %s2848_s11 = scalar_lea.vmem %s35_s24, 2048  ;;  %p2853_p4 = scmp.lt.s32.totalorder %s35_s24, %s35_s24 }
   0xc   :  { %p2849_p3 = scmp.ne.s32.totalorder %s35_s24, %s2848_s11  ;;  %p2854_p5 = scmp.lt.s32.totalorder %s2848_s11, %s2848_s11 }
   0xe   :  { %p2855_p6 = por %p2854_p5, %p2853_p4 }
  0x10   :  { %p2856_p7 = pnand %p2855_p6, %p2849_p3 }
  0x12   :  { %2859 = shalt.err (!%p2856_p7)
}
  0x13   :  { %s2887_s14 = smov 128   ;;  %s2888_s15 = smov 8  }
  0x14   :  { %40 = dma.hbm_to_vmem [thread:$0]  %s3834_s4, 2048, %s35_s24, [#allocation4], %s2887_s14, %s2887_s14, %s2888_s15  }
  0x15   :  { %s2889_s18 = smov [#allocation5]   ;;  %s2860_s22 = scalar_lea.hbm %s3836_s6, 2048 }
  0x16   :  { %s48_s19 = sshll.u32 %s2889_s18, 4  ;;  %p2861_p8 = scmp.ne.s32.totalorder %s3836_s6, %s2860_s22  ;;  %s49_s19 = int_to_ptr.vmem [resolvable:$true] %s48_s19 }
  0x17   :  { %p2864_p9 = scmp.lt.u32.totalorder %s2860_s22, %s3836_s6 }
  0x19   :  { %p2866_p10 = pnand %p2864_p9, %p2861_p8 }
  0x1b   :  { %2869 = shalt.err (!%p2866_p10)
}
  0x1c   :  { %s2870_s28 = scalar_lea.vmem %s49_s19, 2048  ;;  %p2875_p12 = scmp.lt.s32.totalorder %s49_s19, %s49_s19 }
  0x1d   :  { %p2871_p11 = scmp.ne.s32.totalorder %s49_s19, %s2870_s28  ;;  %p2876_p13 = scmp.lt.s32.totalorder %s2870_s28, %s2870_s28 }
  0x1f   :  { %p2877_p0 = por %p2876_p13, %p2875_p12 }
  0x21   :  { %p2878_p1 = pnand %p2877_p0, %p2871_p11 }
  0x23   :  { %2881 = shalt.err (!%p2878_p1)
}
  0x24   :  { %54 = dma.hbm_to_vmem [thread:$0]  %s3836_s6, 2048, %s49_s19, [#allocation6], %s2887_s14, %s2887_s14, %s2888_s15  }
  0x25   :  { %2882 = dma.done.wait [#allocation4], 2048  }
  0x26   :  { %2883 = vsyncadd [#allocation4], 4294965248 }
  0x27   :  { %2884 = dma.done.wait [#allocation6], 2048  }
  0x28   :  { %2885 = vsyncadd [#allocation6], 4294965248  ;;  %v3843_v1 = vmov 0   ;;  %v2991_v2 = vld [vmem:[%s3833_s3 + $0x4] ss:$8 sps:$4 sm:$0xff]   ;;  %vm97_vm0 = vcmask 1043456   ;;  %v78_v17 = vlaneseq }
  0x29   :  { %136 = vmatprep.mubr.bf16.mxu0 %v3843_v1  ;;  %255 = vmatprep.mubr.bf16.mxu1 %v3843_v1  ;;  %v2996_v3 = vld [vmem:[%s3833_s3] ss:$8 sps:$4 sm:$0xff]   ;;  %v3002_v4 = vld [vmem:[%s3833_s3 + $0x14] ss:$8 sps:$4 sm:$0xff]   ;;  %v3011_v6 = vld [vmem:[%s3833_s3 + $0x10] ss:$8 sps:$4 sm:$0xff]  }
  0x2a   :  { %223 = vmatprep.subr.bf16.mxu1 %v2991_v2  ;;  %v75_v5 = vld [vmem:[%s3831_s1] sm:$0xff]  ;;  %v73_v11 = vld [vmem:[%s3830_s0 + $0x8] sm:$0xff]  ;;  %vm93_vm1 = vcmask 64512   ;;  %v3033_v15 = vld [vmem:[%s3833_s3 + $0x34] ss:$8 sps:$4 sm:$0xff]   ;;  %v79_v18 = vshrl.u32 %v78_v17, 7 }
  0x2b   :  { %224 = vmatpush1.bf16.msra.mxu1 %v2996_v3  ;;  %v2302_v7 = vcombine.high %v75_v5, %v75_v5  ;;  %v2301_v8 = vcombine.low %v75_v5, %v75_v5  ;;  %v3017_v9 = vld [vmem:[%s3833_s3 + $0x24] ss:$8 sps:$4 sm:$0xff]   ;;  %v3028_v14 = vld [vmem:[%s3833_s3 + $0x20] ss:$8 sps:$4 sm:$0xff]   ;;  %v3041_v16 = vld [vmem:[%s3833_s3 + $0x30] ss:$8 sps:$4 sm:$0xff]  }
  0x2c   :  { %225 = vmatprep.subr.bf16.mxu1 %v3002_v4  ;;  %v72_v10 = vld [vmem:[%s3830_s0] sm:$0xff]  ;;  %v3057_v19 = vsub.s32 0, %v79_v18  ;;  %v3062_v21 = vsub.s32 1, %v79_v18  ;;  %v3085_v47 = vld [vmem:[#allocation3 + $0x10] ss:$8 sps:$4 sm:$0xff]   ;;  %vm219_vm2 = vcmask 523264  }
  0x2d   :  { %2303 = vmatprep.subr.msk.bf16.mxu0 %vm97_vm0, %v2302_v7  ;;  %v99_v12 = vsel %vm97_vm0, %v2301_v8, 0  ;;  %v74_v13 = vpack.c.bf16 %v73_v11, %v72_v10  ;;  %v76_v20 = vld [vmem:[%s3832_s2] sm:$0x3]  ;;  %s2891_s2 = smov 64   ;;  %v3077_v44 = vld [vmem:[#allocation3 + $0x4] ss:$8 sps:$4 sm:$0xff]   ;;  %vm3136_vm3 = vmpackc.low %vm219_vm2, %vm219_vm2 }
  0x2e   :  { %105 = vmatpush1.bf16.msra.mxu0 %v99_v12  ;;  %v81_v22 = vrot.slane %v76_v20, %v3057_v19  ;;  %v85_v24 = vrot.slane %v76_v20, %v3062_v21  ;;  %3854 = vst [vmem:[#allocation11_spill] sm:$0xff] %v3077_v44  ;;  %v3079_v45 = vld [vmem:[#allocation3] ss:$8 sps:$4 sm:$0xff]   ;;  %v3081_v46 = vld [vmem:[#allocation3 + $0x14] ss:$8 sps:$4 sm:$0xff]   ;;  %vm2893_vm4 = vmmov 0  }
  0x2f   :  { %226 = vmatpush1.bf16.msra.mxu1 %v3011_v6  ;;  %295 = vmatprep.subr.bf16.mxu0 %v2991_v2  ;;  %v3088_v48 = vld [vmem:[#allocation3 + $0x24] ss:$8 sps:$4 sm:$0xff]   ;;  %v3091_v49 = vld [vmem:[#allocation3 + $0x20] ss:$8 sps:$4 sm:$0xff]   ;;  %v3094_v50 = vld [vmem:[#allocation3 + $0x34] ss:$8 sps:$4 sm:$0xff]  }
  0x30   :  { %227 = vmatprep.subr.bf16.mxu1 %v3017_v9  ;;  %v3097_v51 = vld [vmem:[#allocation3 + $0x30] ss:$8 sps:$4 sm:$0xff]   ;;  %v3100_v52 = vld [vmem:[#allocation3 + $0x44] ss:$8 sps:$4 sm:$0xff]   ;;  %v3103_v53 = vld [vmem:[#allocation3 + $0x40] ss:$8 sps:$4 sm:$0xff]  }
  0x31   :  { %2304 = vmatmul.mubr.msk.bf16.vlgmr.msra.gmra.mrb[0].mxu0 %vm93_vm1, %v74_v13  ;;  %v3106_v54 = vld [vmem:[#allocation3 + $0x54] ss:$8 sps:$4 sm:$0xff]   ;;  %v3109_v55 = vld [vmem:[#allocation3 + $0x50] ss:$8 sps:$4 sm:$0xff]   ;;  %v3112_v56 = vld [vmem:[#allocation3 + $0x64] ss:$8 sps:$4 sm:$0xff]  }
  0x32   :  { %296 = vmatpush1.bf16.msra.mxu0 %v2996_v3  ;;  %327 = vmatprep.mubr.bf16.mxu0 %v3843_v1  ;;  %v3115_v57 = vld [vmem:[#allocation3 + $0x60] ss:$8 sps:$4 sm:$0xff]   ;;  %v3122_v0 = vld [vmem:[#allocation3 + $0x74] ss:$8 sps:$4 sm:$0xff]   ;;  %v3124_v5 = vld [vmem:[#allocation3 + $0x70] ss:$8 sps:$4 sm:$0xff]  }
  0x33   :  { %228 = vmatpush1.bf16.msra.mxu1 %v3028_v14  ;;  %297 = vmatprep.subr.bf16.mxu0 %v3002_v4  ;;  %v147_v20 = vld [vmem:[%s3835_s5] sm:$0x3]  ;;  %vm2275_vm5 = vcmask 254976   ;;  %vm2293_vm6 = vcmask 1024  }
  0x34   :  { %229 = vmatprep.subr.bf16.mxu1 %v3033_v15 }
  0x36   :  { %298 = vmatpush1.bf16.msra.mxu0 %v3011_v6 }
  0x37   :  { %230 = vmatpush1.bf16.msra.mxu1 %v3041_v16  ;;  %299 = vmatprep.subr.bf16.mxu0 %v3017_v9 }
  0x38   :  { %446 = vmatprep.subr.bf16.mxu1 %v3077_v44 }
  0x3a   :  { %256 = vmatmul.mubr.bf16.vlgmr.msra.gmra.mrb[0].mxu1 %v3843_v1  ;;  %300 = vmatpush1.bf16.msra.mxu0 %v3028_v14 }
  0x3b   :  { %301 = vmatprep.subr.bf16.mxu0 %v3033_v15  ;;  %478 = vmatprep.mubr.bf16.mxu1 %v3843_v1 }
  0x3c   :  { %447 = vmatpush1.bf16.msra.mxu1 %v3079_v45 }
  0x3d   :  { %448 = vmatprep.subr.bf16.mxu1 %v3081_v46 }
  0x3e   :  { %302 = vmatpush1.bf16.msra.mxu0 %v3041_v16 }
  0x3f   :  { %542 = vmatprep.subr.bf16.mxu0 %v2991_v2 }
  0x40   :  { %449 = vmatpush1.bf16.msra.mxu1 %v3085_v47 }
  0x41   :  { %450 = vmatprep.subr.bf16.mxu1 %v3088_v48 }
  0x44   :  { %451 = vmatpush1.bf16.msra.mxu1 %v3091_v49 }
  0x45   :  { %452 = vmatprep.subr.bf16.mxu1 %v3094_v50 }
  0x48   :  { %453 = vmatpush1.bf16.msra.mxu1 %v3097_v51 }
  0x49   :  { %454 = vmatprep.subr.bf16.mxu1 %v3100_v52 }
  0x4c   :  { %455 = vmatpush1.bf16.msra.mxu1 %v3103_v53 }
  0x4d   :  { %456 = vmatprep.subr.bf16.mxu1 %v3106_v54 }
  0x50   :  { %457 = vmatpush1.bf16.msra.mxu1 %v3109_v55 }
  0x51   :  { %458 = vmatprep.subr.bf16.mxu1 %v3112_v56 }
  0x54   :  { %459 = vmatpush1.bf16.msra.mxu1 %v3115_v57 }
  0x55   :  { %460 = vmatprep.subr.bf16.mxu1 %v3122_v0 }
  0x58   :  { %461 = vmatpush1.bf16.msra.mxu1 %v3124_v5 }
 0x104   :  { %v138_v23 = vpop.f32.mrb[0].mxu0 }
 0x105   :  { %v140_v25 = vpop.f32.mrb[1].mxu0  ;;  %v3070_v30 = vadd.f32 %v138_v23, %v81_v22 }
 0x106   :  { %v142_v26 = vpop.f32.mrb[2].mxu0  ;;  %v3073_v37 = vadd.f32 %v140_v25, %v85_v24 }
 0x107   :  { %v3066_v27 = vadd.f32 %v142_v26, %v81_v22  ;;  %v144_v28 = vpop.f32.mrb[3].mxu0  ;;  %v3153_v26 = vrot.slane %v147_v20, %v3057_v19 }
 0x108   :  { %v3068_v29 = vadd.f32 %v144_v28, %v85_v24 }
 0x109   :  { %3852 = vst [vmem:[#allocation9_spill] sm:$0xff] %v3066_v27 }
 0x10a   :  { %3853 = vst [vmem:[#allocation10_spill] sm:$0xff] %v3068_v29 }
 0x10d   :  { %v257_v31 = vpop.f32.mrb[0].mxu1 }
 0x10e   :  { %v264_v32 = vadd.f32 %v257_v31, %v3070_v30  ;;  %v259_v33 = vpop.f32.mrb[1].mxu1 }
 0x10f   :  { %v261_v34 = vpop.f32.mrb[2].mxu1  ;;  %v265_v38 = vadd.f32 %v259_v33, %v3073_v37 }
 0x110   :  { %v2313_v35 = vmul.f32 -1.442695, %v264_v32  ;;  %v262_v36 = vpop.f32.mrb[3].mxu1 }
 0x111   :  { %v2314_v58 = vmul.f32 -1.442695, %v265_v38 }
 0x112   :  { %2506 = vpow2.f32 %v2313_v35 }
 0x113   :  { %2508 = vtanh.f32 %v265_v38 }
 0x11c   :  { %v2507_v39 = vpop.eup %2506 }
 0x11d   :  { %v269_v40 = vadd.f32 1.0, %v2507_v39  ;;  %v2509_v41 = vpop.eup %2508 }
 0x11f   :  { %2510 = vrcp.f32 %v269_v40 }
 0x120   :  { %2512 = vpow2.f32 %v2314_v58 }
 0x129   :  { %v2511_v42 = vpop.eup %2510 }
 0x12a   :  { %v280_v43 = vmul.f32 %v2511_v42, %v2509_v41  ;;  %v2513_v59 = vpop.eup %2512  ;;  %v279_v61 = vmul.f32 0.0, %v2511_v42  ;;  %v3158_v41 = vrot.slane %v147_v20, %v3062_v21 }
 0x12b   :  { %v276_v60 = vadd.f32 1.0, %v2513_v59 }
 0x12c   :  { %282 = vrot.lane.b32.xlu0 %v280_v43, %s2891_s2 }
 0x12d   :  { %2514 = vrcp.f32 %v276_v60 }
 0x137   :  { %v2515_v7 = vpop.eup %2514 }
 0x19e   :  { %v283_v62 = vpop.permute.xlu0 %282 }
 0x19f   :  { %v3119_v63 = vadd.f32 %v283_v62, %v279_v61 }
 0x1a1   :  { %2516 = vtanh.f32 %v3119_v63 }
 0x1ab   :  { %v2517_v8 = vpop.eup %2516 }
 0x1ac   :  { %v287_v10 = vmul.f32 %v2517_v8, %v2515_v7  ;;  %v501_v7 = vrot.slane %v3119_v63, 6 }
 0x1ae   :  { %v288_v11 = vpack.c.bf16 %v287_v10, %v287_v10 }
 0x1b0   :  { %290 = vrot.lane.b32.xlu0 %v288_v11, %s2891_s2 }
 0x1b4   :  { %345 = vrot.lane.b32.xlu0 %v287_v10, %s2891_s2 }
 0x222   :  { %v291_v12 = vpop.permute.xlu0 %290 }
 0x223   :  { %2315 = vmatmul.mubr.msk.bf16.vlgmr.msra.gmra.mrb[4].mxu0 %vm219_vm2, %v291_v12 }
 0x224   :  { %543 = vmatpush1.bf16.msra.mxu0 %v2996_v3  ;;  %574 = vmatprep.mubr.bf16.mxu0 %v3843_v1 }
 0x225   :  { %544 = vmatprep.subr.bf16.mxu0 %v3002_v4 }
 0x226   :  { %v346_v13 = vpop.permute.xlu0 %345 }
 0x227   :  { %v2333_v18 = vpack.c.bf16 %v346_v13, %v346_v13 }
 0x228   :  { %545 = vmatpush1.bf16.msra.mxu0 %v3011_v6 }
 0x229   :  { %2334 = vmatmul.mubr.msk.bf16.vlgmr.msra.gmra.mrb[4].mxu1 %vm3136_vm3, %v2333_v18  ;;  %546 = vmatprep.subr.bf16.mxu0 %v3017_v9 }
 0x22a   :  { %777 = vmatprep.mubr.bf16.mxu1 %v3843_v1 }
 0x22c   :  { %547 = vmatpush1.bf16.msra.mxu0 %v3028_v14 }
 0x22d   :  { %548 = vmatprep.subr.bf16.mxu0 %v3033_v15 }
 0x230   :  { %549 = vmatpush1.bf16.msra.mxu0 %v3041_v16 }
 0x231   :  { %603 = vmatprep.subr.bf16.mxu0 %v3077_v44 }
 0x2f6   :  { %v329_v22 = vpop.f32.mrb[4].mxu0 }
 0x2f7   :  { %v338_v23 = vrot.slane %v329_v22, 6  ;;  %v331_v24 = vpop.f32.mrb[5].mxu0 }
 0x2f8   :  { %v333_v25 = vpop.f32.mrb[6].mxu0  ;;  %v339_v40 = vrot.slane %v331_v24, 6 }
 0x2f9   :  { %v342_v28 = vadd.f32 %v338_v23, %v3070_v30  ;;  %v334_v31 = vpop.f32.mrb[7].mxu0 }
 0x2fa   :  { %v343_v42 = vadd.f32 %v339_v40, %v3073_v37  ;;  %v3208_v40 = vld [vmem:[#allocation5 + $0x24] ss:$8 sps:$4 sm:$0xff]  }
 0x2fb   :  { %v2335_v32 = vmul.f32 -1.442695, %v342_v28 }
 0x2fc   :  { %v480_v33 = vpop.f32.mrb[4].mxu1  ;;  %v2336_v20 = vmul.f32 -1.442695, %v343_v42 }
 0x2fd   :  { %2518 = vpow2.f32 %v2335_v32  ;;  %v481_v34 = vadd.f32 %v480_v33, %v3153_v26  ;;  %v482_v35 = vpop.f32.mrb[5].mxu1 }
 0x2fe   :  { %v484_v36 = vpop.f32.mrb[6].mxu1  ;;  %v3162_v59 = vadd.f32 %v482_v35, %v3158_v41  ;;  %v3197_v35 = vld [vmem:[#allocation5 + $0x4] ss:$8 sps:$4 sm:$0xff]  }
 0x2ff   :  { %v2337_v38 = vmul.f32 -1.442695, %v481_v34  ;;  %v485_v39 = vpop.f32.mrb[7].mxu1  ;;  %v3199_v36 = vld [vmem:[#allocation5] ss:$8 sps:$4 sm:$0xff]   ;;  %745 = vmatprep.subr.bf16.mxu1 %v3197_v35 }
 0x300   :  { %746 = vmatpush1.bf16.msra.mxu1 %v3199_v36  ;;  %v3205_v39 = vld [vmem:[#allocation5 + $0x10] ss:$8 sps:$4 sm:$0xff]  }
 0x301   :  { %2520 = vpow2.f32 %v2337_v38  ;;  %v3201_v38 = vld [vmem:[#allocation5 + $0x14] ss:$8 sps:$4 sm:$0xff]  }
 0x302   :  { %2522 = vtanh.f32 %v343_v42  ;;  %747 = vmatprep.subr.bf16.mxu1 %v3201_v38  ;;  %v3211_v42 = vld [vmem:[#allocation5 + $0x20] ss:$8 sps:$4 sm:$0xff]  }
 0x304   :  { %748 = vmatpush1.bf16.msra.mxu1 %v3205_v39 }
 0x305   :  { %749 = vmatprep.subr.bf16.mxu1 %v3208_v40 }
 0x307   :  { %v2519_v43 = vpop.eup %2518 }
 0x308   :  { %v490_v58 = vadd.f32 1.0, %v2519_v43  ;;  %v3214_v43 = vld [vmem:[#allocation5 + $0x34] ss:$8 sps:$4 sm:$0xff]   ;;  %750 = vmatpush1.bf16.msra.mxu1 %v3211_v42 }
 0x309   :  { %751 = vmatprep.subr.bf16.mxu1 %v3214_v43 }
 0x30a   :  { %2524 = vrcp.f32 %v490_v58  ;;  %v3217_v58 = vld [vmem:[#allocation5 + $0x30] ss:$8 sps:$4 sm:$0xff]  }
 0x30b   :  { %v2521_v60 = vpop.eup %2520  ;;  %2526 = vtanh.f32 %v3162_v59 }
 0x30c   :  { %v515_v61 = vadd.f32 1.0, %v2521_v60  ;;  %v2523_v62 = vpop.eup %2522  ;;  %v3220_v60 = vld [vmem:[#allocation5 + $0x44] ss:$8 sps:$4 sm:$0xff]   ;;  %752 = vmatpush1.bf16.msra.mxu1 %v3217_v58 }
 0x30d   :  { %753 = vmatprep.subr.bf16.mxu1 %v3220_v60 }
 0x30e   :  { %2528 = vrcp.f32 %v515_v61  ;;  %v3223_v61 = vld [vmem:[#allocation5 + $0x40] ss:$8 sps:$4 sm:$0xff]  }
 0x30f   :  { %2530 = vpow2.f32 %v2336_v20 }
 0x310   :  { %754 = vmatpush1.bf16.msra.mxu1 %v3223_v61 }
 0x314   :  { %v2525_v8 = vpop.eup %2524 }
 0x315   :  { %v504_v10 = vmul.f32 %v2525_v8, %v2523_v62  ;;  %v503_v11 = vmul.f32 %v2525_v8, %v501_v7  ;;  %v2527_v12 = vpop.eup %2526  ;;  %v3226_v62 = vld [vmem:[#allocation5 + $0x54] ss:$8 sps:$4 sm:$0xff]  }
 0x316   :  { %755 = vmatprep.subr.bf16.mxu1 %v3226_v62 }
 0x317   :  { %506 = vrot.lane.b32.xlu1 %v504_v10, %s2891_s2 }
 0x318   :  { %v3167_v13 = vpop.eup %2528 }
 0x319   :  { %v526_v18 = vmul.f32 %v3167_v13, %v2527_v12  ;;  %v2531_v22 = vpop.eup %2530 }
 0x31a   :  { %v497_v23 = vadd.f32 1.0, %v2531_v22  ;;  %v2338_v22 = vmul.f32 -1.442695, %v3162_v59  ;;  %v3239_v59 = vld [vmem:[#allocation5 + $0x60] ss:$8 sps:$4 sm:$0xff]  }
 0x31b   :  { %528 = vrot.lane.b32.xlu0 %v526_v18, %s2891_s2 }
 0x31c   :  { %2532 = vrcp.f32 %v497_v23 }
 0x326   :  { %v2533_v63 = vpop.eup %2532 }
 0x389   :  { %v507_v24 = vpop.permute.xlu1 %506 }
 0x38a   :  { %v3171_v25 = vadd.f32 %v507_v24, %v503_v11 }
 0x38c   :  { %2534 = vtanh.f32 %v3171_v25 }
 0x396   :  { %v2535_v28 = vpop.eup %2534 }
 0x397   :  { %v3174_v31 = vmul.f32 %v2535_v28, %v2533_v63  ;;  %v3233_v28 = vld [vmem:[#allocation5 + $0x50] ss:$8 sps:$4 sm:$0xff]  }
 0x398   :  { %756 = vmatpush1.bf16.msra.mxu1 %v3233_v28 }
 0x399   :  { %v534_v32 = vpack.c.bf16 %v3174_v31, %v3174_v31 }
 0x39b   :  { %v536_v33 = vrot.slane %v534_v32, 1 }
 0x39d   :  { %537 = vrot.lane.b32.xlu1 %v536_v33, %s2891_s2  ;;  %v529_v33 = vpop.permute.xlu0 %528 }
 0x40f   :  { %v538_v34 = vpop.permute.xlu1 %537 }
 0x410   :  { %2339 = vmatmul.mubr.msk.bf16.vlgmr.msra.gmra.mrb[8].mxu0 %vm219_vm2, %v538_v34  ;;  %v525_v34 = vmul.f32 0.0, %v3167_v13 }
 0x411   :  { %604 = vmatpush1.bf16.msra.mxu0 %v3079_v45  ;;  %635 = vmatprep.mubr.bf16.mxu0 %v3843_v1 }
 0x412   :  { %605 = vmatprep.subr.bf16.mxu0 %v3081_v46 }
 0x415   :  { %606 = vmatpush1.bf16.msra.mxu0 %v3085_v47 }
 0x416   :  { %607 = vmatprep.subr.bf16.mxu0 %v3088_v48 }
 0x419   :  { %608 = vmatpush1.bf16.msra.mxu0 %v3091_v49 }
 0x41a   :  { %609 = vmatprep.subr.bf16.mxu0 %v3094_v50 }
 0x41d   :  { %610 = vmatpush1.bf16.msra.mxu0 %v3097_v51 }
 0x41e   :  { %611 = vmatprep.subr.bf16.mxu0 %v3100_v52 }
 0x421   :  { %612 = vmatpush1.bf16.msra.mxu0 %v3103_v53 }
 0x422   :  { %613 = vmatprep.subr.bf16.mxu0 %v3106_v54 }
 0x425   :  { %614 = vmatpush1.bf16.msra.mxu0 %v3109_v55 }
 0x426   :  { %615 = vmatprep.subr.bf16.mxu0 %v3112_v56 }
 0x429   :  { %616 = vmatpush1.bf16.msra.mxu0 %v3115_v57 }
 0x42a   :  { %617 = vmatprep.subr.bf16.mxu0 %v3122_v0 }
 0x42d   :  { %618 = vmatpush1.bf16.msra.mxu0 %v3124_v5 }
 0x42e   :  { %863 = vmatprep.subr.bf16.mxu0 %v2991_v2 }
 0x4e3   :  { %v576_v7 = vpop.f32.mrb[8].mxu0 }
 0x4e4   :  { %v585_v8 = vrot.slane %v576_v7, 4  ;;  %v578_v10 = vpop.f32.mrb[9].mxu0  ;;  %v3237_v7 = vld [vmem:[#allocation5 + $0x64] ss:$8 sps:$4 sm:$0xff]  }
 0x4e5   :  { %v580_v11 = vpop.f32.mrb[10].mxu0  ;;  %v586_v23 = vrot.slane %v578_v10, 4  ;;  %757 = vmatprep.subr.bf16.mxu1 %v3237_v7 }
 0x4e6   :  { %v589_v12 = vadd.f32 %v585_v8, %v3070_v30  ;;  %v581_v18 = vpop.f32.mrb[11].mxu0  ;;  %v3241_v11 = vadd.f32 %v529_v33, %v525_v34  ;;  %758 = vmatpush1.bf16.msra.mxu1 %v3239_v59 }
 0x4e7   :  { %v590_v24 = vadd.f32 %v586_v23, %v3073_v37  ;;  %v3247_v18 = vld [vmem:[#allocation5 + $0x70] ss:$8 sps:$4 sm:$0xff]  }
 0x4e8   :  { %v2359_v20 = vmul.f32 -1.442695, %v589_v12  ;;  %v3245_v12 = vld [vmem:[#allocation5 + $0x74] ss:$8 sps:$4 sm:$0xff]  }
 0x4e9   :  { %759 = vmatprep.subr.bf16.mxu1 %v3245_v12 }
 0x4ea   :  { %2536 = vpow2.f32 %v2359_v20  ;;  %760 = vmatpush1.bf16.msra.mxu1 %v3247_v18  ;;  %v800_v20 = vrot.slane %v3171_v25, 6 }
 0x4eb   :  { %2538 = vpow2.f32 %v2338_v22  ;;  %924 = vmatprep.subr.bf16.mxu1 %v3077_v44 }
 0x4ec   :  { %2540 = vtanh.f32 %v590_v24 }
 0x4f4   :  { %v2537_v63 = vpop.eup %2536 }
 0x4f5   :  { %v789_v32 = vadd.f32 1.0, %v2537_v63  ;;  %v2539_v8 = vpop.eup %2538 }
 0x4f6   :  { %v522_v10 = vadd.f32 1.0, %v2539_v8  ;;  %v2541_v13 = vpop.eup %2540  ;;  %v2360_v8 = vmul.f32 -1.442695, %v590_v24 }
 0x4f7   :  { %2542 = vrcp.f32 %v789_v32 }
 0x4f8   :  { %2544 = vtanh.f32 %v3241_v11 }
 0x4f9   :  { %2546 = vrcp.f32 %v522_v10 }
 0x4fa   :  { %2548 = vpow2.f32 %v2360_v8 }
 0x501   :  { %v2543_v22 = vpop.eup %2542 }
 0x502   :  { %v803_v23 = vmul.f32 %v2543_v22, %v2541_v13  ;;  %v802_v63 = vmul.f32 %v2543_v22, %v800_v20  ;;  %v2545_v32 = vpop.eup %2544 }
 0x503   :  { %v2547_v33 = vpop.eup %2546 }
 0x504   :  { %805 = vrot.lane.b32.xlu1 %v803_v23, %s2891_s2  ;;  %v533_v34 = vmul.f32 %v2547_v33, %v2545_v32  ;;  %v2549_v10 = vpop.eup %2548 }
 0x505   :  { %v796_v1 = vadd.f32 1.0, %v2549_v10 }
 0x506   :  { %v596_v25 = vrot.slane %v533_v34, 6 }
 0x507   :  { %2550 = vrcp.f32 %v796_v1  ;;  %v3857_v1 = vmov 0  }
 0x508   :  { %592 = vrot.lane.b32.xlu1 %v3174_v31, %s2891_s2 }
 0x50c   :  { %644 = vrot.lane.b32.xlu1 %v533_v34, %s2891_s2 }
 0x511   :  { %v2551_v24 = vpop.eup %2550 }
 0x576   :  { %v806_v29 = vpop.permute.xlu1 %805 }
 0x577   :  { %v3258_v27 = vadd.f32 %v806_v29, %v802_v63 }
 0x579   :  { %2552 = vtanh.f32 %v3258_v27 }
 0x57a   :  { %v593_v13 = vpop.permute.xlu1 %592 }
 0x57b   :  { %v598_v20 = vsel %vm219_vm2, %v593_v13, %v596_v25 }
 0x57c   :  { %v599_v22 = vpack.c.bf16 %v598_v20, %v598_v20 }
 0x57e   :  { %v601_v31 = vrot.slane %v599_v22, 1  ;;  %v645_v23 = vpop.permute.xlu1 %644 }
 0x57f   :  { %v2357_v32 = vpack.c.bf16 %v645_v23, %v645_v23 }
 0x580   :  { %636 = vmatmul.mubr.bf16.vlgmr.msra.gmra.mrb[12].mxu0 %v601_v31 }
 0x581   :  { %2358 = vmatmul.mubr.msk.bf16.vlgmr.msra.gmra.mrb[8].mxu1 %vm3136_vm3, %v2357_v32  ;;  %864 = vmatpush1.bf16.msra.mxu0 %v2996_v3 }
 0x582   :  { %865 = vmatprep.subr.bf16.mxu0 %v3002_v4  ;;  %895 = vmatprep.mubr.bf16.mxu0 %v3857_v1 }
 0x583   :  { %v2553_v29 = vpop.eup %2552  ;;  %925 = vmatpush1.bf16.msra.mxu1 %v3079_v45  ;;  %956 = vmatprep.mubr.bf16.mxu1 %v3857_v1 }
 0x584   :  { %v810_v63 = vmul.f32 %v2553_v29, %v2551_v24  ;;  %926 = vmatprep.subr.bf16.mxu1 %v3081_v46 }
 0x585   :  { %866 = vmatpush1.bf16.msra.mxu0 %v3011_v6 }
 0x586   :  { %913 = vrot.lane.b32.xlu1 %v810_v63, %s2891_s2  ;;  %v855_v17 = vpack.c.bf16 %v810_v63, %v810_v63  ;;  %867 = vmatprep.subr.bf16.mxu0 %v3017_v9 }
 0x587   :  { %927 = vmatpush1.bf16.msra.mxu1 %v3085_v47 }
 0x588   :  { %v857_v33 = vrot.slane %v855_v17, 2  ;;  %928 = vmatprep.subr.bf16.mxu1 %v3088_v48 }
 0x589   :  { %868 = vmatpush1.bf16.msra.mxu0 %v3028_v14 }
 0x58a   :  { %858 = vrot.lane.b32.xlu0 %v857_v33, %s2891_s2  ;;  %869 = vmatprep.subr.bf16.mxu0 %v3033_v15 }
 0x58b   :  { %929 = vmatpush1.bf16.msra.mxu1 %v3091_v49 }
 0x58c   :  { %930 = vmatprep.subr.bf16.mxu1 %v3094_v50 }
 0x58d   :  { %870 = vmatpush1.bf16.msra.mxu0 %v3041_v16 }
 0x58e   :  { %970 = vmatprep.subr.bf16.mxu0 %v3197_v35 }
 0x58f   :  { %931 = vmatpush1.bf16.msra.mxu1 %v3097_v51 }
 0x590   :  { %932 = vmatprep.subr.bf16.mxu1 %v3100_v52 }
 0x593   :  { %933 = vmatpush1.bf16.msra.mxu1 %v3103_v53 }
 0x594   :  { %934 = vmatprep.subr.bf16.mxu1 %v3106_v54 }
 0x597   :  { %935 = vmatpush1.bf16.msra.mxu1 %v3109_v55 }
 0x598   :  { %936 = vmatprep.subr.bf16.mxu1 %v3112_v56 }
 0x59b   :  { %937 = vmatpush1.bf16.msra.mxu1 %v3115_v57 }
 0x59c   :  { %938 = vmatprep.subr.bf16.mxu1 %v3122_v0 }
 0x59f   :  { %939 = vmatpush1.bf16.msra.mxu1 %v3124_v5 }
 0x5a0   :  { %1088 = vmatprep.subr.bf16.mxu1 %v2991_v2  ;;  %v159_v2 = vld [vmem:[%s3837_s7] sm:$0x3] }
 0x5a1   :  { %v3314_v8 = vrot.slane %v159_v2, %v3057_v19  ;;  %v3319_v33 = vrot.slane %v159_v2, %v3062_v21 }
 0x5a3   :  { %3858 = vst [vmem:[#allocation12_spill] sm:$0xff] %v3314_v8  ;;  %3859 = vst [vmem:[#allocation13_spill] sm:$0xff] %v3319_v33 }
 0x5fc   :  { %v859_v34 = vpop.permute.xlu0 %858 }
 0x5fd   :  { %2365 = vmatmul.mubr.msk.bf16.vlgmr.msra.gmra.mrb[16].mxu0 %vm219_vm2, %v859_v34 }
 0x5fe   :  { %971 = vmatpush1.bf16.msra.mxu0 %v3199_v36  ;;  %1002 = vmatprep.mubr.bf16.mxu0 %v3857_v1 }
 0x5ff   :  { %972 = vmatprep.subr.bf16.mxu0 %v3201_v38 }
 0x602   :  { %973 = vmatpush1.bf16.msra.mxu0 %v3205_v39 }
 0x603   :  { %974 = vmatprep.subr.bf16.mxu0 %v3208_v40 }
 0x606   :  { %975 = vmatpush1.bf16.msra.mxu0 %v3211_v42 }
 0x607   :  { %976 = vmatprep.subr.bf16.mxu0 %v3214_v43 }
 0x60a   :  { %977 = vmatpush1.bf16.msra.mxu0 %v3217_v58 }
 0x60b   :  { %978 = vmatprep.subr.bf16.mxu0 %v3220_v60 }
 0x60e   :  { %979 = vmatpush1.bf16.msra.mxu0 %v3223_v61 }
 0x60f   :  { %980 = vmatprep.subr.bf16.mxu0 %v3226_v62 }
 0x612   :  { %981 = vmatpush1.bf16.msra.mxu0 %v3233_v28 }
 0x613   :  { %982 = vmatprep.subr.bf16.mxu0 %v3237_v7 }
 0x616   :  { %983 = vmatpush1.bf16.msra.mxu0 %v3239_v59 }
 0x617   :  { %984 = vmatprep.subr.bf16.mxu0 %v3245_v12 }
 0x61a   :  { %985 = vmatpush1.bf16.msra.mxu0 %v3247_v18 }
 0x61b   :  { %1143 = vmatprep.subr.bf16.mxu0 %v3077_v44 }
 0x653   :  { %v637_v10 = vpop.f32.mrb[12].mxu0 }
 0x654   :  { %v638_v25 = vadd.f32 %v637_v10, %v3153_v26  ;;  %v639_v13 = vpop.f32.mrb[13].mxu0  ;;  %v779_v20 = vpop.f32.mrb[8].mxu1 }
 0x655   :  { %v780_v22 = vadd.f32 %v779_v20, %v3314_v8  ;;  %v641_v31 = vpop.f32.mrb[14].mxu0  ;;  %v781_v23 = vpop.f32.mrb[9].mxu1  ;;  %v640_v19 = vadd.f32 %v639_v13, %v3158_v41 }
 0x656   :  { %v2361_v32 = vmul.f32 -1.442695, %v638_v25  ;;  %v642_v24 = vpop.f32.mrb[15].mxu0  ;;  %v783_v29 = vpop.f32.mrb[10].mxu1  ;;  %v3323_v10 = vadd.f32 %v781_v23, %v3319_v33 }
 0x657   :  { %v2363_v63 = vmul.f32 -1.442695, %v780_v22  ;;  %v784_v17 = vpop.f32.mrb[11].mxu1  ;;  %v2362_v23 = vmul.f32 -1.442695, %v640_v19 }
 0x658   :  { %2554 = vpow2.f32 %v2361_v32 }
 0x659   :  { %2556 = vpow2.f32 %v2363_v63 }
 0x65a   :  { %2558 = vtanh.f32 %v640_v19 }
 0x662   :  { %v2555_v34 = vpop.eup %2554 }
 0x663   :  { %v814_v44 = vadd.f32 1.0, %v2555_v34  ;;  %v2557_v20 = vpop.eup %2556 }
 0x664   :  { %v836_v25 = vadd.f32 1.0, %v2557_v20  ;;  %v2559_v22 = vpop.eup %2558 }
 0x665   :  { %2560 = vrcp.f32 %v814_v44 }
 0x666   :  { %2562 = vtanh.f32 %v3323_v10 }
 0x667   :  { %2564 = vrcp.f32 %v836_v25 }
 0x668   :  { %2566 = vpow2.f32 %v2362_v23  ;;  %v1025_v23 = vrot.slane %v3258_v27, 6  ;;  %v2364_v27 = vmul.f32 -1.442695, %v3323_v10 }
 0x66f   :  { %v2561_v31 = vpop.eup %2560 }
 0x670   :  { %v2563_v32 = vpop.eup %2562  ;;  %v825_v24 = vmul.f32 %v2561_v31, %v2559_v22 }
 0x671   :  { %v2565_v21 = vpop.eup %2564 }
 0x672   :  { %827 = vrot.lane.b32.xlu0 %v825_v24, %s2891_s2  ;;  %v847_v2 = vmul.f32 %v2565_v21, %v2563_v32  ;;  %v2567_v33 = vpop.eup %2566 }
 0x673   :  { %v821_v24 = vadd.f32 1.0, %v2567_v33 }
 0x674   :  { %849 = vrot.lane.b32.xlu1 %v847_v2, %s2891_s2  ;;  %v824_v2 = vmul.f32 %v2561_v31, %v3241_v11  ;;  %v914_v11 = vpop.permute.xlu1 %913 }
 0x6d0   :  { %v897_v13 = vpop.f32.mrb[16].mxu0 }
 0x6d1   :  { %v906_v29 = vrot.slane %v897_v13, 2  ;;  %v899_v63 = vpop.f32.mrb[17].mxu0 }
 0x6d2   :  { %v901_v17 = vpop.f32.mrb[18].mxu0  ;;  %v907_v25 = vrot.slane %v899_v63, 2 }
 0x6d3   :  { %v910_v44 = vadd.f32 %v906_v29, %v3070_v30  ;;  %v902_v34 = vpop.f32.mrb[19].mxu0 }
 0x6d4   :  { %v911_v22 = vadd.f32 %v907_v25, %v3073_v37 }
 0x6d5   :  { %v2366_v20 = vmul.f32 -1.442695, %v910_v44 }
 0x6d7   :  { %2568 = vpow2.f32 %v2366_v20 }
 0x6d8   :  { %2570 = vtanh.f32 %v911_v22 }
 0x6e1   :  { %v2569_v8 = vpop.eup %2568 }
 0x6e2   :  { %v1014_v32 = vadd.f32 1.0, %v2569_v8  ;;  %v2571_v30 = vpop.eup %2570 }
 0x6e4   :  { %2572 = vrcp.f32 %v1014_v32  ;;  %v828_v19 = vpop.permute.xlu0 %827 }
 0x6e5   :  { %v3331_v13 = vadd.f32 %v828_v19, %v824_v2  ;;  %2574 = vrcp.f32 %v821_v24  ;;  %v846_v24 = vmul.f32 0.0, %v2565_v21 }
 0x6e6   :  { %v850_v25 = vpop.permute.xlu1 %849 }
 0x6e7   :  { %2576 = vtanh.f32 %v3331_v13 }
 0x6e8   :  { %2578 = vpow2.f32 %v2364_v27 }
 0x6ee   :  { %v2573_v29 = vpop.eup %2572 }
 0x6ef   :  { %v1028_v63 = vmul.f32 %v2573_v29, %v2571_v30  ;;  %v1027_v17 = vmul.f32 %v2573_v29, %v1025_v23  ;;  %v2575_v37 = vpop.eup %2574 }
 0x6f1   :  { %v2577_v44 = vpop.eup %2576  ;;  %1030 = vrot.lane.b32.xlu0 %v1028_v63, %s2891_s2 }
 0x6f2   :  { %v832_v8 = vmul.f32 %v2577_v44, %v2575_v37  ;;  %v2579_v32 = vpop.eup %2578 }
 0x6f4   :  { %v917_v33 = vrot.slane %v832_v8, 4 }
 0x6f5   :  { %965 = vrot.lane.b32.xlu0 %v832_v8, %s2891_s2 }
 0x6f6   :  { %v919_v31 = vsel %vm219_vm2, %v914_v11, %v917_v33 }
 0x6f7   :  { %v920_v34 = vpack.c.bf16 %v919_v31, %v919_v31 }
 0x6f9   :  { %v922_v20 = vrot.slane %v920_v34, 2 }
 0x6fb   :  { %957 = vmatmul.mubr.bf16.vlgmr.msra.gmra.mrb[12].mxu1 %v922_v20 }
 0x6fc   :  { %1089 = vmatpush1.bf16.msra.mxu1 %v2996_v3  ;;  %1120 = vmatprep.mubr.bf16.mxu1 %v3857_v1  ;;  %v2367_v3 = vmul.f32 -1.442695, %v911_v22 }
 0x6fd   :  { %1090 = vmatprep.subr.bf16.mxu1 %v3002_v4  ;;  %v3348_v4 = vadd.f32 %v850_v25, %v846_v24  ;;  %v3860_v25 = vld [vmem:[#allocation11_spill] sm:$0xff] }
 0x6fe   :  { %2580 = vpow2.f32 %v2367_v3 }
 0x6ff   :  { %2582 = vtanh.f32 %v3348_v4 }
 0x700   :  { %1091 = vmatpush1.bf16.msra.mxu1 %v3011_v6  ;;  %v843_v6 = vadd.f32 1.0, %v2579_v32  ;;  %v3861_v32 = vld [vmem:[#allocation12_spill] sm:$0xff] }
 0x701   :  { %1092 = vmatprep.subr.bf16.mxu1 %v3017_v9 }
 0x702   :  { %2584 = vrcp.f32 %v843_v6 }
 0x704   :  { %1093 = vmatpush1.bf16.msra.mxu1 %v3028_v14 }
 0x705   :  { %1094 = vmatprep.subr.bf16.mxu1 %v3033_v15 }
 0x708   :  { %1095 = vmatpush1.bf16.msra.mxu1 %v3041_v16  ;;  %v2581_v9 = vpop.eup %2580 }
 0x709   :  { %1189 = vmatprep.subr.bf16.mxu1 %v3197_v35  ;;  %v1021_v14 = vadd.f32 1.0, %v2581_v9  ;;  %v2583_v15 = vpop.eup %2582 }
 0x70b   :  { %2586 = vrcp.f32 %v1021_v14 }
 0x70c   :  { %v2585_v19 = vpop.eup %2584 }
 0x70d   :  { %v854_v10 = vmul.f32 %v2585_v19, %v2583_v15 }
 0x715   :  { %v2587_v23 = vpop.eup %2586 }
 0x763   :  { %v1031_v16 = vpop.permute.xlu0 %1030 }
 0x764   :  { %v3351_v2 = vadd.f32 %v1031_v16, %v1027_v17 }
 0x766   :  { %2588 = vtanh.f32 %v3351_v2 }
 0x767   :  { %v966_v21 = vpop.permute.xlu0 %965 }
 0x768   :  { %v968_v22 = vsel %vm219_vm2, %v966_v21, %v854_v10  ;;  %v3862_v10 = vld [vmem:[#allocation13_spill] sm:$0xff] }
 0x769   :  { %v969_v30 = vpack.c.bf16 %v968_v22, %v968_v22 }
 0x76b   :  { %1003 = vmatmul.mubr.bf16.vlgmr.msra.gmra.mrb[20].mxu0 %v969_v30 }
 0x76c   :  { %1144 = vmatpush1.bf16.msra.mxu0 %v3079_v45  ;;  %1175 = vmatprep.mubr.bf16.mxu0 %v3857_v1  ;;  %v3376_v45 = vld [vmem:[%s3833_s3 + $0x4] ss:$8 sps:$4 sm:$0xff]  }
 0x76d   :  { %1145 = vmatprep.subr.bf16.mxu0 %v3081_v46 }
 0x770   :  { %v2589_v29 = vpop.eup %2588  ;;  %1146 = vmatpush1.bf16.msra.mxu0 %v3085_v47 }
 0x771   :  { %v1035_v63 = vmul.f32 %v2589_v29, %v2587_v23  ;;  %1147 = vmatprep.subr.bf16.mxu0 %v3088_v48 }
 0x773   :  { %v1080_v17 = vpack.c.bf16 %v1035_v63, %v1035_v63 }
 0x774   :  { %1148 = vmatpush1.bf16.msra.mxu0 %v3091_v49 }
 0x775   :  { %v1082_v37 = vrot.slane %v1080_v17, 3  ;;  %1149 = vmatprep.subr.bf16.mxu0 %v3094_v50 }
 0x777   :  { %1083 = vrot.lane.b32.xlu1 %v1082_v37, %s2891_s2 }
 0x778   :  { %1150 = vmatpush1.bf16.msra.mxu0 %v3097_v51 }
 0x779   :  { %1151 = vmatprep.subr.bf16.mxu0 %v3100_v52 }
 0x77b   :  { %1132 = vrot.lane.b32.xlu1 %v1035_v63, %s2891_s2 }
 0x77c   :  { %1152 = vmatpush1.bf16.msra.mxu0 %v3103_v53 }
 0x77d   :  { %1153 = vmatprep.subr.bf16.mxu0 %v3106_v54 }
 0x780   :  { %1154 = vmatpush1.bf16.msra.mxu0 %v3109_v55 }
 0x781   :  { %1155 = vmatprep.subr.bf16.mxu0 %v3112_v56 }
 0x784   :  { %1156 = vmatpush1.bf16.msra.mxu0 %v3115_v57 }
 0x785   :  { %1157 = vmatprep.subr.bf16.mxu0 %v3122_v0 }
 0x788   :  { %1158 = vmatpush1.bf16.msra.mxu0 %v3124_v5 }
 0x789   :  { %1306 = vmatprep.subr.bf16.mxu0 %v3376_v45 }
 0x7ce   :  { %v958_v46 = vpop.f32.mrb[12].mxu1 }
 0x7cf   :  { %v959_v47 = vadd.f32 %v958_v46, %v3153_v26  ;;  %v960_v48 = vpop.f32.mrb[13].mxu1 }
 0x7d0   :  { %v962_v49 = vpop.f32.mrb[14].mxu1  ;;  %v961_v33 = vadd.f32 %v960_v48, %v3158_v41 }
 0x7d1   :  { %v2368_v44 = vmul.f32 -1.442695, %v959_v47  ;;  %v963_v8 = vpop.f32.mrb[15].mxu1 }
 0x7d2   :  { %v2369_v19 = vmul.f32 -1.442695, %v961_v33 }
 0x7d3   :  { %2590 = vpow2.f32 %v2368_v44 }
 0x7d4   :  { %2592 = vtanh.f32 %v961_v33 }
 0x7dd   :  { %v2591_v11 = vpop.eup %2590 }
 0x7de   :  { %v1039_v31 = vadd.f32 1.0, %v2591_v11  ;;  %v2593_v34 = vpop.eup %2592 }
 0x7e0   :  { %2594 = vrcp.f32 %v1039_v31 }
 0x7e9   :  { %v1084_v20 = vpop.permute.xlu1 %1083 }
 0x7ea   :  { %v2595_v27 = vpop.eup %2594  ;;  %2372 = vmatmul.mubr.msk.bf16.vlgmr.msra.gmra.mrb[16].mxu1 %vm219_vm2, %v1084_v20 }
 0x7eb   :  { %v1050_v3 = vmul.f32 %v2595_v27, %v2593_v34  ;;  %1190 = vmatpush1.bf16.msra.mxu1 %v3199_v36  ;;  %1221 = vmatprep.mubr.bf16.mxu1 %v3857_v1  ;;  %v1049_v46 = vmul.f32 %v2595_v27, %v3331_v13  ;;  %v3412_v13 = vld [vmem:[%s3833_s3] ss:$8 sps:$4 sm:$0xff]   ;;  %v3419_v27 = vld [vmem:[%s3833_s3 + $0x14] ss:$8 sps:$4 sm:$0xff]  }
 0x7ec   :  { %1191 = vmatprep.subr.bf16.mxu1 %v3201_v38 }
 0x7ed   :  { %1052 = vrot.lane.b32.xlu0 %v1050_v3, %s2891_s2  ;;  %v1133_v11 = vpop.permute.xlu1 %1132  ;;  %v3425_v3 = vld [vmem:[%s3833_s3 + $0x10] ss:$8 sps:$4 sm:$0xff]  }
 0x7ef   :  { %1192 = vmatpush1.bf16.msra.mxu1 %v3205_v39 }
 0x7f0   :  { %1193 = vmatprep.subr.bf16.mxu1 %v3208_v40 }
 0x7f3   :  { %1194 = vmatpush1.bf16.msra.mxu1 %v3211_v42 }
 0x7f4   :  { %1195 = vmatprep.subr.bf16.mxu1 %v3214_v43 }
 0x7f7   :  { %1196 = vmatpush1.bf16.msra.mxu1 %v3217_v58 }
 0x7f8   :  { %1197 = vmatprep.subr.bf16.mxu1 %v3220_v60 }
 0x7fb   :  { %1198 = vmatpush1.bf16.msra.mxu1 %v3223_v61 }
 0x7fc   :  { %1199 = vmatprep.subr.bf16.mxu1 %v3226_v62 }
 0x7ff   :  { %1200 = vmatpush1.bf16.msra.mxu1 %v3233_v28 }
 0x800   :  { %1201 = vmatprep.subr.bf16.mxu1 %v3237_v7 }
 0x803   :  { %1202 = vmatpush1.bf16.msra.mxu1 %v3239_v59 }
 0x804   :  { %1203 = vmatprep.subr.bf16.mxu1 %v3245_v12 }
 0x807   :  { %1204 = vmatpush1.bf16.msra.mxu1 %v3247_v18 }
 0x808   :  { %1361 = vmatprep.subr.bf16.mxu1 %v3860_v25  ;;  %v3431_v25 = vld [vmem:[%s3833_s3 + $0x24] ss:$8 sps:$4 sm:$0xff]  }
 0x83e   :  { %v1004_v24 = vpop.f32.mrb[20].mxu0 }
 0x83f   :  { %v1005_v6 = vadd.f32 %v1004_v24, %v3861_v32  ;;  %v1006_v9 = vpop.f32.mrb[21].mxu0  ;;  %v3437_v24 = vld [vmem:[%s3833_s3 + $0x20] ss:$8 sps:$4 sm:$0xff]  }
 0x840   :  { %v1008_v14 = vpop.f32.mrb[22].mxu0  ;;  %v1007_v21 = vadd.f32 %v1006_v9, %v3862_v10  ;;  %v3449_v9 = vld [vmem:[%s3833_s3 + $0x30] ss:$8 sps:$4 sm:$0xff]  }
 0x841   :  { %v2370_v15 = vmul.f32 -1.442695, %v1005_v6  ;;  %v1009_v16 = vpop.f32.mrb[23].mxu0  ;;  %v3443_v6 = vld [vmem:[%s3833_s3 + $0x34] ss:$8 sps:$4 sm:$0xff]  }
 0x843   :  { %2596 = vpow2.f32 %v2370_v15  ;;  %v3863_v15 = vld [vmem:[#allocation9_spill] sm:$0xff] }
 0x844   :  { %2598 = vpow2.f32 %v2369_v19 }
 0x845   :  { %2600 = vtanh.f32 %v1007_v21 }
 0x84d   :  { %v2597_v22 = vpop.eup %2596 }
 0x84e   :  { %v1061_v30 = vadd.f32 1.0, %v2597_v22  ;;  %v2599_v23 = vpop.eup %2598 }
 0x84f   :  { %v2601_v29 = vpop.eup %2600  ;;  %v1046_v37 = vadd.f32 1.0, %v2599_v23 }
 0x850   :  { %2602 = vrcp.f32 %v1061_v30  ;;  %v2371_v30 = vmul.f32 -1.442695, %v1007_v21 }
 0x851   :  { %2604 = vrcp.f32 %v1046_v37 }
 0x85a   :  { %v2603_v63 = vpop.eup %2602 }
 0x85b   :  { %v1072_v17 = vmul.f32 %v2603_v63, %v2601_v29  ;;  %v2605_v49 = vpop.eup %2604 }
 0x85d   :  { %1074 = vrot.lane.b32.xlu0 %v1072_v17, %s2891_s2  ;;  %v3864_v17 = vld [vmem:[#allocation10_spill] sm:$0xff] }
 0x85f   :  { %v1053_v47 = vpop.permute.xlu0 %1052 }
 0x860   :  { %v3404_v48 = vadd.f32 %v1053_v47, %v1049_v46 }
 0x862   :  { %2606 = vtanh.f32 %v3404_v48 }
 0x86c   :  { %v2607_v44 = vpop.eup %2606 }
 0x86d   :  { %v1057_v8 = vmul.f32 %v2607_v44, %v2605_v49  ;;  %v1071_v44 = vmul.f32 %v2603_v63, %v3348_v4 }
 0x86f   :  { %1184 = vrot.lane.b32.xlu1 %v1057_v8, %s2891_s2  ;;  %v1136_v33 = vrot.slane %v1057_v8, 2 }
 0x871   :  { %v1138_v31 = vsel %vm219_vm2, %v1133_v11, %v1136_v33 }
 0x872   :  { %v1139_v34 = vpack.c.bf16 %v1138_v31, %v1138_v31  ;;  %v1244_v31 = vrot.slane %v3351_v2, 6  ;;  %v3466_v2 = vld [vmem:[#allocation3 + $0x14] ss:$8 sps:$4 sm:$0xff]  }
 0x874   :  { %v1141_v20 = vrot.slane %v1139_v34, 3 }
 0x876   :  { %1176 = vmatmul.mubr.bf16.vlgmr.msra.gmra.mrb[24].mxu0 %v1141_v20 }
 0x877   :  { %1307 = vmatpush1.bf16.msra.mxu0 %v3412_v13  ;;  %1338 = vmatprep.mubr.bf16.mxu0 %v3857_v1 }
 0x878   :  { %1308 = vmatprep.subr.bf16.mxu0 %v3419_v27 }
 0x87b   :  { %1309 = vmatpush1.bf16.msra.mxu0 %v3425_v3 }
 0x87c   :  { %1310 = vmatprep.subr.bf16.mxu0 %v3431_v25 }
 0x87f   :  { %1311 = vmatpush1.bf16.msra.mxu0 %v3437_v24 }
 0x880   :  { %1312 = vmatprep.subr.bf16.mxu0 %v3443_v6 }
 0x883   :  { %1313 = vmatpush1.bf16.msra.mxu0 %v3449_v9 }
 0x884   :  { %1408 = vmatprep.subr.bf16.mxu0 %v3197_v35 }
 0x8bd   :  { %v1122_v14 = vpop.f32.mrb[16].mxu1 }
 0x8be   :  { %v1129_v16 = vadd.f32 %v1122_v14, %v3863_v15  ;;  %v1124_v19 = vpop.f32.mrb[17].mxu1 }
 0x8bf   :  { %v1126_v22 = vpop.f32.mrb[18].mxu1  ;;  %v1130_v37 = vadd.f32 %v1124_v19, %v3864_v17 }
 0x8c0   :  { %v2373_v23 = vmul.f32 -1.442695, %v1129_v16  ;;  %v1127_v29 = vpop.f32.mrb[19].mxu1 }
 0x8c1   :  { %v3469_v29 = vld [vmem:[#allocation3 + $0x10] ss:$8 sps:$4 sm:$0xff]  }
 0x8c2   :  { %2608 = vpow2.f32 %v2373_v23  ;;  %v3462_v23 = vld [vmem:[#allocation3] ss:$8 sps:$4 sm:$0xff]  }
 0x8c3   :  { %2610 = vpow2.f32 %v2371_v30 }
 0x8c4   :  { %2612 = vtanh.f32 %v1130_v37 }
 0x8cc   :  { %v2609_v46 = vpop.eup %2608 }
 0x8cd   :  { %v1233_v47 = vadd.f32 1.0, %v2609_v46  ;;  %v2611_v49 = vpop.eup %2610  ;;  %v3472_v46 = vld [vmem:[#allocation3 + $0x24] ss:$8 sps:$4 sm:$0xff]  }
 0x8ce   :  { %v1068_v11 = vadd.f32 1.0, %v2611_v49  ;;  %v2613_v21 = vpop.eup %2612 }
 0x8cf   :  { %2614 = vrcp.f32 %v1233_v47  ;;  %v1075_v8 = vpop.permute.xlu0 %1074  ;;  %v3475_v47 = vld [vmem:[#allocation3 + $0x20] ss:$8 sps:$4 sm:$0xff]  }
 0x8d0   :  { %v3456_v33 = vadd.f32 %v1075_v8, %v1071_v44 }
 0x8d2   :  { %2616 = vtanh.f32 %v3456_v33 }
 0x8d3   :  { %2618 = vrcp.f32 %v1068_v11 }
 0x8d9   :  { %v2615_v34 = vpop.eup %2614 }
 0x8da   :  { %v1247_v20 = vmul.f32 %v2615_v34, %v2613_v21  ;;  %v1246_v14 = vmul.f32 %v2615_v34, %v1244_v31 }
 0x8dc   :  { %1249 = vrot.lane.b32.xlu0 %v1247_v20, %s2891_s2  ;;  %v2617_v16 = vpop.eup %2616 }
 0x8dd   :  { %v2619_v19 = vpop.eup %2618 }
 0x8de   :  { %v1079_v22 = vmul.f32 %v2619_v19, %v2617_v16 }
 0x8e1   :  { %v1185_v4 = vpop.permute.xlu1 %1184 }
 0x8e2   :  { %v1187_v63 = vsel %vm219_vm2, %v1185_v4, %v1079_v22 }
 0x8e3   :  { %v1188_v30 = vpack.c.bf16 %v1187_v63, %v1187_v63 }
 0x8e5   :  { %1222 = vmatmul.mubr.bf16.vlgmr.msra.gmra.mrb[20].mxu1 %v1188_v30 }
 0x8e6   :  { %1362 = vmatpush1.bf16.msra.mxu1 %v3462_v23  ;;  %1393 = vmatprep.mubr.bf16.mxu1 %v3857_v1 }
 0x8e7   :  { %1363 = vmatprep.subr.bf16.mxu1 %v3466_v2 }
 0x8ea   :  { %1364 = vmatpush1.bf16.msra.mxu1 %v3469_v29 }
 0x8eb   :  { %1365 = vmatprep.subr.bf16.mxu1 %v3472_v46 }
 0x8ee   :  { %1366 = vmatpush1.bf16.msra.mxu1 %v3475_v47 }
 0x8ef   :  { %1367 = vmatprep.subr.bf16.mxu1 %v3094_v50  ;;  %v2374_v50 = vmul.f32 -1.442695, %v1130_v37 }
 0x8f1   :  { %2620 = vpow2.f32 %v2374_v50 }
 0x8f2   :  { %1368 = vmatpush1.bf16.msra.mxu1 %v3097_v51 }
 0x8f3   :  { %1369 = vmatprep.subr.bf16.mxu1 %v3100_v52 }
 0x8f6   :  { %1370 = vmatpush1.bf16.msra.mxu1 %v3103_v53 }
 0x8f7   :  { %1371 = vmatprep.subr.bf16.mxu1 %v3106_v54 }
 0x8fa   :  { %1372 = vmatpush1.bf16.msra.mxu1 %v3109_v55 }
 0x8fb   :  { %1373 = vmatprep.subr.bf16.mxu1 %v3112_v56  ;;  %v2621_v51 = vpop.eup %2620 }
 0x8fc   :  { %v1240_v44 = vadd.f32 1.0, %v2621_v51 }
 0x8fe   :  { %1374 = vmatpush1.bf16.msra.mxu1 %v3115_v57 }
 0x8ff   :  { %1375 = vmatprep.subr.bf16.mxu1 %v3122_v0 }
 0x902   :  { %1376 = vmatpush1.bf16.msra.mxu1 %v3124_v5 }
 0x903   :  { %1526 = vmatprep.subr.bf16.mxu1 %v3376_v45 }
 0x949   :  { %v1177_v52 = vpop.f32.mrb[24].mxu0 }
 0x94a   :  { %v1178_v53 = vadd.f32 %v1177_v52, %v3153_v26  ;;  %v1179_v49 = vpop.f32.mrb[25].mxu0 }
 0x94b   :  { %v1181_v54 = vpop.f32.mrb[26].mxu0  ;;  %v1180_v0 = vadd.f32 %v1179_v49, %v3158_v41 }
 0x94c   :  { %v2375_v55 = vmul.f32 -1.442695, %v1178_v53  ;;  %v1182_v8 = vpop.f32.mrb[27].mxu0 }
 0x94d   :  { %v2376_v53 = vmul.f32 -1.442695, %v1180_v0 }
 0x94e   :  { %2622 = vpow2.f32 %v2375_v55  ;;  %v1250_v56 = vpop.permute.xlu0 %1249 }
 0x94f   :  { %v3490_v57 = vadd.f32 %v1250_v56, %v1246_v14  ;;  %2624 = vrcp.f32 %v1240_v44 }
 0x951   :  { %2626 = vtanh.f32 %v3490_v57 }
 0x952   :  { %2628 = vtanh.f32 %v1180_v0 }
 0x958   :  { %v2623_v5 = vpop.eup %2622 }
 0x959   :  { %v1258_v37 = vadd.f32 1.0, %v2623_v5  ;;  %v2625_v11 = vpop.eup %2624 }
 0x95b   :  { %v2627_v21 = vpop.eup %2626  ;;  %2630 = vrcp.f32 %v1258_v37 }
 0x95c   :  { %v1254_v31 = vmul.f32 %v2627_v21, %v2625_v11  ;;  %v2629_v20 = vpop.eup %2628 }
 0x95e   :  { %v1299_v34 = vpack.c.bf16 %v1254_v31, %v1254_v31 }
 0x960   :  { %1301 = vrot.lane.b32.xlu1 %v1299_v34, %s2891_s2 }
 0x964   :  { %1356 = vrot.lane.b32.xlu1 %v1254_v31, %s2891_s2 }
 0x965   :  { %v2631_v14 = vpop.eup %2630 }
 0x966   :  { %v1269_v16 = vmul.f32 %v2631_v14, %v2629_v20  ;;  %v1268_v5 = vmul.f32 %v2631_v14, %v3404_v48  ;;  %v3552_v20 = vld [vmem:[#allocation3 + $0x44] ss:$8 sps:$4 sm:$0xff]   ;;  %v3555_v14 = vld [vmem:[#allocation3 + $0x40] ss:$8 sps:$4 sm:$0xff]  }
 0x968   :  { %1271 = vrot.lane.b32.xlu0 %v1269_v16, %s2891_s2  ;;  %v3558_v16 = vld [vmem:[#allocation3 + $0x54] ss:$8 sps:$4 sm:$0xff]  }
 0x9b8   :  { %v1223_v19 = vpop.f32.mrb[20].mxu1 }
 0x9b9   :  { %v1224_v22 = vadd.f32 %v1223_v19, %v3861_v32  ;;  %v1225_v4 = vpop.f32.mrb[21].mxu1  ;;  %v3561_v19 = vld [vmem:[#allocation3 + $0x50] ss:$8 sps:$4 sm:$0xff]  }
 0x9ba   :  { %v1227_v63 = vpop.f32.mrb[22].mxu1  ;;  %v1226_v51 = vadd.f32 %v1225_v4, %v3862_v10  ;;  %v3567_v4 = vld [vmem:[#allocation3 + $0x60] ss:$8 sps:$4 sm:$0xff]  }
 0x9bb   :  { %v2377_v30 = vmul.f32 -1.442695, %v1224_v22  ;;  %v1228_v50 = vpop.f32.mrb[23].mxu1  ;;  %v3564_v22 = vld [vmem:[#allocation3 + $0x64] ss:$8 sps:$4 sm:$0xff]  }
 0x9bc   :  { %v3570_v63 = vld [vmem:[#allocation3 + $0x74] ss:$8 sps:$4 sm:$0xff]  }
 0x9bd   :  { %2632 = vpow2.f32 %v2377_v30  ;;  %v3573_v30 = vld [vmem:[#allocation3 + $0x70] ss:$8 sps:$4 sm:$0xff]  }
 0x9be   :  { %2634 = vtanh.f32 %v1226_v51 }
 0x9c7   :  { %v2633_v52 = vpop.eup %2632 }
 0x9c8   :  { %v1280_v49 = vadd.f32 1.0, %v2633_v52  ;;  %v2635_v44 = vpop.eup %2634 }
 0x9ca   :  { %2636 = vrcp.f32 %v1280_v49 }
 0x9cb   :  { %2638 = vpow2.f32 %v2376_v53 }
 0x9d2   :  { %v1302_v54 = vpop.permute.xlu1 %1301 }
 0x9d3   :  { %2379 = vmatmul.mubr.msk.bf16.vlgmr.msra.gmra.mrb[28].mxu0 %vm219_vm2, %v1302_v54 }
 0x9d4   :  { %v2637_v55 = vpop.eup %2636  ;;  %1409 = vmatpush1.bf16.msra.mxu0 %v3199_v36  ;;  %1440 = vmatprep.mubr.bf16.mxu0 %v3857_v1 }
 0x9d5   :  { %v2639_v8 = vpop.eup %2638  ;;  %v1291_v56 = vmul.f32 %v2637_v55, %v2635_v44  ;;  %1410 = vmatprep.subr.bf16.mxu0 %v3201_v38 }
 0x9d6   :  { %v1265_v0 = vadd.f32 1.0, %v2639_v8 }
 0x9d7   :  { %1293 = vrot.lane.b32.xlu0 %v1291_v56, %s2891_s2 }
 0x9d8   :  { %1411 = vmatpush1.bf16.msra.mxu0 %v3205_v39  ;;  %2640 = vrcp.f32 %v1265_v0 }
 0x9d9   :  { %1412 = vmatprep.subr.bf16.mxu0 %v3208_v40  ;;  %v1357_v40 = vpop.permute.xlu1 %1356 }
 0x9da   :  { %v1272_v37 = vpop.permute.xlu0 %1271 }
 0x9db   :  { %v3507_v11 = vadd.f32 %v1272_v37, %v1268_v5 }
 0x9dc   :  { %1413 = vmatpush1.bf16.msra.mxu0 %v3211_v42 }
 0x9dd   :  { %2642 = vtanh.f32 %v3507_v11  ;;  %1414 = vmatprep.subr.bf16.mxu0 %v3214_v43 }
 0x9e0   :  { %1415 = vmatpush1.bf16.msra.mxu0 %v3217_v58  ;;  %v3526_v58 = vld [vmem:[#allocation3 + $0x4] ss:$8 sps:$4 sm:$0xff]  }
 0x9e1   :  { %1416 = vmatprep.subr.bf16.mxu0 %v3220_v60  ;;  %v2378_v60 = vmul.f32 -1.442695, %v1226_v51 }
 0x9e2   :  { %v2641_v36 = vpop.eup %2640 }
 0x9e3   :  { %2644 = vpow2.f32 %v2378_v60 }
 0x9e4   :  { %1417 = vmatpush1.bf16.msra.mxu0 %v3223_v61  ;;  %v1290_v61 = vmul.f32 %v2637_v55, %v3456_v33  ;;  %v3549_v33 = vld [vmem:[#allocation3 + $0x30] ss:$8 sps:$4 sm:$0xff]  }
 0x9e5   :  { %1418 = vmatprep.subr.bf16.mxu0 %v3226_v62 }
 0x9e7   :  { %v2643_v38 = vpop.eup %2642 }
 0x9e8   :  { %v1276_v39 = vmul.f32 %v2643_v38, %v2641_v36  ;;  %1419 = vmatpush1.bf16.msra.mxu0 %v3233_v28 }
 0x9e9   :  { %1420 = vmatprep.subr.bf16.mxu0 %v3237_v7 }
 0x9ea   :  { %1403 = vrot.lane.b32.xlu1 %v1276_v39, %s2891_s2  ;;  %v1359_v42 = vsel %vm219_vm2, %v1357_v40, %v1276_v39  ;;  %v1463_v39 = vrot.slane %v3490_v57, 6 }
 0x9eb   :  { %v1360_v43 = vpack.c.bf16 %v1359_v42, %v1359_v42 }
 0x9ec   :  { %1421 = vmatpush1.bf16.msra.mxu0 %v3239_v59 }
 0x9ed   :  { %1394 = vmatmul.mubr.bf16.vlgmr.msra.gmra.mrb[24].mxu1 %v1360_v43  ;;  %1422 = vmatprep.subr.bf16.mxu0 %v3245_v12  ;;  %v2645_v62 = vpop.eup %2644 }
 0x9ee   :  { %1527 = vmatpush1.bf16.msra.mxu1 %v3412_v13  ;;  %1558 = vmatprep.mubr.bf16.mxu1 %v3857_v1  ;;  %v1287_v59 = vadd.f32 1.0, %v2645_v62 }
 0x9ef   :  { %1528 = vmatprep.subr.bf16.mxu1 %v3419_v27 }
 0x9f0   :  { %1423 = vmatpush1.bf16.msra.mxu0 %v3247_v18 }
 0x9f1   :  { %1587 = vmatprep.subr.bf16.mxu0 %v3526_v58 }
 0x9f2   :  { %1529 = vmatpush1.bf16.msra.mxu1 %v3425_v3 }
 0x9f3   :  { %1530 = vmatprep.subr.bf16.mxu1 %v3431_v25 }
 0x9f6   :  { %1531 = vmatpush1.bf16.msra.mxu1 %v3437_v24 }
 0x9f7   :  { %1532 = vmatprep.subr.bf16.mxu1 %v3443_v6 }
 0x9fa   :  { %1533 = vmatpush1.bf16.msra.mxu1 %v3449_v9 }
 0x9fb   :  { %1633 = vmatprep.subr.bf16.mxu1 %v3197_v35  ;;  %v3546_v35 = vld [vmem:[#allocation3 + $0x34] ss:$8 sps:$4 sm:$0xff]  }
 0xa49   :  { %v1294_v28 = vpop.permute.xlu0 %1293 }
 0xa4a   :  { %v3536_v7 = vadd.f32 %v1294_v28, %v1290_v61 }
 0xa4c   :  { %2646 = vtanh.f32 %v3536_v7 }
 0xa4d   :  { %2648 = vrcp.f32 %v1287_v59 }
 0xa56   :  { %v2647_v12 = vpop.eup %2646 }
 0xa57   :  { %v2649_v18 = vpop.eup %2648 }
 0xa58   :  { %v1298_v48 = vmul.f32 %v2649_v18, %v2647_v12 }
 0xa5c   :  { %v1404_v21 = vpop.permute.xlu1 %1403 }
 0xa5d   :  { %v1406_v31 = vsel %vm219_vm2, %v1404_v21, %v1298_v48 }
 0xa5e   :  { %v1407_v34 = vpack.c.bf16 %v1406_v31, %v1406_v31 }
 0xa60   :  { %1441 = vmatmul.mubr.bf16.vlgmr.msra.gmra.mrb[32].mxu0 %v1407_v34 }
 0xa61   :  { %1588 = vmatpush1.bf16.msra.mxu0 %v3462_v23  ;;  %1619 = vmatprep.mubr.bf16.mxu0 %v3857_v1 }
 0xa62   :  { %1589 = vmatprep.subr.bf16.mxu0 %v3466_v2 }
 0xa65   :  { %1590 = vmatpush1.bf16.msra.mxu0 %v3469_v29 }
 0xa66   :  { %1591 = vmatprep.subr.bf16.mxu0 %v3472_v46 }
 0xa69   :  { %1592 = vmatpush1.bf16.msra.mxu0 %v3475_v47 }
 0xa6a   :  { %1593 = vmatprep.subr.bf16.mxu0 %v3546_v35 }
 0xa6d   :  { %1594 = vmatpush1.bf16.msra.mxu0 %v3549_v33 }
 0xa6e   :  { %1595 = vmatprep.subr.bf16.mxu0 %v3552_v20 }
 0xa71   :  { %1596 = vmatpush1.bf16.msra.mxu0 %v3555_v14 }
 0xa72   :  { %1597 = vmatprep.subr.bf16.mxu0 %v3558_v16 }
 0xa75   :  { %1598 = vmatpush1.bf16.msra.mxu0 %v3561_v19 }
 0xa76   :  { %1599 = vmatprep.subr.bf16.mxu0 %v3564_v22 }
 0xa79   :  { %1600 = vmatpush1.bf16.msra.mxu0 %v3567_v4 }
 0xa7a   :  { %1601 = vmatprep.subr.bf16.mxu0 %v3570_v63 }
 0xa7d   :  { %1602 = vmatpush1.bf16.msra.mxu0 %v3573_v30 }
 0xa7e   :  { %1751 = vmatprep.subr.bf16.mxu0 %v3376_v45 }
 0xaa6   :  { %v1340_v50 = vpop.f32.mrb[28].mxu0 }
 0xaa7   :  { %v1349_v51 = vrot.slane %v1340_v50, 6  ;;  %v1342_v52 = vpop.f32.mrb[29].mxu0 }
 0xaa8   :  { %v1344_v53 = vpop.f32.mrb[30].mxu0  ;;  %v1350_v55 = vrot.slane %v1342_v52, 6 }
 0xaa9   :  { %v1353_v49 = vadd.f32 %v1349_v51, %v3863_v15  ;;  %v1345_v54 = vpop.f32.mrb[31].mxu0 }
 0xaaa   :  { %v1354_v8 = vadd.f32 %v1350_v55, %v3864_v17 }
 0xaab   :  { %v2380_v44 = vmul.f32 -1.442695, %v1353_v49 }
 0xaac   :  { %v2381_v57 = vmul.f32 -1.442695, %v1354_v8 }
 0xaad   :  { %2650 = vpow2.f32 %v2380_v44 }
 0xaae   :  { %2652 = vtanh.f32 %v1354_v8 }
 0xab7   :  { %v2651_v56 = vpop.eup %2650 }
 0xab8   :  { %v1452_v0 = vadd.f32 1.0, %v2651_v56  ;;  %v2653_v38 = vpop.eup %2652 }
 0xaba   :  { %2654 = vrcp.f32 %v1452_v0 }
 0xac0   :  { %v1395_v5 = vpop.f32.mrb[24].mxu1 }
 0xac1   :  { %v1396_v37 = vadd.f32 %v1395_v5, %v3153_v26  ;;  %v1397_v45 = vpop.f32.mrb[25].mxu1 }
 0xac2   :  { %v1399_v36 = vpop.f32.mrb[26].mxu1  ;;  %v1398_v62 = vadd.f32 %v1397_v45, %v3158_v41 }
 0xac3   :  { %v2382_v40 = vmul.f32 -1.442695, %v1396_v37  ;;  %v1400_v42 = vpop.f32.mrb[27].mxu1 }
 0xac4   :  { %v2655_v43 = vpop.eup %2654  ;;  %v2383_v55 = vmul.f32 -1.442695, %v1398_v62 }
 0xac5   :  { %2656 = vpow2.f32 %v2382_v40  ;;  %v1466_v60 = vmul.f32 %v2655_v43, %v2653_v38  ;;  %v1465_v61 = vmul.f32 %v2655_v43, %v1463_v39 }
 0xac6   :  { %2658 = vtanh.f32 %v1398_v62 }
 0xac7   :  { %1468 = vrot.lane.b32.xlu0 %v1466_v60, %s2891_s2 }
 0xacf   :  { %v2657_v28 = vpop.eup %2656 }
 0xad0   :  { %v1477_v59 = vadd.f32 1.0, %v2657_v28  ;;  %v2659_v12 = vpop.eup %2658 }
 0xad2   :  { %2660 = vrcp.f32 %v1477_v59 }
 0xad3   :  { %2662 = vpow2.f32 %v2381_v57 }
 0xadc   :  { %v2661_v18 = vpop.eup %2660 }
 0xadd   :  { %v1488_v48 = vmul.f32 %v2661_v18, %v2659_v12  ;;  %v2663_v31 = vpop.eup %2662  ;;  %v1487_v60 = vmul.f32 %v2661_v18, %v3507_v11  ;;  %v3598_v11 = vld [vmem:[#allocation5] ss:$8 sps:$4 sm:$0xff]  }
 0xade   :  { %v1459_v49 = vadd.f32 1.0, %v2663_v31  ;;  %v3602_v31 = vld [vmem:[#allocation5 + $0x14] ss:$8 sps:$4 sm:$0xff]  }
 0xadf   :  { %1490 = vrot.lane.b32.xlu0 %v1488_v48, %s2891_s2 }
 0xb33   :  { %v1442_v21 = vpop.f32.mrb[32].mxu0 }
 0xb34   :  { %v1443_v34 = vadd.f32 %v1442_v21, %v3861_v32  ;;  %v1444_v50 = vpop.f32.mrb[33].mxu0 }
 0xb35   :  { %v1446_v51 = vpop.f32.mrb[34].mxu0  ;;  %v1445_v8 = vadd.f32 %v1444_v50, %v3862_v10 }
 0xb36   :  { %v2384_v52 = vmul.f32 -1.442695, %v1443_v34  ;;  %v1447_v53 = vpop.f32.mrb[35].mxu0 }
 0xb37   :  { %v2385_v57 = vmul.f32 -1.442695, %v1445_v8 }
 0xb38   :  { %2664 = vpow2.f32 %v2384_v52 }
 0xb39   :  { %v1469_v54 = vpop.permute.xlu0 %1468  ;;  %2666 = vrcp.f32 %v1459_v49 }
 0xb3a   :  { %v3585_v44 = vadd.f32 %v1469_v54, %v1465_v61  ;;  %v3607_v54 = vld [vmem:[#allocation5 + $0x10] ss:$8 sps:$4 sm:$0xff]  }
 0xb3c   :  { %2668 = vtanh.f32 %v3585_v44 }
 0xb3d   :  { %2670 = vpow2.f32 %v2383_v55 }
 0xb3e   :  { %2672 = vtanh.f32 %v1445_v8  ;;  %v3612_v8 = vld [vmem:[#allocation5 + $0x24] ss:$8 sps:$4 sm:$0xff]  }
 0xb42   :  { %v2665_v56 = vpop.eup %2664 }
 0xb43   :  { %v1499_v0 = vadd.f32 1.0, %v2665_v56  ;;  %v2667_v5 = vpop.eup %2666 }
 0xb45   :  { %2674 = vrcp.f32 %v1499_v0 }
 0xb46   :  { %v2669_v37 = vpop.eup %2668 }
 0xb47   :  { %v1473_v45 = vmul.f32 %v2669_v37, %v2667_v5  ;;  %v2671_v39 = vpop.eup %2670  ;;  %v3615_v5 = vld [vmem:[#allocation5 + $0x20] ss:$8 sps:$4 sm:$0xff]   ;;  %v3625_v37 = vld [vmem:[#allocation5 + $0x30] ss:$8 sps:$4 sm:$0xff]  }
 0xb48   :  { %v2673_v40 = vpop.eup %2672  ;;  %v1484_v43 = vadd.f32 1.0, %v2671_v39  ;;  %v3644_v39 = vld [vmem:[#allocation5 + $0x64] ss:$8 sps:$4 sm:$0xff]  }
 0xb49   :  { %v1518_v36 = vpack.c.bf16 %v1473_v45, %v1473_v45 }
 0xb4a   :  { %2676 = vrcp.f32 %v1484_v43 }
 0xb4b   :  { %v1520_v38 = vrot.slane %v1518_v36, 1  ;;  %v3633_v36 = vld [vmem:[#allocation5 + $0x40] ss:$8 sps:$4 sm:$0xff]  }
 0xb4d   :  { %1521 = vrot.lane.b32.xlu1 %v1520_v38, %s2891_s2  ;;  %v3641_v38 = vld [vmem:[#allocation5 + $0x50] ss:$8 sps:$4 sm:$0xff]  }
 0xb4f   :  { %v2675_v42 = vpop.eup %2674 }
 0xb50   :  { %v1510_v61 = vmul.f32 %v2675_v42, %v2673_v40  ;;  %v1509_v51 = vmul.f32 %v2675_v42, %v3536_v7  ;;  %v3619_v7 = vld [vmem:[#allocation5 + $0x34] ss:$8 sps:$4 sm:$0xff]   ;;  %v3648_v40 = vld [vmem:[#allocation5 + $0x4] ss:$8 sps:$4 sm:$0xff]   ;;  %v3651_v42 = vld [vmem:[#allocation5 + $0x60] ss:$8 sps:$4 sm:$0xff]  }
 0xb51   :  { %1576 = vrot.lane.b32.xlu1 %v1473_v45, %s2891_s2  ;;  %v1491_v62 = vpop.permute.xlu0 %1490  ;;  %v3628_v45 = vld [vmem:[#allocation5 + $0x44] ss:$8 sps:$4 sm:$0xff]  }
 0xb52   :  { %v3592_v28 = vadd.f32 %v1491_v62, %v1487_v60  ;;  %1512 = vrot.lane.b32.xlu0 %v1510_v61, %s2891_s2  ;;  %v3658_v60 = vld [vmem:[#allocation5 + $0x70] ss:$8 sps:$4 sm:$0xff]  }
 0xb54   :  { %2678 = vtanh.f32 %v3592_v28  ;;  %v2677_v59 = vpop.eup %2676 }
 0xb55   :  { %2680 = vpow2.f32 %v2385_v57 }
 0xb5e   :  { %v2679_v12 = vpop.eup %2678 }
 0xb5f   :  { %v1495_v48 = vmul.f32 %v2679_v12, %v2677_v59  ;;  %v2681_v53 = vpop.eup %2680 }
 0xb60   :  { %v1506_v0 = vadd.f32 1.0, %v2681_v53 }
 0xb61   :  { %1628 = vrot.lane.b32.xlu1 %v1495_v48, %s2891_s2  ;;  %v1580_v18 = vrot.slane %v1495_v48, 6 }
 0xbbf   :  { %v1522_v21 = vpop.permute.xlu1 %1521 }
 0xbc0   :  { %2386 = vmatmul.mubr.msk.bf16.vlgmr.msra.gmra.mrb[28].mxu1 %vm219_vm2, %v1522_v21 }
 0xbc1   :  { %1634 = vmatpush1.bf16.msra.mxu1 %v3598_v11  ;;  %1665 = vmatprep.mubr.bf16.mxu1 %v3857_v1 }
 0xbc2   :  { %1635 = vmatprep.subr.bf16.mxu1 %v3602_v31 }
 0xbc3   :  { %v1577_v34 = vpop.permute.xlu1 %1576 }
 0xbc4   :  { %v1582_v50 = vsel %vm219_vm2, %v1577_v34, %v1580_v18  ;;  %v1513_v52 = vpop.permute.xlu0 %1512 }
 0xbc5   :  { %v1583_v49 = vpack.c.bf16 %v1582_v50, %v1582_v50  ;;  %1636 = vmatpush1.bf16.msra.mxu1 %v3607_v54  ;;  %v3610_v55 = vadd.f32 %v1513_v52, %v1509_v51 }
 0xbc6   :  { %1637 = vmatprep.subr.bf16.mxu1 %v3612_v8 }
 0xbc7   :  { %v1585_v56 = vrot.slane %v1583_v49, 1  ;;  %2682 = vtanh.f32 %v3610_v55 }
 0xbc8   :  { %2684 = vrcp.f32 %v1506_v0 }
 0xbc9   :  { %1638 = vmatpush1.bf16.msra.mxu1 %v3615_v5  ;;  %1620 = vmatmul.mubr.bf16.vlgmr.msra.gmra.mrb[36].mxu0 %v1585_v56 }
 0xbca   :  { %1639 = vmatprep.subr.bf16.mxu1 %v3619_v7  ;;  %1752 = vmatpush1.bf16.msra.mxu0 %v3412_v13  ;;  %v3636_v13 = vld [vmem:[#allocation5 + $0x54] ss:$8 sps:$4 sm:$0xff]  }
 0xbcb   :  { %1753 = vmatprep.subr.bf16.mxu0 %v3419_v27  ;;  %1783 = vmatprep.mubr.bf16.mxu0 %v3857_v1 }
 0xbcd   :  { %1640 = vmatpush1.bf16.msra.mxu1 %v3625_v37 }
 0xbce   :  { %1641 = vmatprep.subr.bf16.mxu1 %v3628_v45  ;;  %1754 = vmatpush1.bf16.msra.mxu0 %v3425_v3 }
 0xbcf   :  { %1755 = vmatprep.subr.bf16.mxu0 %v3431_v25 }
 0xbd1   :  { %1642 = vmatpush1.bf16.msra.mxu1 %v3633_v36  ;;  %v2683_v27 = vpop.eup %2682 }
 0xbd2   :  { %1643 = vmatprep.subr.bf16.mxu1 %v3636_v13  ;;  %1756 = vmatpush1.bf16.msra.mxu0 %v3437_v24  ;;  %v2685_v3 = vpop.eup %2684 }
 0xbd3   :  { %1757 = vmatprep.subr.bf16.mxu0 %v3443_v6  ;;  %v1517_v25 = vmul.f32 %v2685_v3, %v2683_v27  ;;  %v1629_v24 = vpop.permute.xlu1 %1628  ;;  %v3654_v6 = vld [vmem:[#allocation5 + $0x74] ss:$8 sps:$4 sm:$0xff]  }
 0xbd5   :  { %1644 = vmatpush1.bf16.msra.mxu1 %v3641_v38  ;;  %v1631_v43 = vsel %vm219_vm2, %v1629_v24, %v1517_v25 }
 0xbd6   :  { %1645 = vmatprep.subr.bf16.mxu1 %v3644_v39  ;;  %1758 = vmatpush1.bf16.msra.mxu0 %v3449_v9  ;;  %v1632_v9 = vpack.c.bf16 %v1631_v43, %v1631_v43  ;;  %v1688_v43 = vrot.slane %v3585_v44, 6 }
 0xbd7   :  { %1858 = vmatprep.subr.bf16.mxu0 %v3648_v40 }
 0xbd9   :  { %1646 = vmatpush1.bf16.msra.mxu1 %v3651_v42 }
 0xbda   :  { %1647 = vmatprep.subr.bf16.mxu1 %v3654_v6 }
 0xbdd   :  { %1648 = vmatpush1.bf16.msra.mxu1 %v3658_v60 }
 0xbde   :  { %1812 = vmatprep.subr.bf16.mxu1 %v3526_v58 }
 0xbe0   :  { %1666 = vmatmul.mubr.bf16.vlgmr.msra.gmra.mrb[32].mxu1 %v1632_v9 }
 0xbe1   :  { %1813 = vmatpush1.bf16.msra.mxu1 %v3462_v23  ;;  %1844 = vmatprep.mubr.bf16.mxu1 %v3857_v1 }
 0xbe2   :  { %1814 = vmatprep.subr.bf16.mxu1 %v3466_v2 }
 0xbe5   :  { %1815 = vmatpush1.bf16.msra.mxu1 %v3469_v29 }
 0xbe6   :  { %1816 = vmatprep.subr.bf16.mxu1 %v3472_v46 }
 0xbe9   :  { %1817 = vmatpush1.bf16.msra.mxu1 %v3475_v47 }
 0xbea   :  { %1818 = vmatprep.subr.bf16.mxu1 %v3546_v35 }
 0xbed   :  { %1819 = vmatpush1.bf16.msra.mxu1 %v3549_v33 }
 0xbee   :  { %1820 = vmatprep.subr.bf16.mxu1 %v3552_v20 }
 0xbf1   :  { %1821 = vmatpush1.bf16.msra.mxu1 %v3555_v14 }
 0xbf2   :  { %1822 = vmatprep.subr.bf16.mxu1 %v3558_v16 }
 0xbf5   :  { %1823 = vmatpush1.bf16.msra.mxu1 %v3561_v19 }
 0xbf6   :  { %1824 = vmatprep.subr.bf16.mxu1 %v3564_v22 }
 0xbf9   :  { %1825 = vmatpush1.bf16.msra.mxu1 %v3567_v4 }
 0xbfa   :  { %1826 = vmatprep.subr.bf16.mxu1 %v3570_v63 }
 0xbfd   :  { %1827 = vmatpush1.bf16.msra.mxu1 %v3573_v30 }
 0xbfe   :  { %1980 = vmatprep.subr.bf16.mxu1 %v3526_v58 }
 0xc93   :  { %v1560_v61 = vpop.f32.mrb[28].mxu1 }
 0xc94   :  { %v1569_v62 = vrot.slane %v1560_v61, 4  ;;  %v1562_v59 = vpop.f32.mrb[29].mxu1 }
 0xc95   :  { %v1564_v12 = vpop.f32.mrb[30].mxu1  ;;  %v1570_v51 = vrot.slane %v1562_v59, 4 }
 0xc96   :  { %v1573_v48 = vadd.f32 %v1569_v62, %v3863_v15  ;;  %v1565_v57 = vpop.f32.mrb[31].mxu1 }
 0xc97   :  { %v1574_v58 = vadd.f32 %v1570_v51, %v3864_v17 }
 0xc98   :  { %v2387_v21 = vmul.f32 -1.442695, %v1573_v48 }
 0xc9a   :  { %2686 = vpow2.f32 %v2387_v21 }
 0xc9c   :  { %v1621_v18 = vpop.f32.mrb[36].mxu0 }
 0xc9d   :  { %v1622_v34 = vadd.f32 %v1621_v18, %v3153_v26  ;;  %v1623_v50 = vpop.f32.mrb[37].mxu0 }
 0xc9e   :  { %v1625_v52 = vpop.f32.mrb[38].mxu0  ;;  %v1624_v27 = vadd.f32 %v1623_v50, %v3158_v41 }
 0xc9f   :  { %v2389_v53 = vmul.f32 -1.442695, %v1622_v34  ;;  %v1626_v49 = vpop.f32.mrb[39].mxu0 }
 0xca1   :  { %2688 = vpow2.f32 %v2389_v53 }
 0xca2   :  { %2690 = vtanh.f32 %v1574_v58 }
 0xca4   :  { %v2687_v56 = vpop.eup %2686 }
 0xca5   :  { %v1677_v0 = vadd.f32 1.0, %v2687_v56 }
 0xca7   :  { %2692 = vrcp.f32 %v1677_v0 }
 0xca8   :  { %2694 = vtanh.f32 %v1624_v27 }
 0xcab   :  { %v2689_v3 = vpop.eup %2688 }
 0xcac   :  { %v1702_v25 = vadd.f32 1.0, %v2689_v3  ;;  %v2691_v24 = vpop.eup %2690  ;;  %v2388_v3 = vmul.f32 -1.442695, %v1574_v58 }
 0xcae   :  { %2696 = vrcp.f32 %v1702_v25  ;;  %v2390_v25 = vmul.f32 -1.442695, %v1624_v27 }
 0xcb1   :  { %v2693_v9 = vpop.eup %2692 }
 0xcb2   :  { %v1691_v61 = vmul.f32 %v2693_v9, %v2691_v24  ;;  %v1690_v62 = vmul.f32 %v2693_v9, %v1688_v43  ;;  %v2695_v34 = vpop.eup %2694 }
 0xcb3   :  { %v1667_v59 = vpop.f32.mrb[32].mxu1 }
 0xcb4   :  { %v1668_v12 = vadd.f32 %v1667_v59, %v3861_v32  ;;  %v1669_v48 = vpop.f32.mrb[33].mxu1  ;;  %1693 = vrot.lane.b32.xlu0 %v1691_v61, %s2891_s2 }
 0xcb5   :  { %v1671_v57 = vpop.f32.mrb[34].mxu1  ;;  %v1670_v44 = vadd.f32 %v1669_v48, %v3862_v10 }
 0xcb6   :  { %v2391_v21 = vmul.f32 -1.442695, %v1668_v12  ;;  %v1672_v18 = vpop.f32.mrb[35].mxu1 }
 0xcb8   :  { %v2697_v50 = vpop.eup %2696  ;;  %2698 = vpow2.f32 %v2391_v21 }
 0xcb9   :  { %v1713_v51 = vmul.f32 %v2697_v50, %v2695_v34  ;;  %2700 = vtanh.f32 %v1670_v44  ;;  %v1712_v12 = vmul.f32 %v2697_v50, %v3592_v28  ;;  %v2392_v28 = vmul.f32 -1.442695, %v1670_v44 }
 0xcbb   :  { %1715 = vrot.lane.b32.xlu0 %v1713_v51, %s2891_s2 }
 0xcc2   :  { %v2699_v52 = vpop.eup %2698 }
 0xcc3   :  { %v1724_v53 = vadd.f32 1.0, %v2699_v52  ;;  %v2701_v49 = vpop.eup %2700 }
 0xcc5   :  { %2702 = vrcp.f32 %v1724_v53 }
 0xcc6   :  { %2704 = vpow2.f32 %v2388_v3 }
 0xcc7   :  { %2706 = vpow2.f32 %v2390_v25 }
 0xccf   :  { %v2703_v56 = vpop.eup %2702 }
 0xcd0   :  { %v1735_v0 = vmul.f32 %v2703_v56, %v2701_v49  ;;  %v2705_v24 = vpop.eup %2704  ;;  %v1734_v44 = vmul.f32 %v2703_v56, %v3610_v55 }
 0xcd1   :  { %v1684_v43 = vadd.f32 1.0, %v2705_v24  ;;  %v2707_v48 = vpop.eup %2706 }
 0xcd2   :  { %1737 = vrot.lane.b32.xlu0 %v1735_v0, %s2891_s2  ;;  %v1709_v21 = vadd.f32 1.0, %v2707_v48 }
 0xcd3   :  { %2708 = vrcp.f32 %v1684_v43 }
 0xcdd   :  { %v2709_v18 = vpop.eup %2708 }
 0xd26   :  { %v1694_v9 = vpop.permute.xlu0 %1693 }
 0xd27   :  { %v3689_v61 = vadd.f32 %v1694_v9, %v1690_v62 }
 0xd29   :  { %2710 = vtanh.f32 %v3689_v61 }
 0xd2d   :  { %v1716_v59 = vpop.permute.xlu0 %1715 }
 0xd2e   :  { %v3693_v57 = vadd.f32 %v1716_v59, %v1712_v12 }
 0xd30   :  { %2712 = vtanh.f32 %v3693_v57 }
 0xd31   :  { %2714 = vrcp.f32 %v1709_v21 }
 0xd32   :  { %2716 = vpow2.f32 %v2392_v28 }
 0xd33   :  { %v2711_v58 = vpop.eup %2710 }
 0xd34   :  { %v1698_v27 = vmul.f32 %v2711_v58, %v2709_v18 }
 0xd36   :  { %v1743_v34 = vpack.c.bf16 %v1698_v27, %v1698_v27 }
 0xd38   :  { %v1745_v51 = vrot.slane %v1743_v34, 2 }
 0xd3a   :  { %1746 = vrot.lane.b32.xlu1 %v1745_v51, %s2891_s2  ;;  %v2713_v62 = vpop.eup %2712 }
 0xd3b   :  { %v2715_v52 = vpop.eup %2714 }
 0xd3c   :  { %v1720_v53 = vmul.f32 %v2715_v52, %v2713_v62  ;;  %v2717_v43 = vpop.eup %2716  ;;  %v1913_v52 = vrot.slane %v3689_v61, 6 }
 0xd3d   :  { %v1731_v12 = vadd.f32 1.0, %v2717_v43 }
 0xd3e   :  { %1801 = vrot.lane.b32.xlu1 %v1698_v27, %s2891_s2  ;;  %v1805_v49 = vrot.slane %v1720_v53, 4 }
 0xd42   :  { %1853 = vrot.lane.b32.xlu1 %v1720_v53, %s2891_s2 }
 0xd44   :  { %v1738_v25 = vpop.permute.xlu0 %1737 }
 0xd45   :  { %v3707_v59 = vadd.f32 %v1738_v25, %v1734_v44 }
 0xd47   :  { %2718 = vtanh.f32 %v3707_v59 }
 0xd48   :  { %2720 = vrcp.f32 %v1731_v12 }
 0xdac   :  { %v1747_v50 = vpop.permute.xlu1 %1746 }
 0xdad   :  { %2393 = vmatmul.mubr.msk.bf16.vlgmr.msra.gmra.mrb[40].mxu0 %vm219_vm2, %v1747_v50 }
 0xdae   :  { %1859 = vmatpush1.bf16.msra.mxu0 %v3598_v11  ;;  %1890 = vmatprep.mubr.bf16.mxu0 %v3857_v1 }
 0xdaf   :  { %1860 = vmatprep.subr.bf16.mxu0 %v3602_v31 }
 0xdb0   :  { %v1802_v0 = vpop.permute.xlu1 %1801 }
 0xdb1   :  { %v1807_v3 = vsel %vm219_vm2, %v1802_v0, %v1805_v49 }
 0xdb2   :  { %v1808_v24 = vpack.c.bf16 %v1807_v3, %v1807_v3  ;;  %1861 = vmatpush1.bf16.msra.mxu0 %v3607_v54 }
 0xdb3   :  { %1862 = vmatprep.subr.bf16.mxu0 %v3612_v8 }
 0xdb4   :  { %v1810_v9 = vrot.slane %v1808_v24, 2 }
 0xdb6   :  { %1863 = vmatpush1.bf16.msra.mxu0 %v3615_v5  ;;  %1845 = vmatmul.mubr.bf16.vlgmr.msra.gmra.mrb[36].mxu1 %v1810_v9 }
 0xdb7   :  { %1864 = vmatprep.subr.bf16.mxu0 %v3619_v7  ;;  %1981 = vmatpush1.bf16.msra.mxu1 %v3462_v23  ;;  %v2719_v23 = vpop.eup %2718 }
 0xdb8   :  { %1982 = vmatprep.subr.bf16.mxu1 %v3466_v2  ;;  %2012 = vmatprep.mubr.bf16.mxu1 %v3857_v1  ;;  %v2721_v2 = vpop.eup %2720 }
 0xdba   :  { %1865 = vmatpush1.bf16.msra.mxu0 %v3625_v37 }
 0xdbb   :  { %1866 = vmatprep.subr.bf16.mxu0 %v3628_v45  ;;  %1983 = vmatpush1.bf16.msra.mxu1 %v3469_v29  ;;  %v1854_v29 = vpop.permute.xlu1 %1853 }
 0xdbc   :  { %1984 = vmatprep.subr.bf16.mxu1 %v3472_v46  ;;  %v1742_v46 = vmul.f32 %v2721_v2, %v2719_v23 }
 0xdbe   :  { %1867 = vmatpush1.bf16.msra.mxu0 %v3633_v36 }
 0xdbf   :  { %1868 = vmatprep.subr.bf16.mxu0 %v3636_v13  ;;  %1985 = vmatpush1.bf16.msra.mxu1 %v3475_v47  ;;  %v1856_v47 = vsel %vm219_vm2, %v1854_v29, %v1742_v46 }
 0xdc0   :  { %1986 = vmatprep.subr.bf16.mxu1 %v3546_v35  ;;  %v1857_v35 = vpack.c.bf16 %v1856_v47, %v1856_v47 }
 0xdc2   :  { %1869 = vmatpush1.bf16.msra.mxu0 %v3641_v38 }
 0xdc3   :  { %1870 = vmatprep.subr.bf16.mxu0 %v3644_v39  ;;  %1987 = vmatpush1.bf16.msra.mxu1 %v3549_v33 }
 0xdc4   :  { %1988 = vmatprep.subr.bf16.mxu1 %v3552_v20 }
 0xdc6   :  { %1871 = vmatpush1.bf16.msra.mxu0 %v3651_v42 }
 0xdc7   :  { %1872 = vmatprep.subr.bf16.mxu0 %v3654_v6  ;;  %1989 = vmatpush1.bf16.msra.mxu1 %v3555_v14 }
 0xdc8   :  { %1990 = vmatprep.subr.bf16.mxu1 %v3558_v16 }
 0xdca   :  { %1873 = vmatpush1.bf16.msra.mxu0 %v3658_v60 }
 0xdcb   :  { %2026 = vmatprep.subr.bf16.mxu0 %v3648_v40  ;;  %1991 = vmatpush1.bf16.msra.mxu1 %v3561_v19 }
 0xdcc   :  { %1992 = vmatprep.subr.bf16.mxu1 %v3564_v22 }
 0xdcd   :  { %1891 = vmatmul.mubr.bf16.vlgmr.msra.gmra.mrb[44].mxu0 %v1857_v35 }
 0xdce   :  { %2027 = vmatpush1.bf16.msra.mxu0 %v3598_v11  ;;  %2058 = vmatprep.mubr.bf16.mxu0 %v3857_v1 }
 0xdcf   :  { %2028 = vmatprep.subr.bf16.mxu0 %v3602_v31  ;;  %1993 = vmatpush1.bf16.msra.mxu1 %v3567_v4 }
 0xdd0   :  { %1994 = vmatprep.subr.bf16.mxu1 %v3570_v63 }
 0xdd2   :  { %2029 = vmatpush1.bf16.msra.mxu0 %v3607_v54 }
 0xdd3   :  { %2030 = vmatprep.subr.bf16.mxu0 %v3612_v8  ;;  %1995 = vmatpush1.bf16.msra.mxu1 %v3573_v30 }
 0xdd4   :  { %2117 = vmatprep.subr.bf16.mxu1 %v3648_v40 }
 0xdd6   :  { %2031 = vmatpush1.bf16.msra.mxu0 %v3615_v5 }
 0xdd7   :  { %2032 = vmatprep.subr.bf16.mxu0 %v3619_v7 }
 0xdda   :  { %2033 = vmatpush1.bf16.msra.mxu0 %v3625_v37 }
 0xddb   :  { %2034 = vmatprep.subr.bf16.mxu0 %v3628_v45 }
 0xdde   :  { %2035 = vmatpush1.bf16.msra.mxu0 %v3633_v36 }
 0xddf   :  { %2036 = vmatprep.subr.bf16.mxu0 %v3636_v13 }
 0xde2   :  { %2037 = vmatpush1.bf16.msra.mxu0 %v3641_v38 }
 0xde3   :  { %2038 = vmatprep.subr.bf16.mxu0 %v3644_v39 }
 0xde6   :  { %2039 = vmatpush1.bf16.msra.mxu0 %v3651_v42 }
 0xde7   :  { %2040 = vmatprep.subr.bf16.mxu0 %v3654_v6 }
 0xdea   :  { %2041 = vmatpush1.bf16.msra.mxu0 %v3658_v60 }
 0xe80   :  { %v1785_v33 = vpop.f32.mrb[40].mxu0 }
 0xe81   :  { %v1794_v20 = vrot.slane %v1785_v33, 2  ;;  %v1787_v14 = vpop.f32.mrb[41].mxu0 }
 0xe82   :  { %v1789_v16 = vpop.f32.mrb[42].mxu0  ;;  %v1795_v40 = vrot.slane %v1787_v14, 2 }
 0xe83   :  { %v1798_v19 = vadd.f32 %v1794_v20, %v3863_v15  ;;  %v1790_v22 = vpop.f32.mrb[43].mxu0 }
 0xe84   :  { %v1799_v18 = vadd.f32 %v1795_v40, %v3864_v17 }
 0xe85   :  { %v2394_v4 = vmul.f32 -1.442695, %v1798_v19 }
 0xe86   :  { %v2395_v47 = vmul.f32 -1.442695, %v1799_v18 }
 0xe87   :  { %2722 = vpow2.f32 %v2394_v4 }
 0xe89   :  { %v1846_v63 = vpop.f32.mrb[36].mxu1 }
 0xe8a   :  { %v1847_v30 = vadd.f32 %v1846_v63, %v3153_v26  ;;  %v1848_v55 = vpop.f32.mrb[37].mxu1 }
 0xe8b   :  { %v1850_v56 = vpop.f32.mrb[38].mxu1  ;;  %v1849_v15 = vadd.f32 %v1848_v55, %v3158_v41 }
 0xe8c   :  { %v2396_v48 = vmul.f32 -1.442695, %v1847_v30  ;;  %v1851_v21 = vpop.f32.mrb[39].mxu1 }
 0xe8d   :  { %v2397_v35 = vmul.f32 -1.442695, %v1849_v15 }
 0xe8e   :  { %2724 = vpow2.f32 %v2396_v48 }
 0xe8f   :  { %2726 = vtanh.f32 %v1799_v18 }
 0xe91   :  { %v2723_v58 = vpop.eup %2722 }
 0xe92   :  { %v1902_v27 = vadd.f32 1.0, %v2723_v58 }
 0xe94   :  { %2728 = vrcp.f32 %v1902_v27 }
 0xe95   :  { %2730 = vtanh.f32 %v1849_v15 }
 0xe98   :  { %v2725_v34 = vpop.eup %2724 }
 0xe99   :  { %v1927_v51 = vadd.f32 1.0, %v2725_v34  ;;  %v2727_v62 = vpop.eup %2726 }
 0xe9b   :  { %2732 = vrcp.f32 %v1927_v51 }
 0xe9e   :  { %v2729_v53 = vpop.eup %2728 }
 0xe9f   :  { %v1916_v28 = vmul.f32 %v2729_v53, %v2727_v62  ;;  %v1915_v50 = vmul.f32 %v2729_v53, %v1913_v52  ;;  %v2731_v44 = vpop.eup %2730 }
 0xea0   :  { %v1892_v49 = vpop.f32.mrb[44].mxu0 }
 0xea1   :  { %v1893_v0 = vadd.f32 %v1892_v49, %v3861_v32  ;;  %v1894_v17 = vpop.f32.mrb[45].mxu0  ;;  %1918 = vrot.lane.b32.xlu0 %v1916_v28, %s2891_s2 }
 0xea2   :  { %v1896_v3 = vpop.f32.mrb[46].mxu0  ;;  %v1895_v61 = vadd.f32 %v1894_v17, %v3862_v10 }
 0xea3   :  { %v2398_v25 = vmul.f32 -1.442695, %v1893_v0  ;;  %v1897_v24 = vpop.f32.mrb[47].mxu0 }
 0xea4   :  { %v2399_v58 = vmul.f32 -1.442695, %v1895_v61 }
 0xea5   :  { %v2733_v43 = vpop.eup %2732  ;;  %2734 = vpow2.f32 %v2398_v25 }
 0xea6   :  { %v1938_v9 = vmul.f32 %v2733_v43, %v2731_v44  ;;  %2736 = vtanh.f32 %v1895_v61  ;;  %v1937_v4 = vmul.f32 %v2733_v43, %v3693_v57 }
 0xea8   :  { %1940 = vrot.lane.b32.xlu1 %v1938_v9, %s2891_s2 }
 0xeaf   :  { %v2735_v12 = vpop.eup %2734 }
 0xeb0   :  { %v1949_v23 = vadd.f32 1.0, %v2735_v12  ;;  %v2737_v2 = vpop.eup %2736 }
 0xeb2   :  { %2738 = vrcp.f32 %v1949_v23 }
 0xeb3   :  { %2740 = vpow2.f32 %v2395_v47 }
 0xeb4   :  { %2742 = vpow2.f32 %v2397_v35 }
 0xebc   :  { %v2739_v29 = vpop.eup %2738 }
 0xebd   :  { %v1960_v46 = vmul.f32 %v2739_v29, %v2737_v2  ;;  %v2741_v33 = vpop.eup %2740  ;;  %v1959_v57 = vmul.f32 %v2739_v29, %v3707_v59 }
 0xebe   :  { %v1909_v20 = vadd.f32 1.0, %v2741_v33  ;;  %v2743_v19 = vpop.eup %2742 }
 0xebf   :  { %1962 = vrot.lane.b32.xlu1 %v1960_v46, %s2891_s2  ;;  %v1934_v22 = vadd.f32 1.0, %v2743_v19 }
 0xec0   :  { %2744 = vrcp.f32 %v1909_v20 }
 0xeca   :  { %v2745_v55 = vpop.eup %2744 }
 0xf13   :  { %v1919_v14 = vpop.permute.xlu0 %1918 }
 0xf14   :  { %v1921_v16 = vadd.f32 %v1919_v14, %v1915_v50 }
 0xf16   :  { %2746 = vtanh.f32 %v1921_v16 }
 0xf17   :  { %2748 = vrcp.f32 %v1934_v22 }
 0xf1a   :  { %v1941_v63 = vpop.permute.xlu1 %1940 }
 0xf1b   :  { %v3767_v30 = vadd.f32 %v1941_v63, %v1937_v4 }
 0xf1d   :  { %2750 = vtanh.f32 %v3767_v30 }
 0xf1e   :  { %2752 = vpow2.f32 %v2399_v58 }
 0xf20   :  { %v2747_v40 = vpop.eup %2746 }
 0xf21   :  { %v1923_v56 = vmul.f32 %v2747_v40, %v2745_v55  ;;  %v2749_v48 = vpop.eup %2748 }
 0xf23   :  { %1969 = vrot.lane.b32.xlu0 %v1923_v56, %s2891_s2 }
 0xf27   :  { %v2751_v21 = vpop.eup %2750 }
 0xf28   :  { %v1945_v18 = vmul.f32 %v2751_v21, %v2749_v48  ;;  %v2753_v15 = vpop.eup %2752 }
 0xf29   :  { %v1956_v51 = vadd.f32 1.0, %v2753_v15 }
 0xf2a   :  { %2021 = vrot.lane.b32.xlu0 %v1945_v18, %s2891_s2  ;;  %v1973_v62 = vrot.slane %v1945_v18, 2 }
 0xf31   :  { %v1963_v27 = vpop.permute.xlu1 %1962 }
 0xf32   :  { %v3773_v34 = vadd.f32 %v1963_v27, %v1959_v57 }
 0xf34   :  { %2754 = vtanh.f32 %v3773_v34 }
 0xf35   :  { %2756 = vrcp.f32 %v1956_v51 }
 0xf3e   :  { %v2755_v50 = vpop.eup %2754 }
 0xf3f   :  { %v2757_v0 = vpop.eup %2756 }
 0xf40   :  { %v1967_v17 = vmul.f32 %v2757_v0, %v2755_v50  ;;  %v2892_v0 = vmov 0.0  }
 0xf41   :  { %2420 = vmatprep.subr.bf16.mxu0 %v2892_v0 }
 0xf95   :  { %v1970_v52 = vpop.permute.xlu0 %1969 }
 0xf96   :  { %v1975_v53 = vsel %vm219_vm2, %v1970_v52, %v1973_v62 }
 0xf97   :  { %v1976_v28 = vpack.c.bf16 %v1975_v53, %v1975_v53 }
 0xf99   :  { %v1978_v49 = vrot.slane %v1976_v28, 3 }
 0xf9b   :  { %2013 = vmatmul.mubr.bf16.vlgmr.msra.gmra.mrb[40].mxu1 %v1978_v49 }
 0xf9c   :  { %v2022_v3 = vpop.permute.xlu0 %2021  ;;  %2118 = vmatpush1.bf16.msra.mxu1 %v3598_v11  ;;  %2149 = vmatprep.mubr.bf16.mxu1 %v3857_v1 }
 0xf9d   :  { %v2024_v59 = vsel %vm219_vm2, %v2022_v3, %v1967_v17  ;;  %2119 = vmatprep.subr.bf16.mxu1 %v3602_v31  ;;  %v2504_v17 = vld [vmem:[%s3838_s8 + $0x10] sm:$0xff]   ;;  %v2505_v3 = vld [vmem:[%s3838_s8 + $0x18] sm:$0xff]  }
 0xf9e   :  { %v2025_v25 = vpack.c.bf16 %v2024_v59, %v2024_v59 }
 0xfa0   :  { %2059 = vmatmul.mubr.bf16.vlgmr.msra.gmra.mrb[48].mxu0 %v2025_v25  ;;  %2120 = vmatpush1.bf16.msra.mxu1 %v3607_v54 }
 0xfa1   :  { %2121 = vmatprep.subr.bf16.mxu1 %v3612_v8  ;;  %2428 = vmatprep.mubr.msk.bf16.mxu0 %vm2893_vm4, %v2892_v0 }
 0xfa4   :  { %2122 = vmatpush1.bf16.msra.mxu1 %v3615_v5 }
 0xfa5   :  { %2123 = vmatprep.subr.bf16.mxu1 %v3619_v7 }
 0xfa8   :  { %2124 = vmatpush1.bf16.msra.mxu1 %v3625_v37 }
 0xfa9   :  { %2125 = vmatprep.subr.bf16.mxu1 %v3628_v45 }
 0xfac   :  { %2126 = vmatpush1.bf16.msra.mxu1 %v3633_v36 }
 0xfad   :  { %2127 = vmatprep.subr.bf16.mxu1 %v3636_v13 }
 0xfb0   :  { %2128 = vmatpush1.bf16.msra.mxu1 %v3641_v38 }
 0xfb1   :  { %2129 = vmatprep.subr.bf16.mxu1 %v3644_v39 }
 0xfb4   :  { %2130 = vmatpush1.bf16.msra.mxu1 %v3651_v42 }
 0xfb5   :  { %2131 = vmatprep.subr.bf16.mxu1 %v3654_v6 }
 0xfb8   :  { %2132 = vmatpush1.bf16.msra.mxu1 %v3658_v60 }
0x106e   :  { %v2014_v1 = vpop.f32.mrb[40].mxu1 }
0x106f   :  { %v2015_v11 = vadd.f32 %v2014_v1, %v3153_v26  ;;  %v2016_v31 = vpop.f32.mrb[41].mxu1 }
0x1070   :  { %v2018_v54 = vpop.f32.mrb[42].mxu1  ;;  %v2017_v39 = vadd.f32 %v2016_v31, %v3158_v41 }
0x1071   :  { %v2400_v8 = vmul.f32 -1.442695, %v2015_v11  ;;  %v2019_v5 = vpop.f32.mrb[43].mxu1 }
0x1072   :  { %v2401_v41 = vmul.f32 -1.442695, %v2017_v39 }
0x1073   :  { %2758 = vpow2.f32 %v2400_v8  ;;  %v2060_v7 = vpop.f32.mrb[48].mxu0 }
0x1074   :  { %v2061_v37 = vadd.f32 %v2060_v7, %v3861_v32  ;;  %v2062_v45 = vpop.f32.mrb[49].mxu0 }
0x1075   :  { %v2064_v36 = vpop.f32.mrb[50].mxu0  ;;  %v2063_v26 = vadd.f32 %v2062_v45, %v3862_v10 }
0x1076   :  { %v2402_v13 = vmul.f32 -1.442695, %v2061_v37  ;;  %v2065_v38 = vpop.f32.mrb[51].mxu0  ;;  %v2406_v36 = vld [vmem:[%s3839_s9] ss:$0 sm:$0xff] }
0x1077   :  { %v2403_v16 = vmul.f32 -1.442695, %v2063_v26 }
0x1078   :  { %2760 = vpow2.f32 %v2402_v13 }
0x1079   :  { %2762 = vtanh.f32 %v2017_v39 }
0x107d   :  { %v2759_v42 = vpop.eup %2758 }
0x107e   :  { %v2070_v6 = vadd.f32 1.0, %v2759_v42 }
0x1080   :  { %2764 = vrcp.f32 %v2070_v6  ;;  %v2412_v6 = vld [vmem:[%s3840_s10] ss:$0 sm:$0xff] }
0x1081   :  { %2766 = vtanh.f32 %v2063_v26 }
0x1082   :  { %v2761_v60 = vpop.eup %2760 }
0x1083   :  { %v2092_v24 = vadd.f32 1.0, %v2761_v60  ;;  %v2763_v44 = vpop.eup %2762 }
0x1085   :  { %2768 = vrcp.f32 %v2092_v24 }
0x1086   :  { %2770 = vpow2.f32 %v2401_v41 }
0x108a   :  { %v2765_v43 = vpop.eup %2764 }
0x108b   :  { %v2081_v9 = vmul.f32 %v2765_v43, %v2763_v44  ;;  %v2767_v61 = vpop.eup %2766  ;;  %v2080_v46 = vmul.f32 %v2765_v43, %v3767_v30  ;;  %v2413_v43 = vld [vmem:[#allocation2] ss:$0 sm:$0xff] }
0x108d   :  { %2083 = vrot.lane.b32.xlu1 %v2081_v9, %s2891_s2 }
0x108f   :  { %v2769_v12 = vpop.eup %2768 }
0x1090   :  { %v2103_v23 = vmul.f32 %v2769_v12, %v2767_v61  ;;  %v2771_v2 = vpop.eup %2770  ;;  %v2102_v22 = vmul.f32 %v2769_v12, %v3773_v34 }
0x1091   :  { %v2077_v29 = vadd.f32 1.0, %v2771_v2 }
0x1092   :  { %2105 = vrot.lane.b32.xlu0 %v2103_v23, %s2891_s2 }
0x1093   :  { %2772 = vrcp.f32 %v2077_v29 }
0x109d   :  { %v2773_v33 = vpop.eup %2772 }
0x10ff   :  { %v2084_v47 = vpop.permute.xlu1 %2083 }
0x1100   :  { %v2086_v35 = vadd.f32 %v2084_v47, %v2080_v46 }
0x1102   :  { %2774 = vtanh.f32 %v2086_v35 }
0x1103   :  { %2776 = vpow2.f32 %v2403_v16 }
0x1104   :  { %v2106_v19 = vpop.permute.xlu0 %2105 }
0x1105   :  { %v2108_v63 = vadd.f32 %v2106_v19, %v2102_v22 }
0x1107   :  { %2778 = vtanh.f32 %v2108_v63 }
0x110c   :  { %v2775_v20 = vpop.eup %2774 }
0x110d   :  { %v2088_v14 = vmul.f32 %v2775_v20, %v2773_v33  ;;  %v2777_v4 = vpop.eup %2776 }
0x110e   :  { %v2099_v55 = vadd.f32 1.0, %v2777_v4 }
0x110f   :  { %2112 = vrot.lane.b32.xlu1 %v2088_v14, %s2891_s2 }
0x1110   :  { %2780 = vrcp.f32 %v2099_v55 }
0x1111   :  { %v2779_v30 = vpop.eup %2778 }
0x111a   :  { %v2781_v40 = vpop.eup %2780 }
0x111b   :  { %v2110_v56 = vmul.f32 %v2781_v40, %v2779_v30 }
0x1181   :  { %v2113_v48 = vpop.permute.xlu1 %2112 }
0x1182   :  { %v2115_v21 = vsel %vm219_vm2, %v2113_v48, %v2110_v56 }
0x1183   :  { %v2116_v18 = vpack.c.bf16 %v2115_v21, %v2115_v21 }
0x1185   :  { %2150 = vmatmul.mubr.bf16.vlgmr.msra.gmra.mrb[44].mxu1 %v2116_v18 }
0x1258   :  { %v2151_v58 = vpop.f32.mrb[44].mxu1 }
0x1259   :  { %v2152_v27 = vadd.f32 %v2151_v58, %v3861_v32  ;;  %v2153_v57 = vpop.f32.mrb[45].mxu1  ;;  %v2502_v32 = vld [vmem:[%s3838_s8] sm:$0xff]  }
0x125a   :  { %v2155_v15 = vpop.f32.mrb[46].mxu1  ;;  %v2154_v62 = vadd.f32 %v2153_v57, %v3862_v10  ;;  %2421 = vmatpush3.bf16.msra.mxu0 %v2502_v32  ;;  %v2503_v10 = vld [vmem:[%s3838_s8 + $0x8] sm:$0xff]  }
0x125b   :  { %v2404_v51 = vmul.f32 -1.442695, %v2152_v27  ;;  %v2156_v34 = vpop.f32.mrb[47].mxu1  ;;  %2422 = vmatprep.subr.bf16.mxu0 %v2892_v0 }
0x125c   :  { %v2405_v59 = vmul.f32 -1.442695, %v2154_v62 }
0x125d   :  { %2782 = vpow2.f32 %v2404_v51 }
0x125e   :  { %2784 = vtanh.f32 %v2154_v62  ;;  %2423 = vmatpush3.bf16.msra.mxu0 %v2503_v10 }
0x125f   :  { %2424 = vmatprep.subr.bf16.mxu0 %v2892_v0 }
0x1262   :  { %2425 = vmatpush3.bf16.msra.mxu0 %v2504_v17 }
0x1263   :  { %2426 = vmatprep.subr.bf16.mxu0 %v2892_v0 }
0x1266   :  { %2427 = vmatpush3.bf16.msra.mxu0 %v2505_v3 }
0x1267   :  { %v2783_v52 = vpop.eup %2782 }
0x1268   :  { %v2161_v53 = vadd.f32 1.0, %v2783_v52  ;;  %v2785_v28 = vpop.eup %2784 }
0x126a   :  { %2786 = vrcp.f32 %v2161_v53 }
0x126b   :  { %2788 = vpow2.f32 %v2405_v59 }
0x1274   :  { %v2787_v50 = vpop.eup %2786 }
0x1275   :  { %v2172_v49 = vmul.f32 %v2787_v50, %v2785_v28  ;;  %v2789_v25 = vpop.eup %2788  ;;  %v2171_v11 = vmul.f32 %v2787_v50, %v2108_v63 }
0x1276   :  { %v2168_v1 = vadd.f32 1.0, %v2789_v25 }
0x1277   :  { %2174 = vrot.lane.b32.xlu0 %v2172_v49, %s2891_s2 }
0x1278   :  { %2790 = vrcp.f32 %v2168_v1 }
0x1282   :  { %v2791_v8 = vpop.eup %2790 }
0x12e9   :  { %v2175_v31 = vpop.permute.xlu0 %2174 }
0x12ea   :  { %v2177_v54 = vadd.f32 %v2175_v31, %v2171_v11 }
0x12ec   :  { %2792 = vtanh.f32 %v2177_v54 }
0x12f6   :  { %v2793_v5 = vpop.eup %2792 }
0x12f7   :  { %v2179_v7 = vmul.f32 %v2793_v5, %v2791_v8 }
0x12f9   :  { %v2180_v37 = vpack.c.bf16 %v2179_v7, %v2179_v7 }
0x12fb   :  { %2197 = vrot.lane.b32.xlu1 %v2180_v37, %s2891_s2 }
0x136d   :  { %v2198_v45 = vpop.permute.xlu1 %2197 }
0x136e   :  { %2429 = vmatmul.mubr.msk.bf16.vlgmr.msra.gmra.mrb[52].mxu0 %vm219_vm2, %v2198_v45 }
0x1441   :  { %v2260_v13 = vpop.f32.mrb[52].mxu0 }
0x1442   :  { %v2261_v38 = vadd.f32 %v2406_v36, %v2260_v13  ;;  %v2430_v39 = vpop.f32.mrb[53].mxu0 }
0x1443   :  { %v2263_v42 = vpop.f32.mrb[54].mxu0 }
0x1444   :  { %v2266_v26 = vmax.f32 %v2261_v38, 0.0  ;;  %v2431_v60 = vpop.f32.mrb[55].mxu0 }
0x1446   :  { %v2274_v24 = vmul.f32 %v2412_v6, %v2266_v26 }
0x1448   :  { %v2276_v44 = vsel %vm2275_vm5, %v2274_v24, 0.0 }
0x1449   :  { %2277 = vadd.xlane.f32.xlu0 %v2276_v44 }
0x14d6   :  { %v2278_v9 = vpop.xlane.xlu0 %2277 }
0x14d7   :  { %v2286_v61 = vadd.f32 %v2413_v43, %v2278_v9 }
0x14d9   :  { %v2414_v12 = vmul.f32 -1.442695, %v2286_v61 }
0x14db   :  { %2794 = vpow2.f32 %v2414_v12 }
0x14e5   :  { %v2795_v23 = vpop.eup %2794 }
0x14e6   :  { %v2290_v41 = vadd.f32 1.0, %v2795_v23 }
0x14e8   :  { %2796 = vrcp.f32 %v2290_v41 }
0x14f2   :  { %v2797_v2 = vpop.eup %2796 }
0x14f3   :  { %2294 = vst.msk [vmem:[%s3842_s12] sm:$0x3] %vm2293_vm6, %v2797_v2 }
0x14f4   :  { %2299 = vsyncpa [#allocation4], 1 }
0x14f5   :  { %2300 = vsyncpa [#allocation6], 1 }

</bundles_post_ra>
